<compile_context>
chip_gen: v7x
topology: tpu7x:2x2x1
jax: 0.10.0
libtpu: 0.0.40
codegen_flags: <defaults>
</compile_context>

<pallas_src>
import functools

import numpy as np
import jax
import jax.numpy as jnp
from jax import lax
from jax.experimental import pallas as pl
from jax.experimental.pallas import tpu as pltpu


# ----------------------------------------------------------------------------
# Fused Pallas kernel: both discriminator scales + downsample, one batch
# element per grid step.  Refs: [x, (q,r,b) per conv layer, (pc,pr) per pool,
# one output per conv layer].
# ----------------------------------------------------------------------------
def _fused_msd_kernel(*refs, num_d, layers_per_d, acts, neg_slope):
    n_conv = num_d * layers_per_d
    x_ref = refs[0]
    w_refs = refs[1:1 + 3 * n_conv]
    p_refs = refs[1 + 3 * n_conv:1 + 3 * n_conv + 2 * (num_d - 1)]
    o_refs = refs[1 + 3 * n_conv + 2 * (num_d - 1):]

    xin = x_ref[0, :, :]                       # (H, W*C) current-scale input
    oi = 0
    for g in range(num_d):
        h = xin
        for l in range(layers_per_d):
            base = 3 * (g * layers_per_d + l)
            q_ref, r_ref, b_ref = w_refs[base], w_refs[base + 1], w_refs[base + 2]
            oh = r_ref.shape[1]                # output rows
            n = q_ref.shape[2]                 # OW * OC (lane-flattened)
            acc = jnp.zeros((oh, n), jnp.float32)
            for i in range(4):                 # 4 vertical taps; horizontal taps
                                               # + BN scale are folded into Q_i
                t = jnp.dot(h, q_ref[i], preferred_element_type=jnp.float32)
                acc = acc + jnp.dot(r_ref[i], t, preferred_element_type=jnp.float32)
            y = acc + b_ref[...]               # folded conv bias + BatchNorm shift
            if acts[g][l]:
                y = jnp.maximum(y, neg_slope * y)        # LeakyReLU(0.2)
            o_refs[oi][0, :, :] = y
            oi += 1
            h = y                              # (OH, OW*OC) == next layer's (H, W*C)
        if g != num_d - 1:                     # AvgPool2d(3,2,1, count_include_pad=False)
            pc_ref, pr_ref = p_refs[2 * g], p_refs[2 * g + 1]
            t = jnp.dot(xin, pc_ref[...], preferred_element_type=jnp.float32)
            xin = jnp.dot(pr_ref[...], t, preferred_element_type=jnp.float32)


# ----------------------------------------------------------------------------
# Host-side (init-time) weight folding / selection-matrix construction.
# ----------------------------------------------------------------------------
def _conv_sel_matrices(size, stride):
    """R_i[o, y] = 1 iff tap i of output o reads valid input row y (k=4, pad=2)."""
    out = size // stride + 1
    sel = np.zeros((4, out, size), np.float32)
    for i in range(4):
        for o in range(out):
            y = stride * o - 2 + i
            if 0 <= y < size:
                sel[i, o, y] = 1.0
    return sel, out


def _pool_sel_matrix(size):
    """AvgPool2d(3, stride=2, pad=1, count_include_pad=False), 1-D separable factor."""
    out = (size - 1) // 2 + 1
    a = np.zeros((out, size), np.float32)
    for o in range(out):
        lo, hi = max(2 * o - 1, 0), min(2 * o + 1, size - 1)
        a[o, lo:hi + 1] = 1.0
    a /= a.sum(axis=1, keepdims=True)
    return a, out


def _pack_discriminator(d_raw, h, w):
    """Fold conv weights + eval-BN into the separable matmul form for input (h, w)."""
    layers, feat_shapes = [], []
    for layer in d_raw:
        wgt, scale, bias = layer["w"], layer["scale"], layer["bias"]
        stride = layer["stride"]
        oc_, c_ = wgt.shape[0], wgt.shape[1]
        rsel, oh = _conv_sel_matrices(h, stride)                 # (4, oh, h)
        csel, ow = _conv_sel_matrices(w, stride)                 # (4, ow, w)
        wt = wgt.transpose(2, 3, 1, 0) * scale[None, None, None, :]   # (i, j, c, oc)
        # Q_i[x*C+c, ox*OC+oc] = sum_j csel[j, ox, x] * w[oc, c, i, j] * scale[oc]
        q = np.einsum("jux,ijcq->ixcuq", csel, wt).reshape(4, w * c_, ow * oc_)
        b_row = np.tile(bias, ow).reshape(1, ow * oc_)
        layers.append((jnp.asarray(q), jnp.asarray(rsel), jnp.asarray(b_row)))
        feat_shapes.append((oh, ow, oc_))
        h, w = oh, ow
    return layers, tuple(feat_shapes)


def _pack_pool(h, w, c):
    ar, oh = _pool_sel_matrix(h)
    ac, ow = _pool_sel_matrix(w)
    pc = np.einsum("ux,cd->xcud", ac, np.eye(c, dtype=np.float32)).reshape(w * c, ow * c)
    return jnp.asarray(pc), jnp.asarray(ar), oh, ow


def pack_model(raw_params, num_D, H, W, input_nc):
    """Build all kernel operands, in processing order (finest scale first)."""
    weights_flat, pools_flat, feat_shapes, acts = [], [], [], []
    h, w = H, W
    for i in range(num_D):
        d_raw = raw_params[num_D - 1 - i]                  # pix2pixHD scale ordering
        layers, fshapes = _pack_discriminator(d_raw, h, w)
        for (q, r, b) in layers:
            weights_flat += [q, r, b]
        feat_shapes.append(fshapes)
        acts.append(tuple(l["act"] for l in d_raw))
        if i != num_D - 1:
            pc, pr, oh, ow = _pack_pool(h, w, input_nc)
            pools_flat += [pc, pr]
            h, w = oh, ow
    return dict(weights_flat=weights_flat, pools_flat=pools_flat,
                feat_shapes=tuple(feat_shapes), acts=tuple(acts))


# ----------------------------------------------------------------------------
# Raw parameters (mirror NLayerDiscriminator structure, eval-mode BatchNorm).
# ----------------------------------------------------------------------------
def _layer_defs(input_nc, ndf, n_layers):
    defs = [(input_nc, ndf, 2, False, True)]               # conv + LReLU
    nf = ndf
    for _ in range(1, n_layers):
        nf_prev, nf = nf, min(nf * 2, 512)
        defs.append((nf_prev, nf, 2, True, True))          # conv + BN + LReLU
    nf_prev, nf = nf, min(nf * 2, 512)
    defs.append((nf_prev, nf, 1, True, True))              # conv + BN + LReLU
    defs.append((nf, 1, 1, False, False))                  # final OC=1 conv
    return defs


def init_raw_params(key, input_nc, ndf, n_layers, num_D):
    # TODO(synk): BatchNorm is folded in eval mode (running stats); training-mode
    # batch statistics are not computed in-kernel.
    eps = 1e-5
    defs = _layer_defs(input_nc, ndf, n_layers)
    all_d = []
    for _ in range(num_D):
        d_layers = []
        for (in_c, out_c, stride, has_norm, has_act) in defs:
            key, kw_, kb_, kg_ = jax.random.split(key, 4)
            w = 0.1 * jax.random.normal(kw_, (out_c, in_c, 4, 4), jnp.float32)
            conv_b = 0.1 * jax.random.normal(kb_, (out_c,), jnp.float32)
            if has_norm:
                gamma = 1.0 + 0.1 * jax.random.normal(kg_, (out_c,), jnp.float32)
                beta = jnp.zeros((out_c,), jnp.float32)
                run_mean = jnp.zeros((out_c,), jnp.float32)
                run_var = jnp.ones((out_c,), jnp.float32)
                scale = gamma / jnp.sqrt(run_var + eps)
                bias = (conv_b - run_mean) * scale + beta
            else:
                scale = jnp.ones((out_c,), jnp.float32)
                bias = conv_b
            d_layers.append(dict(w=np.asarray(w), scale=np.asarray(scale),
                                 bias=np.asarray(bias), stride=stride, act=has_act))
        all_d.append(d_layers)
    return all_d


# ----------------------------------------------------------------------------
# Forward: one pallas_call for the whole MultiscaleDiscriminator.
# ----------------------------------------------------------------------------
def _zeros_index_map(ndim):
    def imap(b):
        return (0,) * ndim
    return imap


def render_mouth_d_forward(weights_flat, pools_flat, x_nchw, *, num_D, layers_per_d,
                           acts, feat_shapes, get_interm_feat=True, neg_slope=0.2):
    B, C, H, W = x_nchw.shape
    # NCHW -> NHWC -> (B, H, W*C), once at the model boundary.
    x2d = jnp.transpose(x_nchw, (0, 2, 3, 1)).reshape(B, H, W * C)

    params_flat = list(weights_flat) + list(pools_flat)
    inputs = [x2d] + params_flat

    in_specs = [pl.BlockSpec((1, H, W * C), lambda b: (b, 0, 0))]
    in_specs += [pl.BlockSpec(a.shape, _zeros_index_map(a.ndim)) for a in params_flat]

    out_shapes, out_specs = [], []
    for g in range(num_D):
        for (oh, ow, oc) in feat_shapes[g]:
            out_shapes.append(jax.ShapeDtypeStruct((B, oh, ow * oc), jnp.float32))
            out_specs.append(pl.BlockSpec((1, oh, ow * oc), lambda b: (b, 0, 0)))

    # Advisory cost estimate so XLA schedules the boundary transposes around it.
    flops = 0
    n_conv = num_D * layers_per_d
    for li in range(n_conv):
        q, r = weights_flat[3 * li], weights_flat[3 * li + 1]
        wc, n = q.shape[1], q.shape[2]
        oh, hi = r.shape[1], r.shape[2]
        flops += 4 * 2 * (hi * wc * n + oh * hi * n)
    for pi in range(num_D - 1):
        pc, pr = pools_flat[2 * pi], pools_flat[2 * pi + 1]
        wc, nc = pc.shape
        ohp, hi = pr.shape
        flops += 2 * (hi * wc * nc + ohp * hi * nc)
    flops *= B
    bytes_accessed = sum(int(np.prod(a.shape)) * 4 for a in inputs)
    bytes_accessed += sum(int(np.prod(s.shape)) * 4 for s in out_shapes)

    outs = pl.pallas_call(
        functools.partial(_fused_msd_kernel, num_d=num_D, layers_per_d=layers_per_d,
                          acts=acts, neg_slope=neg_slope),
        grid=(B,),
        in_specs=in_specs,
        out_specs=out_specs,
        out_shape=tuple(out_shapes),
        compiler_params=pltpu.CompilerParams(dimension_semantics=("parallel",)),
        cost_estimate=pl.CostEstimate(flops=int(flops), transcendentals=0,
                                      bytes_accessed=int(bytes_accessed)),
    )(*inputs)

    # Per-feature (B, OH, OW*OC) -> NCHW, after the kernel (off the layer chain).
    results, k = [], 0
    for g in range(num_D):
        feats = []
        for (oh, ow, oc) in feat_shapes[g]:
            feats.append(outs[k].reshape(B, oh, ow, oc).transpose(0, 3, 1, 2))
            k += 1
        results.append(feats if get_interm_feat else [feats[-1]])
    return results


# ----------------------------------------------------------------------------
# Pure-JAX reference (for correctness checking only).
# ----------------------------------------------------------------------------
def reference_forward(raw_params, x_nchw, num_D):
    x = jnp.transpose(x_nchw, (0, 2, 3, 1))
    results, xd = [], x
    for i in range(num_D):
        d = raw_params[num_D - 1 - i]
        feats, h = [], xd
        for layer in d:
            wio = jnp.transpose(jnp.asarray(layer["w"]), (2, 3, 1, 0))   # HWIO
            s = layer["stride"]
            y = lax.conv_general_dilated(
                h, wio, window_strides=(s, s), padding=((2, 2), (2, 2)),
                dimension_numbers=("NHWC", "HWIO", "NHWC"))
            y = y * jnp.asarray(layer["scale"]) + jnp.asarray(layer["bias"])
            if layer["act"]:
                y = jnp.where(y >= 0, y, 0.2 * y)
            feats.append(jnp.transpose(y, (0, 3, 1, 2)))
            h = y
        results.append(feats)
        if i != num_D - 1:
            ssum = lax.reduce_window(xd, 0.0, lax.add, (1, 3, 3, 1), (1, 2, 2, 1),
                                     ((0, 0), (1, 1), (1, 1), (0, 0)))
            cnt = lax.reduce_window(jnp.ones_like(xd), 0.0, lax.add,
                                    (1, 3, 3, 1), (1, 2, 2, 1),
                                    ((0, 0), (1, 1), (1, 1), (0, 0)))
            xd = ssum / cnt
    return results


if __name__ == "__main__":
    # opt: ndf=8, n_layers_D=2, num_D=2, no_ganFeat=False, use_example=1, fp16=False
    ndf, n_layers_D, num_D, use_example = 8, 2, 2, 1
    n_face, n_mesh = 3, 3
    input_nc = n_face + n_mesh + n_face * use_example          # = 9
    B, H, W = 2, 16, 16
    layers_per_d = n_layers_D + 2

    key = jax.random.PRNGKey(0)
    key, kx = jax.random.split(key)
    x = jax.random.normal(kx, (B, input_nc, H, W), jnp.float32)

    raw = init_raw_params(key, input_nc, ndf, n_layers_D, num_D)
    packed = pack_model(raw, num_D, H, W, input_nc)

    fwd = jax.jit(functools.partial(
        render_mouth_d_forward, num_D=num_D, layers_per_d=layers_per_d,
        acts=packed["acts"], feat_shapes=packed["feat_shapes"]))

    preds = fwd(packed["weights_flat"], packed["pools_flat"], x)
    preds = jax.block_until_ready(preds)

    # structural sanity: num_D scales x (n_layers_D + 2) features each, OC=1 heads
    assert len(preds) == num_D
    assert all(len(feats) == layers_per_d for feats in preds)
    assert preds[0][-1].shape[1] == 1 and preds[1][-1].shape[1] == 1
    assert all(bool(jnp.all(jnp.isfinite(f))) for feats in preds for f in feats)

    # numerical check against the pure-JAX reference
    ref = reference_forward(raw, x, num_D)
    for g in range(num_D):
        for l in range(layers_per_d):
            assert preds[g][l].shape == ref[g][l].shape
            np.testing.assert_allclose(np.asarray(preds[g][l]), np.asarray(ref[g][l]),
                                       rtol=5e-2, atol=5e-3)

    print("KERNEL_OK")
</pallas_src>

<mosaic_0001>
module attributes {stable_mosaic.version = 11 : i64} {
  func.func @_fused_msd_kernel(%arg0: i32, %arg1: memref<1x16x144xf32, #tpu.memory_space<vmem>>, %arg2: memref<4x144x72xf32, #tpu.memory_space<vmem>>, %arg3: memref<4x9x16xf32, #tpu.memory_space<vmem>>, %arg4: memref<1x72xf32, #tpu.memory_space<vmem>>, %arg5: memref<4x72x80xf32, #tpu.memory_space<vmem>>, %arg6: memref<4x5x9xf32, #tpu.memory_space<vmem>>, %arg7: memref<1x80xf32, #tpu.memory_space<vmem>>, %arg8: memref<4x80x192xf32, #tpu.memory_space<vmem>>, %arg9: memref<4x6x5xf32, #tpu.memory_space<vmem>>, %arg10: memref<1x192xf32, #tpu.memory_space<vmem>>, %arg11: memref<4x192x7xf32, #tpu.memory_space<vmem>>, %arg12: memref<4x7x6xf32, #tpu.memory_space<vmem>>, %arg13: memref<1x7xf32, #tpu.memory_space<vmem>>, %arg14: memref<4x72x40xf32, #tpu.memory_space<vmem>>, %arg15: memref<4x5x8xf32, #tpu.memory_space<vmem>>, %arg16: memref<1x40xf32, #tpu.memory_space<vmem>>, %arg17: memref<4x40x48xf32, #tpu.memory_space<vmem>>, %arg18: memref<4x3x5xf32, #tpu.memory_space<vmem>>, %arg19: memref<1x48xf32, #tpu.memory_space<vmem>>, %arg20: memref<4x48x128xf32, #tpu.memory_space<vmem>>, %arg21: memref<4x4x3xf32, #tpu.memory_space<vmem>>, %arg22: memref<1x128xf32, #tpu.memory_space<vmem>>, %arg23: memref<4x128x5xf32, #tpu.memory_space<vmem>>, %arg24: memref<4x5x4xf32, #tpu.memory_space<vmem>>, %arg25: memref<1x5xf32, #tpu.memory_space<vmem>>, %arg26: memref<144x72xf32, #tpu.memory_space<vmem>>, %arg27: memref<8x16xf32, #tpu.memory_space<vmem>>, %arg28: memref<1x9x72xf32, #tpu.memory_space<vmem>>, %arg29: memref<1x5x80xf32, #tpu.memory_space<vmem>>, %arg30: memref<1x6x192xf32, #tpu.memory_space<vmem>>, %arg31: memref<1x7x7xf32, #tpu.memory_space<vmem>>, %arg32: memref<1x5x40xf32, #tpu.memory_space<vmem>>, %arg33: memref<1x3x48xf32, #tpu.memory_space<vmem>>, %arg34: memref<1x4x128xf32, #tpu.memory_space<vmem>>, %arg35: memref<1x5x5xf32, #tpu.memory_space<vmem>>) attributes {dimension_semantics = [#tpu.dimension_semantics<parallel>], iteration_bounds = array<i64: 2>, scalar_prefetch = 0 : i64, scratch_operands = 0 : i64, tpu.core_type = #tpu.core_type<tc>, window_params = [{transform_indices = @transform_0, window_bounds = array<i64: 1, 16, 144>}, {pipeline_mode = #tpu.pipeline_mode<synchronous>, transform_indices = @transform_1, window_bounds = array<i64: 4, 144, 72>}, {pipeline_mode = #tpu.pipeline_mode<synchronous>, transform_indices = @transform_2, window_bounds = array<i64: 4, 9, 16>}, {pipeline_mode = #tpu.pipeline_mode<synchronous>, transform_indices = @transform_3, window_bounds = array<i64: 1, 72>}, {pipeline_mode = #tpu.pipeline_mode<synchronous>, transform_indices = @transform_4, window_bounds = array<i64: 4, 72, 80>}, {pipeline_mode = #tpu.pipeline_mode<synchronous>, transform_indices = @transform_5, window_bounds = array<i64: 4, 5, 9>}, {pipeline_mode = #tpu.pipeline_mode<synchronous>, transform_indices = @transform_6, window_bounds = array<i64: 1, 80>}, {pipeline_mode = #tpu.pipeline_mode<synchronous>, transform_indices = @transform_7, window_bounds = array<i64: 4, 80, 192>}, {pipeline_mode = #tpu.pipeline_mode<synchronous>, transform_indices = @transform_8, window_bounds = array<i64: 4, 6, 5>}, {pipeline_mode = #tpu.pipeline_mode<synchronous>, transform_indices = @transform_9, window_bounds = array<i64: 1, 192>}, {pipeline_mode = #tpu.pipeline_mode<synchronous>, transform_indices = @transform_10, window_bounds = array<i64: 4, 192, 7>}, {pipeline_mode = #tpu.pipeline_mode<synchronous>, transform_indices = @transform_11, window_bounds = array<i64: 4, 7, 6>}, {pipeline_mode = #tpu.pipeline_mode<synchronous>, transform_indices = @transform_12, window_bounds = array<i64: 1, 7>}, {pipeline_mode = #tpu.pipeline_mode<synchronous>, transform_indices = @transform_13, window_bounds = array<i64: 4, 72, 40>}, {pipeline_mode = #tpu.pipeline_mode<synchronous>, transform_indices = @transform_14, window_bounds = array<i64: 4, 5, 8>}, {pipeline_mode = #tpu.pipeline_mode<synchronous>, transform_indices = @transform_15, window_bounds = array<i64: 1, 40>}, {pipeline_mode = #tpu.pipeline_mode<synchronous>, transform_indices = @transform_16, window_bounds = array<i64: 4, 40, 48>}, {pipeline_mode = #tpu.pipeline_mode<synchronous>, transform_indices = @transform_17, window_bounds = array<i64: 4, 3, 5>}, {pipeline_mode = #tpu.pipeline_mode<synchronous>, transform_indices = @transform_18, window_bounds = array<i64: 1, 48>}, {pipeline_mode = #tpu.pipeline_mode<synchronous>, transform_indices = @transform_19, window_bounds = array<i64: 4, 48, 128>}, {pipeline_mode = #tpu.pipeline_mode<synchronous>, transform_indices = @transform_20, window_bounds = array<i64: 4, 4, 3>}, {pipeline_mode = #tpu.pipeline_mode<synchronous>, transform_indices = @transform_21, window_bounds = array<i64: 1, 128>}, {pipeline_mode = #tpu.pipeline_mode<synchronous>, transform_indices = @transform_22, window_bounds = array<i64: 4, 128, 5>}, {pipeline_mode = #tpu.pipeline_mode<synchronous>, transform_indices = @transform_23, window_bounds = array<i64: 4, 5, 4>}, {pipeline_mode = #tpu.pipeline_mode<synchronous>, transform_indices = @transform_24, window_bounds = array<i64: 1, 5>}, {pipeline_mode = #tpu.pipeline_mode<synchronous>, transform_indices = @transform_25, window_bounds = array<i64: 144, 72>}, {pipeline_mode = #tpu.pipeline_mode<synchronous>, transform_indices = @transform_26, window_bounds = array<i64: 8, 16>}, {transform_indices = @transform_27, window_bounds = array<i64: 1, 9, 72>}, {transform_indices = @transform_28, window_bounds = array<i64: 1, 5, 80>}, {transform_indices = @transform_29, window_bounds = array<i64: 1, 6, 192>}, {transform_indices = @transform_30, window_bounds = array<i64: 1, 7, 7>}, {transform_indices = @transform_31, window_bounds = array<i64: 1, 5, 40>}, {transform_indices = @transform_32, window_bounds = array<i64: 1, 3, 48>}, {transform_indices = @transform_33, window_bounds = array<i64: 1, 4, 128>}, {transform_indices = @transform_34, window_bounds = array<i64: 1, 5, 5>}]} {
    %c0 = arith.constant 0 : index
    %c0_0 = arith.constant 0 : index
    %c0_1 = arith.constant 0 : index
    %0 = vector.load %arg1[%c0, %c0_0, %c0_1] : memref<1x16x144xf32, #tpu.memory_space<vmem>>, vector<1x16x144xf32>
    %1 = vector.shape_cast %0 : vector<1x16x144xf32> to vector<16x144xf32>
    %cst = arith.constant 0.000000e+00 : f32
    %2 = vector.broadcast %cst : f32 to vector<9x72xf32>
    %c0_2 = arith.constant 0 : index
    %c0_3 = arith.constant 0 : index
    %c0_4 = arith.constant 0 : index
    %3 = vector.load %arg2[%c0_2, %c0_3, %c0_4] : memref<4x144x72xf32, #tpu.memory_space<vmem>>, vector<1x144x72xf32>
    %4 = vector.shape_cast %3 : vector<1x144x72xf32> to vector<144x72xf32>
    %cst_5 = arith.constant dense<0.000000e+00> : vector<16x72xf32>
    %5 = tpu.matmul %1, %4, %cst_5 {dimension_numbers = #tpu.dot_dimension_numbers<[1], [0], [0], [1], [0, 0, 1, 1], [], []>} : vector<16x144xf32>, vector<144x72xf32>, vector<16x72xf32> -> vector<16x72xf32>
    %c0_6 = arith.constant 0 : index
    %c0_7 = arith.constant 0 : index
    %c0_8 = arith.constant 0 : index
    %6 = vector.load %arg3[%c0_6, %c0_7, %c0_8] : memref<4x9x16xf32, #tpu.memory_space<vmem>>, vector<1x9x16xf32>
    %7 = vector.shape_cast %6 : vector<1x9x16xf32> to vector<9x16xf32>
    %cst_9 = arith.constant dense<0.000000e+00> : vector<9x72xf32>
    %8 = tpu.matmul %7, %5, %cst_9 {dimension_numbers = #tpu.dot_dimension_numbers<[1], [0], [0], [1], [0, 0, 1, 1], [], []>} : vector<9x16xf32>, vector<16x72xf32>, vector<9x72xf32> -> vector<9x72xf32>
    %9 = arith.addf %2, %8 : vector<9x72xf32>
    %c1 = arith.constant 1 : index
    %c0_10 = arith.constant 0 : index
    %c0_11 = arith.constant 0 : index
    %10 = vector.load %arg2[%c1, %c0_10, %c0_11] : memref<4x144x72xf32, #tpu.memory_space<vmem>>, vector<1x144x72xf32>
    %11 = vector.shape_cast %10 : vector<1x144x72xf32> to vector<144x72xf32>
    %cst_12 = arith.constant dense<0.000000e+00> : vector<16x72xf32>
    %12 = tpu.matmul %1, %11, %cst_12 {dimension_numbers = #tpu.dot_dimension_numbers<[1], [0], [0], [1], [0, 0, 1, 1], [], []>} : vector<16x144xf32>, vector<144x72xf32>, vector<16x72xf32> -> vector<16x72xf32>
    %c1_13 = arith.constant 1 : index
    %c0_14 = arith.constant 0 : index
    %c0_15 = arith.constant 0 : index
    %13 = vector.load %arg3[%c1_13, %c0_14, %c0_15] : memref<4x9x16xf32, #tpu.memory_space<vmem>>, vector<1x9x16xf32>
    %14 = vector.shape_cast %13 : vector<1x9x16xf32> to vector<9x16xf32>
    %cst_16 = arith.constant dense<0.000000e+00> : vector<9x72xf32>
    %15 = tpu.matmul %14, %12, %cst_16 {dimension_numbers = #tpu.dot_dimension_numbers<[1], [0], [0], [1], [0, 0, 1, 1], [], []>} : vector<9x16xf32>, vector<16x72xf32>, vector<9x72xf32> -> vector<9x72xf32>
    %16 = arith.addf %9, %15 : vector<9x72xf32>
    %c2 = arith.constant 2 : index
    %c0_17 = arith.constant 0 : index
    %c0_18 = arith.constant 0 : index
    %17 = vector.load %arg2[%c2, %c0_17, %c0_18] : memref<4x144x72xf32, #tpu.memory_space<vmem>>, vector<1x144x72xf32>
    %18 = vector.shape_cast %17 : vector<1x144x72xf32> to vector<144x72xf32>
    %cst_19 = arith.constant dense<0.000000e+00> : vector<16x72xf32>
    %19 = tpu.matmul %1, %18, %cst_19 {dimension_numbers = #tpu.dot_dimension_numbers<[1], [0], [0], [1], [0, 0, 1, 1], [], []>} : vector<16x144xf32>, vector<144x72xf32>, vector<16x72xf32> -> vector<16x72xf32>
    %c2_20 = arith.constant 2 : index
    %c0_21 = arith.constant 0 : index
    %c0_22 = arith.constant 0 : index
    %20 = vector.load %arg3[%c2_20, %c0_21, %c0_22] : memref<4x9x16xf32, #tpu.memory_space<vmem>>, vector<1x9x16xf32>
    %21 = vector.shape_cast %20 : vector<1x9x16xf32> to vector<9x16xf32>
    %cst_23 = arith.constant dense<0.000000e+00> : vector<9x72xf32>
    %22 = tpu.matmul %21, %19, %cst_23 {dimension_numbers = #tpu.dot_dimension_numbers<[1], [0], [0], [1], [0, 0, 1, 1], [], []>} : vector<9x16xf32>, vector<16x72xf32>, vector<9x72xf32> -> vector<9x72xf32>
    %23 = arith.addf %16, %22 : vector<9x72xf32>
    %c3 = arith.constant 3 : index
    %c0_24 = arith.constant 0 : index
    %c0_25 = arith.constant 0 : index
    %24 = vector.load %arg2[%c3, %c0_24, %c0_25] : memref<4x144x72xf32, #tpu.memory_space<vmem>>, vector<1x144x72xf32>
    %25 = vector.shape_cast %24 : vector<1x144x72xf32> to vector<144x72xf32>
    %cst_26 = arith.constant dense<0.000000e+00> : vector<16x72xf32>
    %26 = tpu.matmul %1, %25, %cst_26 {dimension_numbers = #tpu.dot_dimension_numbers<[1], [0], [0], [1], [0, 0, 1, 1], [], []>} : vector<16x144xf32>, vector<144x72xf32>, vector<16x72xf32> -> vector<16x72xf32>
    %c3_27 = arith.constant 3 : index
    %c0_28 = arith.constant 0 : index
    %c0_29 = arith.constant 0 : index
    %27 = vector.load %arg3[%c3_27, %c0_28, %c0_29] : memref<4x9x16xf32, #tpu.memory_space<vmem>>, vector<1x9x16xf32>
    %28 = vector.shape_cast %27 : vector<1x9x16xf32> to vector<9x16xf32>
    %cst_30 = arith.constant dense<0.000000e+00> : vector<9x72xf32>
    %29 = tpu.matmul %28, %26, %cst_30 {dimension_numbers = #tpu.dot_dimension_numbers<[1], [0], [0], [1], [0, 0, 1, 1], [], []>} : vector<9x16xf32>, vector<16x72xf32>, vector<9x72xf32> -> vector<9x72xf32>
    %30 = arith.addf %23, %29 : vector<9x72xf32>
    %c0_31 = arith.constant 0 : index
    %c0_32 = arith.constant 0 : index
    %31 = vector.load %arg4[%c0_31, %c0_32] : memref<1x72xf32, #tpu.memory_space<vmem>>, vector<1x72xf32>
    %32 = vector.broadcast %31 : vector<1x72xf32> to vector<9x72xf32>
    %33 = arith.addf %30, %32 : vector<9x72xf32>
    %cst_33 = arith.constant 2.000000e-01 : f32
    %34 = vector.broadcast %cst_33 : f32 to vector<9x72xf32>
    %35 = arith.mulf %34, %33 : vector<9x72xf32>
    %36 = arith.maximumf %33, %35 : vector<9x72xf32>
    %c0_34 = arith.constant 0 : index
    %c0_35 = arith.constant 0 : index
    %c0_36 = arith.constant 0 : index
    %37 = vector.load %arg28[%c0_34, %c0_35, %c0_36] : memref<1x9x72xf32, #tpu.memory_space<vmem>>, vector<1x9x72xf32>
    %38 = vector.shape_cast %37 : vector<1x9x72xf32> to vector<9x72xf32>
    %39 = vector.shape_cast %36 : vector<9x72xf32> to vector<1x9x72xf32>
    tpu.vector_store %arg28[%c0_34, %c0_35, %c0_36], %39 {strides = array<i32>} : memref<1x9x72xf32, #tpu.memory_space<vmem>>, vector<1x9x72xf32>,
    %cst_37 = arith.constant 0.000000e+00 : f32
    %40 = vector.broadcast %cst_37 : f32 to vector<5x80xf32>
    %c0_38 = arith.constant 0 : index
    %c0_39 = arith.constant 0 : index
    %c0_40 = arith.constant 0 : index
    %41 = vector.load %arg5[%c0_38, %c0_39, %c0_40] : memref<4x72x80xf32, #tpu.memory_space<vmem>>, vector<1x72x80xf32>
    %42 = vector.shape_cast %41 : vector<1x72x80xf32> to vector<72x80xf32>
    %cst_41 = arith.constant dense<0.000000e+00> : vector<9x80xf32>
    %43 = tpu.matmul %36, %42, %cst_41 {dimension_numbers = #tpu.dot_dimension_numbers<[1], [0], [0], [1], [0, 0, 1, 1], [], []>} : vector<9x72xf32>, vector<72x80xf32>, vector<9x80xf32> -> vector<9x80xf32>
    %c0_42 = arith.constant 0 : index
    %c0_43 = arith.constant 0 : index
    %c0_44 = arith.constant 0 : index
    %44 = vector.load %arg6[%c0_42, %c0_43, %c0_44] : memref<4x5x9xf32, #tpu.memory_space<vmem>>, vector<1x5x9xf32>
    %45 = vector.shape_cast %44 : vector<1x5x9xf32> to vector<5x9xf32>
    %cst_45 = arith.constant dense<0.000000e+00> : vector<5x80xf32>
    %46 = tpu.matmul %45, %43, %cst_45 {dimension_numbers = #tpu.dot_dimension_numbers<[1], [0], [0], [1], [0, 0, 1, 1], [], []>} : vector<5x9xf32>, vector<9x80xf32>, vector<5x80xf32> -> vector<5x80xf32>
    %47 = arith.addf %40, %46 : vector<5x80xf32>
    %c1_46 = arith.constant 1 : index
    %c0_47 = arith.constant 0 : index
    %c0_48 = arith.constant 0 : index
    %48 = vector.load %arg5[%c1_46, %c0_47, %c0_48] : memref<4x72x80xf32, #tpu.memory_space<vmem>>, vector<1x72x80xf32>
    %49 = vector.shape_cast %48 : vector<1x72x80xf32> to vector<72x80xf32>
    %cst_49 = arith.constant dense<0.000000e+00> : vector<9x80xf32>
    %50 = tpu.matmul %36, %49, %cst_49 {dimension_numbers = #tpu.dot_dimension_numbers<[1], [0], [0], [1], [0, 0, 1, 1], [], []>} : vector<9x72xf32>, vector<72x80xf32>, vector<9x80xf32> -> vector<9x80xf32>
    %c1_50 = arith.constant 1 : index
    %c0_51 = arith.constant 0 : index
    %c0_52 = arith.constant 0 : index
    %51 = vector.load %arg6[%c1_50, %c0_51, %c0_52] : memref<4x5x9xf32, #tpu.memory_space<vmem>>, vector<1x5x9xf32>
    %52 = vector.shape_cast %51 : vector<1x5x9xf32> to vector<5x9xf32>
    %cst_53 = arith.constant dense<0.000000e+00> : vector<5x80xf32>
    %53 = tpu.matmul %52, %50, %cst_53 {dimension_numbers = #tpu.dot_dimension_numbers<[1], [0], [0], [1], [0, 0, 1, 1], [], []>} : vector<5x9xf32>, vector<9x80xf32>, vector<5x80xf32> -> vector<5x80xf32>
    %54 = arith.addf %47, %53 : vector<5x80xf32>
    %c2_54 = arith.constant 2 : index
    %c0_55 = arith.constant 0 : index
    %c0_56 = arith.constant 0 : index
    %55 = vector.load %arg5[%c2_54, %c0_55, %c0_56] : memref<4x72x80xf32, #tpu.memory_space<vmem>>, vector<1x72x80xf32>
    %56 = vector.shape_cast %55 : vector<1x72x80xf32> to vector<72x80xf32>
    %cst_57 = arith.constant dense<0.000000e+00> : vector<9x80xf32>
    %57 = tpu.matmul %36, %56, %cst_57 {dimension_numbers = #tpu.dot_dimension_numbers<[1], [0], [0], [1], [0, 0, 1, 1], [], []>} : vector<9x72xf32>, vector<72x80xf32>, vector<9x80xf32> -> vector<9x80xf32>
    %c2_58 = arith.constant 2 : index
    %c0_59 = arith.constant 0 : index
    %c0_60 = arith.constant 0 : index
    %58 = vector.load %arg6[%c2_58, %c0_59, %c0_60] : memref<4x5x9xf32, #tpu.memory_space<vmem>>, vector<1x5x9xf32>
    %59 = vector.shape_cast %58 : vector<1x5x9xf32> to vector<5x9xf32>
    %cst_61 = arith.constant dense<0.000000e+00> : vector<5x80xf32>
    %60 = tpu.matmul %59, %57, %cst_61 {dimension_numbers = #tpu.dot_dimension_numbers<[1], [0], [0], [1], [0, 0, 1, 1], [], []>} : vector<5x9xf32>, vector<9x80xf32>, vector<5x80xf32> -> vector<5x80xf32>
    %61 = arith.addf %54, %60 : vector<5x80xf32>
    %c3_62 = arith.constant 3 : index
    %c0_63 = arith.constant 0 : index
    %c0_64 = arith.constant 0 : index
    %62 = vector.load %arg5[%c3_62, %c0_63, %c0_64] : memref<4x72x80xf32, #tpu.memory_space<vmem>>, vector<1x72x80xf32>
    %63 = vector.shape_cast %62 : vector<1x72x80xf32> to vector<72x80xf32>
    %cst_65 = arith.constant dense<0.000000e+00> : vector<9x80xf32>
    %64 = tpu.matmul %36, %63, %cst_65 {dimension_numbers = #tpu.dot_dimension_numbers<[1], [0], [0], [1], [0, 0, 1, 1], [], []>} : vector<9x72xf32>, vector<72x80xf32>, vector<9x80xf32> -> vector<9x80xf32>
    %c3_66 = arith.constant 3 : index
    %c0_67 = arith.constant 0 : index
    %c0_68 = arith.constant 0 : index
    %65 = vector.load %arg6[%c3_66, %c0_67, %c0_68] : memref<4x5x9xf32, #tpu.memory_space<vmem>>, vector<1x5x9xf32>
    %66 = vector.shape_cast %65 : vector<1x5x9xf32> to vector<5x9xf32>
    %cst_69 = arith.constant dense<0.000000e+00> : vector<5x80xf32>
    %67 = tpu.matmul %66, %64, %cst_69 {dimension_numbers = #tpu.dot_dimension_numbers<[1], [0], [0], [1], [0, 0, 1, 1], [], []>} : vector<5x9xf32>, vector<9x80xf32>, vector<5x80xf32> -> vector<5x80xf32>
    %68 = arith.addf %61, %67 : vector<5x80xf32>
    %c0_70 = arith.constant 0 : index
    %c0_71 = arith.constant 0 : index
    %69 = vector.load %arg7[%c0_70, %c0_71] : memref<1x80xf32, #tpu.memory_space<vmem>>, vector<1x80xf32>
    %70 = vector.broadcast %69 : vector<1x80xf32> to vector<5x80xf32>
    %71 = arith.addf %68, %70 : vector<5x80xf32>
    %cst_72 = arith.constant 2.000000e-01 : f32
    %72 = vector.broadcast %cst_72 : f32 to vector<5x80xf32>
    %73 = arith.mulf %72, %71 : vector<5x80xf32>
    %74 = arith.maximumf %71, %73 : vector<5x80xf32>
    %c0_73 = arith.constant 0 : index
    %c0_74 = arith.constant 0 : index
    %c0_75 = arith.constant 0 : index
    %75 = vector.load %arg29[%c0_73, %c0_74, %c0_75] : memref<1x5x80xf32, #tpu.memory_space<vmem>>, vector<1x5x80xf32>
    %76 = vector.shape_cast %75 : vector<1x5x80xf32> to vector<5x80xf32>
    %77 = vector.shape_cast %74 : vector<5x80xf32> to vector<1x5x80xf32>
    tpu.vector_store %arg29[%c0_73, %c0_74, %c0_75], %77 {strides = array<i32>} : memref<1x5x80xf32, #tpu.memory_space<vmem>>, vector<1x5x80xf32>,
    %cst_76 = arith.constant 0.000000e+00 : f32
    %78 = vector.broadcast %cst_76 : f32 to vector<6x192xf32>
    %c0_77 = arith.constant 0 : index
    %c0_78 = arith.constant 0 : index
    %c0_79 = arith.constant 0 : index
    %79 = vector.load %arg8[%c0_77, %c0_78, %c0_79] : memref<4x80x192xf32, #tpu.memory_space<vmem>>, vector<1x80x192xf32>
    %80 = vector.shape_cast %79 : vector<1x80x192xf32> to vector<80x192xf32>
    %cst_80 = arith.constant dense<0.000000e+00> : vector<5x192xf32>
    %81 = tpu.matmul %74, %80, %cst_80 {dimension_numbers = #tpu.dot_dimension_numbers<[1], [0], [0], [1], [0, 0, 1, 1], [], []>} : vector<5x80xf32>, vector<80x192xf32>, vector<5x192xf32> -> vector<5x192xf32>
    %c0_81 = arith.constant 0 : index
    %c0_82 = arith.constant 0 : index
    %c0_83 = arith.constant 0 : index
    %82 = vector.load %arg9[%c0_81, %c0_82, %c0_83] : memref<4x6x5xf32, #tpu.memory_space<vmem>>, vector<1x6x5xf32>
    %83 = vector.shape_cast %82 : vector<1x6x5xf32> to vector<6x5xf32>
    %cst_84 = arith.constant dense<0.000000e+00> : vector<6x192xf32>
    %84 = tpu.matmul %83, %81, %cst_84 {dimension_numbers = #tpu.dot_dimension_numbers<[1], [0], [0], [1], [0, 0, 1, 1], [], []>} : vector<6x5xf32>, vector<5x192xf32>, vector<6x192xf32> -> vector<6x192xf32>
    %85 = arith.addf %78, %84 : vector<6x192xf32>
    %c1_85 = arith.constant 1 : index
    %c0_86 = arith.constant 0 : index
    %c0_87 = arith.constant 0 : index
    %86 = vector.load %arg8[%c1_85, %c0_86, %c0_87] : memref<4x80x192xf32, #tpu.memory_space<vmem>>, vector<1x80x192xf32>
    %87 = vector.shape_cast %86 : vector<1x80x192xf32> to vector<80x192xf32>
    %cst_88 = arith.constant dense<0.000000e+00> : vector<5x192xf32>
    %88 = tpu.matmul %74, %87, %cst_88 {dimension_numbers = #tpu.dot_dimension_numbers<[1], [0], [0], [1], [0, 0, 1, 1], [], []>} : vector<5x80xf32>, vector<80x192xf32>, vector<5x192xf32> -> vector<5x192xf32>
    %c1_89 = arith.constant 1 : index
    %c0_90 = arith.constant 0 : index
    %c0_91 = arith.constant 0 : index
    %89 = vector.load %arg9[%c1_89, %c0_90, %c0_91] : memref<4x6x5xf32, #tpu.memory_space<vmem>>, vector<1x6x5xf32>
    %90 = vector.shape_cast %89 : vector<1x6x5xf32> to vector<6x5xf32>
    %cst_92 = arith.constant dense<0.000000e+00> : vector<6x192xf32>
    %91 = tpu.matmul %90, %88, %cst_92 {dimension_numbers = #tpu.dot_dimension_numbers<[1], [0], [0], [1], [0, 0, 1, 1], [], []>} : vector<6x5xf32>, vector<5x192xf32>, vector<6x192xf32> -> vector<6x192xf32>
    %92 = arith.addf %85, %91 : vector<6x192xf32>
    %c2_93 = arith.constant 2 : index
    %c0_94 = arith.constant 0 : index
    %c0_95 = arith.constant 0 : index
    %93 = vector.load %arg8[%c2_93, %c0_94, %c0_95] : memref<4x80x192xf32, #tpu.memory_space<vmem>>, vector<1x80x192xf32>
    %94 = vector.shape_cast %93 : vector<1x80x192xf32> to vector<80x192xf32>
    %cst_96 = arith.constant dense<0.000000e+00> : vector<5x192xf32>
    %95 = tpu.matmul %74, %94, %cst_96 {dimension_numbers = #tpu.dot_dimension_numbers<[1], [0], [0], [1], [0, 0, 1, 1], [], []>} : vector<5x80xf32>, vector<80x192xf32>, vector<5x192xf32> -> vector<5x192xf32>
    %c2_97 = arith.constant 2 : index
    %c0_98 = arith.constant 0 : index
    %c0_99 = arith.constant 0 : index
    %96 = vector.load %arg9[%c2_97, %c0_98, %c0_99] : memref<4x6x5xf32, #tpu.memory_space<vmem>>, vector<1x6x5xf32>
    %97 = vector.shape_cast %96 : vector<1x6x5xf32> to vector<6x5xf32>
    %cst_100 = arith.constant dense<0.000000e+00> : vector<6x192xf32>
    %98 = tpu.matmul %97, %95, %cst_100 {dimension_numbers = #tpu.dot_dimension_numbers<[1], [0], [0], [1], [0, 0, 1, 1], [], []>} : vector<6x5xf32>, vector<5x192xf32>, vector<6x192xf32> -> vector<6x192xf32>
    %99 = arith.addf %92, %98 : vector<6x192xf32>
    %c3_101 = arith.constant 3 : index
    %c0_102 = arith.constant 0 : index
    %c0_103 = arith.constant 0 : index
    %100 = vector.load %arg8[%c3_101, %c0_102, %c0_103] : memref<4x80x192xf32, #tpu.memory_space<vmem>>, vector<1x80x192xf32>
    %101 = vector.shape_cast %100 : vector<1x80x192xf32> to vector<80x192xf32>
    %cst_104 = arith.constant dense<0.000000e+00> : vector<5x192xf32>
    %102 = tpu.matmul %74, %101, %cst_104 {dimension_numbers = #tpu.dot_dimension_numbers<[1], [0], [0], [1], [0, 0, 1, 1], [], []>} : vector<5x80xf32>, vector<80x192xf32>, vector<5x192xf32> -> vector<5x192xf32>
    %c3_105 = arith.constant 3 : index
    %c0_106 = arith.constant 0 : index
    %c0_107 = arith.constant 0 : index
    %103 = vector.load %arg9[%c3_105, %c0_106, %c0_107] : memref<4x6x5xf32, #tpu.memory_space<vmem>>, vector<1x6x5xf32>
    %104 = vector.shape_cast %103 : vector<1x6x5xf32> to vector<6x5xf32>
    %cst_108 = arith.constant dense<0.000000e+00> : vector<6x192xf32>
    %105 = tpu.matmul %104, %102, %cst_108 {dimension_numbers = #tpu.dot_dimension_numbers<[1], [0], [0], [1], [0, 0, 1, 1], [], []>} : vector<6x5xf32>, vector<5x192xf32>, vector<6x192xf32> -> vector<6x192xf32>
    %106 = arith.addf %99, %105 : vector<6x192xf32>
    %c0_109 = arith.constant 0 : index
    %c0_110 = arith.constant 0 : index
    %107 = vector.load %arg10[%c0_109, %c0_110] : memref<1x192xf32, #tpu.memory_space<vmem>>, vector<1x192xf32>
    %108 = vector.broadcast %107 : vector<1x192xf32> to vector<6x192xf32>
    %109 = arith.addf %106, %108 : vector<6x192xf32>
    %cst_111 = arith.constant 2.000000e-01 : f32
    %110 = vector.broadcast %cst_111 : f32 to vector<6x192xf32>
    %111 = arith.mulf %110, %109 : vector<6x192xf32>
    %112 = arith.maximumf %109, %111 : vector<6x192xf32>
    %c0_112 = arith.constant 0 : index
    %c0_113 = arith.constant 0 : index
    %c0_114 = arith.constant 0 : index
    %113 = vector.load %arg30[%c0_112, %c0_113, %c0_114] : memref<1x6x192xf32, #tpu.memory_space<vmem>>, vector<1x6x192xf32>
    %114 = vector.shape_cast %113 : vector<1x6x192xf32> to vector<6x192xf32>
    %115 = vector.shape_cast %112 : vector<6x192xf32> to vector<1x6x192xf32>
    tpu.vector_store %arg30[%c0_112, %c0_113, %c0_114], %115 {strides = array<i32>} : memref<1x6x192xf32, #tpu.memory_space<vmem>>, vector<1x6x192xf32>,
    %cst_115 = arith.constant 0.000000e+00 : f32
    %116 = vector.broadcast %cst_115 : f32 to vector<7x7xf32>
    %c0_116 = arith.constant 0 : index
    %c0_117 = arith.constant 0 : index
    %c0_118 = arith.constant 0 : index
    %117 = vector.load %arg11[%c0_116, %c0_117, %c0_118] : memref<4x192x7xf32, #tpu.memory_space<vmem>>, vector<1x192x7xf32>
    %118 = vector.shape_cast %117 : vector<1x192x7xf32> to vector<192x7xf32>
    %cst_119 = arith.constant dense<0.000000e+00> : vector<6x7xf32>
    %119 = tpu.matmul %112, %118, %cst_119 {dimension_numbers = #tpu.dot_dimension_numbers<[1], [0], [0], [1], [0, 0, 1, 1], [], []>} : vector<6x192xf32>, vector<192x7xf32>, vector<6x7xf32> -> vector<6x7xf32>
    %c0_120 = arith.constant 0 : index
    %c0_121 = arith.constant 0 : index
    %c0_122 = arith.constant 0 : index
    %120 = vector.load %arg12[%c0_120, %c0_121, %c0_122] : memref<4x7x6xf32, #tpu.memory_space<vmem>>, vector<1x7x6xf32>
    %121 = vector.shape_cast %120 : vector<1x7x6xf32> to vector<7x6xf32>
    %cst_123 = arith.constant dense<0.000000e+00> : vector<7x7xf32>
    %122 = tpu.matmul %121, %119, %cst_123 {dimension_numbers = #tpu.dot_dimension_numbers<[1], [0], [0], [1], [0, 0, 1, 1], [], []>} : vector<7x6xf32>, vector<6x7xf32>, vector<7x7xf32> -> vector<7x7xf32>
    %123 = arith.addf %116, %122 : vector<7x7xf32>
    %c1_124 = arith.constant 1 : index
    %c0_125 = arith.constant 0 : index
    %c0_126 = arith.constant 0 : index
    %124 = vector.load %arg11[%c1_124, %c0_125, %c0_126] : memref<4x192x7xf32, #tpu.memory_space<vmem>>, vector<1x192x7xf32>
    %125 = vector.shape_cast %124 : vector<1x192x7xf32> to vector<192x7xf32>
    %cst_127 = arith.constant dense<0.000000e+00> : vector<6x7xf32>
    %126 = tpu.matmul %112, %125, %cst_127 {dimension_numbers = #tpu.dot_dimension_numbers<[1], [0], [0], [1], [0, 0, 1, 1], [], []>} : vector<6x192xf32>, vector<192x7xf32>, vector<6x7xf32> -> vector<6x7xf32>
    %c1_128 = arith.constant 1 : index
    %c0_129 = arith.constant 0 : index
    %c0_130 = arith.constant 0 : index
    %127 = vector.load %arg12[%c1_128, %c0_129, %c0_130] : memref<4x7x6xf32, #tpu.memory_space<vmem>>, vector<1x7x6xf32>
    %128 = vector.shape_cast %127 : vector<1x7x6xf32> to vector<7x6xf32>
    %cst_131 = arith.constant dense<0.000000e+00> : vector<7x7xf32>
    %129 = tpu.matmul %128, %126, %cst_131 {dimension_numbers = #tpu.dot_dimension_numbers<[1], [0], [0], [1], [0, 0, 1, 1], [], []>} : vector<7x6xf32>, vector<6x7xf32>, vector<7x7xf32> -> vector<7x7xf32>
    %130 = arith.addf %123, %129 : vector<7x7xf32>
    %c2_132 = arith.constant 2 : index
    %c0_133 = arith.constant 0 : index
    %c0_134 = arith.constant 0 : index
    %131 = vector.load %arg11[%c2_132, %c0_133, %c0_134] : memref<4x192x7xf32, #tpu.memory_space<vmem>>, vector<1x192x7xf32>
    %132 = vector.shape_cast %131 : vector<1x192x7xf32> to vector<192x7xf32>
    %cst_135 = arith.constant dense<0.000000e+00> : vector<6x7xf32>
    %133 = tpu.matmul %112, %132, %cst_135 {dimension_numbers = #tpu.dot_dimension_numbers<[1], [0], [0], [1], [0, 0, 1, 1], [], []>} : vector<6x192xf32>, vector<192x7xf32>, vector<6x7xf32> -> vector<6x7xf32>
    %c2_136 = arith.constant 2 : index
    %c0_137 = arith.constant 0 : index
    %c0_138 = arith.constant 0 : index
    %134 = vector.load %arg12[%c2_136, %c0_137, %c0_138] : memref<4x7x6xf32, #tpu.memory_space<vmem>>, vector<1x7x6xf32>
    %135 = vector.shape_cast %134 : vector<1x7x6xf32> to vector<7x6xf32>
    %cst_139 = arith.constant dense<0.000000e+00> : vector<7x7xf32>
    %136 = tpu.matmul %135, %133, %cst_139 {dimension_numbers = #tpu.dot_dimension_numbers<[1], [0], [0], [1], [0, 0, 1, 1], [], []>} : vector<7x6xf32>, vector<6x7xf32>, vector<7x7xf32> -> vector<7x7xf32>
    %137 = arith.addf %130, %136 : vector<7x7xf32>
    %c3_140 = arith.constant 3 : index
    %c0_141 = arith.constant 0 : index
    %c0_142 = arith.constant 0 : index
    %138 = vector.load %arg11[%c3_140, %c0_141, %c0_142] : memref<4x192x7xf32, #tpu.memory_space<vmem>>, vector<1x192x7xf32>
    %139 = vector.shape_cast %138 : vector<1x192x7xf32> to vector<192x7xf32>
    %cst_143 = arith.constant dense<0.000000e+00> : vector<6x7xf32>
    %140 = tpu.matmul %112, %139, %cst_143 {dimension_numbers = #tpu.dot_dimension_numbers<[1], [0], [0], [1], [0, 0, 1, 1], [], []>} : vector<6x192xf32>, vector<192x7xf32>, vector<6x7xf32> -> vector<6x7xf32>
    %c3_144 = arith.constant 3 : index
    %c0_145 = arith.constant 0 : index
    %c0_146 = arith.constant 0 : index
    %141 = vector.load %arg12[%c3_144, %c0_145, %c0_146] : memref<4x7x6xf32, #tpu.memory_space<vmem>>, vector<1x7x6xf32>
    %142 = vector.shape_cast %141 : vector<1x7x6xf32> to vector<7x6xf32>
    %cst_147 = arith.constant dense<0.000000e+00> : vector<7x7xf32>
    %143 = tpu.matmul %142, %140, %cst_147 {dimension_numbers = #tpu.dot_dimension_numbers<[1], [0], [0], [1], [0, 0, 1, 1], [], []>} : vector<7x6xf32>, vector<6x7xf32>, vector<7x7xf32> -> vector<7x7xf32>
    %144 = arith.addf %137, %143 : vector<7x7xf32>
    %c0_148 = arith.constant 0 : index
    %c0_149 = arith.constant 0 : index
    %145 = vector.load %arg13[%c0_148, %c0_149] : memref<1x7xf32, #tpu.memory_space<vmem>>, vector<1x7xf32>
    %146 = vector.broadcast %145 : vector<1x7xf32> to vector<7x7xf32>
    %147 = arith.addf %144, %146 : vector<7x7xf32>
    %c0_150 = arith.constant 0 : index
    %c0_151 = arith.constant 0 : index
    %c0_152 = arith.constant 0 : index
    %148 = vector.load %arg31[%c0_150, %c0_151, %c0_152] : memref<1x7x7xf32, #tpu.memory_space<vmem>>, vector<1x7x7xf32>
    %149 = vector.shape_cast %148 : vector<1x7x7xf32> to vector<7x7xf32>
    %150 = vector.shape_cast %147 : vector<7x7xf32> to vector<1x7x7xf32>
    tpu.vector_store %arg31[%c0_150, %c0_151, %c0_152], %150 {strides = array<i32>} : memref<1x7x7xf32, #tpu.memory_space<vmem>>, vector<1x7x7xf32>,
    %c0_153 = arith.constant 0 : index
    %c0_154 = arith.constant 0 : index
    %151 = vector.load %arg26[%c0_153, %c0_154] : memref<144x72xf32, #tpu.memory_space<vmem>>, vector<144x72xf32>
    %cst_155 = arith.constant dense<0.000000e+00> : vector<16x72xf32>
    %152 = tpu.matmul %1, %151, %cst_155 {dimension_numbers = #tpu.dot_dimension_numbers<[1], [0], [0], [1], [0, 0, 1, 1], [], []>} : vector<16x144xf32>, vector<144x72xf32>, vector<16x72xf32> -> vector<16x72xf32>
    %c0_156 = arith.constant 0 : index
    %c0_157 = arith.constant 0 : index
    %153 = vector.load %arg27[%c0_156, %c0_157] : memref<8x16xf32, #tpu.memory_space<vmem>>, vector<8x16xf32>
    %cst_158 = arith.constant dense<0.000000e+00> : vector<8x72xf32>
    %154 = tpu.matmul %153, %152, %cst_158 {dimension_numbers = #tpu.dot_dimension_numbers<[1], [0], [0], [1], [0, 0, 1, 1], [], []>} : vector<8x16xf32>, vector<16x72xf32>, vector<8x72xf32> -> vector<8x72xf32>
    %cst_159 = arith.constant 0.000000e+00 : f32
    %155 = vector.broadcast %cst_159 : f32 to vector<5x40xf32>
    %c0_160 = arith.constant 0 : index
    %c0_161 = arith.constant 0 : index
    %c0_162 = arith.constant 0 : index
    %156 = vector.load %arg14[%c0_160, %c0_161, %c0_162] : memref<4x72x40xf32, #tpu.memory_space<vmem>>, vector<1x72x40xf32>
    %157 = vector.shape_cast %156 : vector<1x72x40xf32> to vector<72x40xf32>
    %cst_163 = arith.constant dense<0.000000e+00> : vector<8x40xf32>
    %158 = tpu.matmul %154, %157, %cst_163 {dimension_numbers = #tpu.dot_dimension_numbers<[1], [0], [0], [1], [0, 0, 1, 1], [], []>} : vector<8x72xf32>, vector<72x40xf32>, vector<8x40xf32> -> vector<8x40xf32>
    %c0_164 = arith.constant 0 : index
    %c0_165 = arith.constant 0 : index
    %c0_166 = arith.constant 0 : index
    %159 = vector.load %arg15[%c0_164, %c0_165, %c0_166] : memref<4x5x8xf32, #tpu.memory_space<vmem>>, vector<1x5x8xf32>
    %160 = vector.shape_cast %159 : vector<1x5x8xf32> to vector<5x8xf32>
    %cst_167 = arith.constant dense<0.000000e+00> : vector<5x40xf32>
    %161 = tpu.matmul %160, %158, %cst_167 {dimension_numbers = #tpu.dot_dimension_numbers<[1], [0], [0], [1], [0, 0, 1, 1], [], []>} : vector<5x8xf32>, vector<8x40xf32>, vector<5x40xf32> -> vector<5x40xf32>
    %162 = arith.addf %155, %161 : vector<5x40xf32>
    %c1_168 = arith.constant 1 : index
    %c0_169 = arith.constant 0 : index
    %c0_170 = arith.constant 0 : index
    %163 = vector.load %arg14[%c1_168, %c0_169, %c0_170] : memref<4x72x40xf32, #tpu.memory_space<vmem>>, vector<1x72x40xf32>
    %164 = vector.shape_cast %163 : vector<1x72x40xf32> to vector<72x40xf32>
    %cst_171 = arith.constant dense<0.000000e+00> : vector<8x40xf32>
    %165 = tpu.matmul %154, %164, %cst_171 {dimension_numbers = #tpu.dot_dimension_numbers<[1], [0], [0], [1], [0, 0, 1, 1], [], []>} : vector<8x72xf32>, vector<72x40xf32>, vector<8x40xf32> -> vector<8x40xf32>
    %c1_172 = arith.constant 1 : index
    %c0_173 = arith.constant 0 : index
    %c0_174 = arith.constant 0 : index
    %166 = vector.load %arg15[%c1_172, %c0_173, %c0_174] : memref<4x5x8xf32, #tpu.memory_space<vmem>>, vector<1x5x8xf32>
    %167 = vector.shape_cast %166 : vector<1x5x8xf32> to vector<5x8xf32>
    %cst_175 = arith.constant dense<0.000000e+00> : vector<5x40xf32>
    %168 = tpu.matmul %167, %165, %cst_175 {dimension_numbers = #tpu.dot_dimension_numbers<[1], [0], [0], [1], [0, 0, 1, 1], [], []>} : vector<5x8xf32>, vector<8x40xf32>, vector<5x40xf32> -> vector<5x40xf32>
    %169 = arith.addf %162, %168 : vector<5x40xf32>
    %c2_176 = arith.constant 2 : index
    %c0_177 = arith.constant 0 : index
    %c0_178 = arith.constant 0 : index
    %170 = vector.load %arg14[%c2_176, %c0_177, %c0_178] : memref<4x72x40xf32, #tpu.memory_space<vmem>>, vector<1x72x40xf32>
    %171 = vector.shape_cast %170 : vector<1x72x40xf32> to vector<72x40xf32>
    %cst_179 = arith.constant dense<0.000000e+00> : vector<8x40xf32>
    %172 = tpu.matmul %154, %171, %cst_179 {dimension_numbers = #tpu.dot_dimension_numbers<[1], [0], [0], [1], [0, 0, 1, 1], [], []>} : vector<8x72xf32>, vector<72x40xf32>, vector<8x40xf32> -> vector<8x40xf32>
    %c2_180 = arith.constant 2 : index
    %c0_181 = arith.constant 0 : index
    %c0_182 = arith.constant 0 : index
    %173 = vector.load %arg15[%c2_180, %c0_181, %c0_182] : memref<4x5x8xf32, #tpu.memory_space<vmem>>, vector<1x5x8xf32>
    %174 = vector.shape_cast %173 : vector<1x5x8xf32> to vector<5x8xf32>
    %cst_183 = arith.constant dense<0.000000e+00> : vector<5x40xf32>
    %175 = tpu.matmul %174, %172, %cst_183 {dimension_numbers = #tpu.dot_dimension_numbers<[1], [0], [0], [1], [0, 0, 1, 1], [], []>} : vector<5x8xf32>, vector<8x40xf32>, vector<5x40xf32> -> vector<5x40xf32>
    %176 = arith.addf %169, %175 : vector<5x40xf32>
    %c3_184 = arith.constant 3 : index
    %c0_185 = arith.constant 0 : index
    %c0_186 = arith.constant 0 : index
    %177 = vector.load %arg14[%c3_184, %c0_185, %c0_186] : memref<4x72x40xf32, #tpu.memory_space<vmem>>, vector<1x72x40xf32>
    %178 = vector.shape_cast %177 : vector<1x72x40xf32> to vector<72x40xf32>
    %cst_187 = arith.constant dense<0.000000e+00> : vector<8x40xf32>
    %179 = tpu.matmul %154, %178, %cst_187 {dimension_numbers = #tpu.dot_dimension_numbers<[1], [0], [0], [1], [0, 0, 1, 1], [], []>} : vector<8x72xf32>, vector<72x40xf32>, vector<8x40xf32> -> vector<8x40xf32>
    %c3_188 = arith.constant 3 : index
    %c0_189 = arith.constant 0 : index
    %c0_190 = arith.constant 0 : index
    %180 = vector.load %arg15[%c3_188, %c0_189, %c0_190] : memref<4x5x8xf32, #tpu.memory_space<vmem>>, vector<1x5x8xf32>
    %181 = vector.shape_cast %180 : vector<1x5x8xf32> to vector<5x8xf32>
    %cst_191 = arith.constant dense<0.000000e+00> : vector<5x40xf32>
    %182 = tpu.matmul %181, %179, %cst_191 {dimension_numbers = #tpu.dot_dimension_numbers<[1], [0], [0], [1], [0, 0, 1, 1], [], []>} : vector<5x8xf32>, vector<8x40xf32>, vector<5x40xf32> -> vector<5x40xf32>
    %183 = arith.addf %176, %182 : vector<5x40xf32>
    %c0_192 = arith.constant 0 : index
    %c0_193 = arith.constant 0 : index
    %184 = vector.load %arg16[%c0_192, %c0_193] : memref<1x40xf32, #tpu.memory_space<vmem>>, vector<1x40xf32>
    %185 = vector.broadcast %184 : vector<1x40xf32> to vector<5x40xf32>
    %186 = arith.addf %183, %185 : vector<5x40xf32>
    %cst_194 = arith.constant 2.000000e-01 : f32
    %187 = vector.broadcast %cst_194 : f32 to vector<5x40xf32>
    %188 = arith.mulf %187, %186 : vector<5x40xf32>
    %189 = arith.maximumf %186, %188 : vector<5x40xf32>
    %c0_195 = arith.constant 0 : index
    %c0_196 = arith.constant 0 : index
    %c0_197 = arith.constant 0 : index
    %190 = vector.load %arg32[%c0_195, %c0_196, %c0_197] : memref<1x5x40xf32, #tpu.memory_space<vmem>>, vector<1x5x40xf32>
    %191 = vector.shape_cast %190 : vector<1x5x40xf32> to vector<5x40xf32>
    %192 = vector.shape_cast %189 : vector<5x40xf32> to vector<1x5x40xf32>
    tpu.vector_store %arg32[%c0_195, %c0_196, %c0_197], %192 {strides = array<i32>} : memref<1x5x40xf32, #tpu.memory_space<vmem>>, vector<1x5x40xf32>,
    %cst_198 = arith.constant 0.000000e+00 : f32
    %193 = vector.broadcast %cst_198 : f32 to vector<3x48xf32>
    %c0_199 = arith.constant 0 : index
    %c0_200 = arith.constant 0 : index
    %c0_201 = arith.constant 0 : index
    %194 = vector.load %arg17[%c0_199, %c0_200, %c0_201] : memref<4x40x48xf32, #tpu.memory_space<vmem>>, vector<1x40x48xf32>
    %195 = vector.shape_cast %194 : vector<1x40x48xf32> to vector<40x48xf32>
    %cst_202 = arith.constant dense<0.000000e+00> : vector<5x48xf32>
    %196 = tpu.matmul %189, %195, %cst_202 {dimension_numbers = #tpu.dot_dimension_numbers<[1], [0], [0], [1], [0, 0, 1, 1], [], []>} : vector<5x40xf32>, vector<40x48xf32>, vector<5x48xf32> -> vector<5x48xf32>
    %c0_203 = arith.constant 0 : index
    %c0_204 = arith.constant 0 : index
    %c0_205 = arith.constant 0 : index
    %197 = vector.load %arg18[%c0_203, %c0_204, %c0_205] : memref<4x3x5xf32, #tpu.memory_space<vmem>>, vector<1x3x5xf32>
    %198 = vector.shape_cast %197 : vector<1x3x5xf32> to vector<3x5xf32>
    %cst_206 = arith.constant dense<0.000000e+00> : vector<3x48xf32>
    %199 = tpu.matmul %198, %196, %cst_206 {dimension_numbers = #tpu.dot_dimension_numbers<[1], [0], [0], [1], [0, 0, 1, 1], [], []>} : vector<3x5xf32>, vector<5x48xf32>, vector<3x48xf32> -> vector<3x48xf32>
    %200 = arith.addf %193, %199 : vector<3x48xf32>
    %c1_207 = arith.constant 1 : index
    %c0_208 = arith.constant 0 : index
    %c0_209 = arith.constant 0 : index
    %201 = vector.load %arg17[%c1_207, %c0_208, %c0_209] : memref<4x40x48xf32, #tpu.memory_space<vmem>>, vector<1x40x48xf32>
    %202 = vector.shape_cast %201 : vector<1x40x48xf32> to vector<40x48xf32>
    %cst_210 = arith.constant dense<0.000000e+00> : vector<5x48xf32>
    %203 = tpu.matmul %189, %202, %cst_210 {dimension_numbers = #tpu.dot_dimension_numbers<[1], [0], [0], [1], [0, 0, 1, 1], [], []>} : vector<5x40xf32>, vector<40x48xf32>, vector<5x48xf32> -> vector<5x48xf32>
    %c1_211 = arith.constant 1 : index
    %c0_212 = arith.constant 0 : index
    %c0_213 = arith.constant 0 : index
    %204 = vector.load %arg18[%c1_211, %c0_212, %c0_213] : memref<4x3x5xf32, #tpu.memory_space<vmem>>, vector<1x3x5xf32>
    %205 = vector.shape_cast %204 : vector<1x3x5xf32> to vector<3x5xf32>
    %cst_214 = arith.constant dense<0.000000e+00> : vector<3x48xf32>
    %206 = tpu.matmul %205, %203, %cst_214 {dimension_numbers = #tpu.dot_dimension_numbers<[1], [0], [0], [1], [0, 0, 1, 1], [], []>} : vector<3x5xf32>, vector<5x48xf32>, vector<3x48xf32> -> vector<3x48xf32>
    %207 = arith.addf %200, %206 : vector<3x48xf32>
    %c2_215 = arith.constant 2 : index
    %c0_216 = arith.constant 0 : index
    %c0_217 = arith.constant 0 : index
    %208 = vector.load %arg17[%c2_215, %c0_216, %c0_217] : memref<4x40x48xf32, #tpu.memory_space<vmem>>, vector<1x40x48xf32>
    %209 = vector.shape_cast %208 : vector<1x40x48xf32> to vector<40x48xf32>
    %cst_218 = arith.constant dense<0.000000e+00> : vector<5x48xf32>
    %210 = tpu.matmul %189, %209, %cst_218 {dimension_numbers = #tpu.dot_dimension_numbers<[1], [0], [0], [1], [0, 0, 1, 1], [], []>} : vector<5x40xf32>, vector<40x48xf32>, vector<5x48xf32> -> vector<5x48xf32>
    %c2_219 = arith.constant 2 : index
    %c0_220 = arith.constant 0 : index
    %c0_221 = arith.constant 0 : index
    %211 = vector.load %arg18[%c2_219, %c0_220, %c0_221] : memref<4x3x5xf32, #tpu.memory_space<vmem>>, vector<1x3x5xf32>
    %212 = vector.shape_cast %211 : vector<1x3x5xf32> to vector<3x5xf32>
    %cst_222 = arith.constant dense<0.000000e+00> : vector<3x48xf32>
    %213 = tpu.matmul %212, %210, %cst_222 {dimension_numbers = #tpu.dot_dimension_numbers<[1], [0], [0], [1], [0, 0, 1, 1], [], []>} : vector<3x5xf32>, vector<5x48xf32>, vector<3x48xf32> -> vector<3x48xf32>
    %214 = arith.addf %207, %213 : vector<3x48xf32>
    %c3_223 = arith.constant 3 : index
    %c0_224 = arith.constant 0 : index
    %c0_225 = arith.constant 0 : index
    %215 = vector.load %arg17[%c3_223, %c0_224, %c0_225] : memref<4x40x48xf32, #tpu.memory_space<vmem>>, vector<1x40x48xf32>
    %216 = vector.shape_cast %215 : vector<1x40x48xf32> to vector<40x48xf32>
    %cst_226 = arith.constant dense<0.000000e+00> : vector<5x48xf32>
    %217 = tpu.matmul %189, %216, %cst_226 {dimension_numbers = #tpu.dot_dimension_numbers<[1], [0], [0], [1], [0, 0, 1, 1], [], []>} : vector<5x40xf32>, vector<40x48xf32>, vector<5x48xf32> -> vector<5x48xf32>
    %c3_227 = arith.constant 3 : index
    %c0_228 = arith.constant 0 : index
    %c0_229 = arith.constant 0 : index
    %218 = vector.load %arg18[%c3_227, %c0_228, %c0_229] : memref<4x3x5xf32, #tpu.memory_space<vmem>>, vector<1x3x5xf32>
    %219 = vector.shape_cast %218 : vector<1x3x5xf32> to vector<3x5xf32>
    %cst_230 = arith.constant dense<0.000000e+00> : vector<3x48xf32>
    %220 = tpu.matmul %219, %217, %cst_230 {dimension_numbers = #tpu.dot_dimension_numbers<[1], [0], [0], [1], [0, 0, 1, 1], [], []>} : vector<3x5xf32>, vector<5x48xf32>, vector<3x48xf32> -> vector<3x48xf32>
    %221 = arith.addf %214, %220 : vector<3x48xf32>
    %c0_231 = arith.constant 0 : index
    %c0_232 = arith.constant 0 : index
    %222 = vector.load %arg19[%c0_231, %c0_232] : memref<1x48xf32, #tpu.memory_space<vmem>>, vector<1x48xf32>
    %223 = vector.broadcast %222 : vector<1x48xf32> to vector<3x48xf32>
    %224 = arith.addf %221, %223 : vector<3x48xf32>
    %cst_233 = arith.constant 2.000000e-01 : f32
    %225 = vector.broadcast %cst_233 : f32 to vector<3x48xf32>
    %226 = arith.mulf %225, %224 : vector<3x48xf32>
    %227 = arith.maximumf %224, %226 : vector<3x48xf32>
    %c0_234 = arith.constant 0 : index
    %c0_235 = arith.constant 0 : index
    %c0_236 = arith.constant 0 : index
    %228 = vector.load %arg33[%c0_234, %c0_235, %c0_236] : memref<1x3x48xf32, #tpu.memory_space<vmem>>, vector<1x3x48xf32>
    %229 = vector.shape_cast %228 : vector<1x3x48xf32> to vector<3x48xf32>
    %230 = vector.shape_cast %227 : vector<3x48xf32> to vector<1x3x48xf32>
    tpu.vector_store %arg33[%c0_234, %c0_235, %c0_236], %230 {strides = array<i32>} : memref<1x3x48xf32, #tpu.memory_space<vmem>>, vector<1x3x48xf32>,
    %cst_237 = arith.constant 0.000000e+00 : f32
    %231 = vector.broadcast %cst_237 : f32 to vector<4x128xf32>
    %c0_238 = arith.constant 0 : index
    %c0_239 = arith.constant 0 : index
    %c0_240 = arith.constant 0 : index
    %232 = vector.load %arg20[%c0_238, %c0_239, %c0_240] : memref<4x48x128xf32, #tpu.memory_space<vmem>>, vector<1x48x128xf32>
    %233 = vector.shape_cast %232 : vector<1x48x128xf32> to vector<48x128xf32>
    %cst_241 = arith.constant dense<0.000000e+00> : vector<3x128xf32>
    %234 = tpu.matmul %227, %233, %cst_241 {dimension_numbers = #tpu.dot_dimension_numbers<[1], [0], [0], [1], [0, 0, 1, 1], [], []>} : vector<3x48xf32>, vector<48x128xf32>, vector<3x128xf32> -> vector<3x128xf32>
    %c0_242 = arith.constant 0 : index
    %c0_243 = arith.constant 0 : index
    %c0_244 = arith.constant 0 : index
    %235 = vector.load %arg21[%c0_242, %c0_243, %c0_244] : memref<4x4x3xf32, #tpu.memory_space<vmem>>, vector<1x4x3xf32>
    %236 = vector.shape_cast %235 : vector<1x4x3xf32> to vector<4x3xf32>
    %cst_245 = arith.constant dense<0.000000e+00> : vector<4x128xf32>
    %237 = tpu.matmul %236, %234, %cst_245 {dimension_numbers = #tpu.dot_dimension_numbers<[1], [0], [0], [1], [0, 0, 1, 1], [], []>} : vector<4x3xf32>, vector<3x128xf32>, vector<4x128xf32> -> vector<4x128xf32>
    %238 = arith.addf %231, %237 : vector<4x128xf32>
    %c1_246 = arith.constant 1 : index
    %c0_247 = arith.constant 0 : index
    %c0_248 = arith.constant 0 : index
    %239 = vector.load %arg20[%c1_246, %c0_247, %c0_248] : memref<4x48x128xf32, #tpu.memory_space<vmem>>, vector<1x48x128xf32>
    %240 = vector.shape_cast %239 : vector<1x48x128xf32> to vector<48x128xf32>
    %cst_249 = arith.constant dense<0.000000e+00> : vector<3x128xf32>
    %241 = tpu.matmul %227, %240, %cst_249 {dimension_numbers = #tpu.dot_dimension_numbers<[1], [0], [0], [1], [0, 0, 1, 1], [], []>} : vector<3x48xf32>, vector<48x128xf32>, vector<3x128xf32> -> vector<3x128xf32>
    %c1_250 = arith.constant 1 : index
    %c0_251 = arith.constant 0 : index
    %c0_252 = arith.constant 0 : index
    %242 = vector.load %arg21[%c1_250, %c0_251, %c0_252] : memref<4x4x3xf32, #tpu.memory_space<vmem>>, vector<1x4x3xf32>
    %243 = vector.shape_cast %242 : vector<1x4x3xf32> to vector<4x3xf32>
    %cst_253 = arith.constant dense<0.000000e+00> : vector<4x128xf32>
    %244 = tpu.matmul %243, %241, %cst_253 {dimension_numbers = #tpu.dot_dimension_numbers<[1], [0], [0], [1], [0, 0, 1, 1], [], []>} : vector<4x3xf32>, vector<3x128xf32>, vector<4x128xf32> -> vector<4x128xf32>
    %245 = arith.addf %238, %244 : vector<4x128xf32>
    %c2_254 = arith.constant 2 : index
    %c0_255 = arith.constant 0 : index
    %c0_256 = arith.constant 0 : index
    %246 = vector.load %arg20[%c2_254, %c0_255, %c0_256] : memref<4x48x128xf32, #tpu.memory_space<vmem>>, vector<1x48x128xf32>
    %247 = vector.shape_cast %246 : vector<1x48x128xf32> to vector<48x128xf32>
    %cst_257 = arith.constant dense<0.000000e+00> : vector<3x128xf32>
    %248 = tpu.matmul %227, %247, %cst_257 {dimension_numbers = #tpu.dot_dimension_numbers<[1], [0], [0], [1], [0, 0, 1, 1], [], []>} : vector<3x48xf32>, vector<48x128xf32>, vector<3x128xf32> -> vector<3x128xf32>
    %c2_258 = arith.constant 2 : index
    %c0_259 = arith.constant 0 : index
    %c0_260 = arith.constant 0 : index
    %249 = vector.load %arg21[%c2_258, %c0_259, %c0_260] : memref<4x4x3xf32, #tpu.memory_space<vmem>>, vector<1x4x3xf32>
    %250 = vector.shape_cast %249 : vector<1x4x3xf32> to vector<4x3xf32>
    %cst_261 = arith.constant dense<0.000000e+00> : vector<4x128xf32>
    %251 = tpu.matmul %250, %248, %cst_261 {dimension_numbers = #tpu.dot_dimension_numbers<[1], [0], [0], [1], [0, 0, 1, 1], [], []>} : vector<4x3xf32>, vector<3x128xf32>, vector<4x128xf32> -> vector<4x128xf32>
    %252 = arith.addf %245, %251 : vector<4x128xf32>
    %c3_262 = arith.constant 3 : index
    %c0_263 = arith.constant 0 : index
    %c0_264 = arith.constant 0 : index
    %253 = vector.load %arg20[%c3_262, %c0_263, %c0_264] : memref<4x48x128xf32, #tpu.memory_space<vmem>>, vector<1x48x128xf32>
    %254 = vector.shape_cast %253 : vector<1x48x128xf32> to vector<48x128xf32>
    %cst_265 = arith.constant dense<0.000000e+00> : vector<3x128xf32>
    %255 = tpu.matmul %227, %254, %cst_265 {dimension_numbers = #tpu.dot_dimension_numbers<[1], [0], [0], [1], [0, 0, 1, 1], [], []>} : vector<3x48xf32>, vector<48x128xf32>, vector<3x128xf32> -> vector<3x128xf32>
    %c3_266 = arith.constant 3 : index
    %c0_267 = arith.constant 0 : index
    %c0_268 = arith.constant 0 : index
    %256 = vector.load %arg21[%c3_266, %c0_267, %c0_268] : memref<4x4x3xf32, #tpu.memory_space<vmem>>, vector<1x4x3xf32>
    %257 = vector.shape_cast %256 : vector<1x4x3xf32> to vector<4x3xf32>
    %cst_269 = arith.constant dense<0.000000e+00> : vector<4x128xf32>
    %258 = tpu.matmul %257, %255, %cst_269 {dimension_numbers = #tpu.dot_dimension_numbers<[1], [0], [0], [1], [0, 0, 1, 1], [], []>} : vector<4x3xf32>, vector<3x128xf32>, vector<4x128xf32> -> vector<4x128xf32>
    %259 = arith.addf %252, %258 : vector<4x128xf32>
    %c0_270 = arith.constant 0 : index
    %c0_271 = arith.constant 0 : index
    %260 = vector.load %arg22[%c0_270, %c0_271] : memref<1x128xf32, #tpu.memory_space<vmem>>, vector<1x128xf32>
    %261 = vector.broadcast %260 : vector<1x128xf32> to vector<4x128xf32>
    %262 = arith.addf %259, %261 : vector<4x128xf32>
    %cst_272 = arith.constant 2.000000e-01 : f32
    %263 = vector.broadcast %cst_272 : f32 to vector<4x128xf32>
    %264 = arith.mulf %263, %262 : vector<4x128xf32>
    %265 = arith.maximumf %262, %264 : vector<4x128xf32>
    %c0_273 = arith.constant 0 : index
    %c0_274 = arith.constant 0 : index
    %c0_275 = arith.constant 0 : index
    %266 = vector.load %arg34[%c0_273, %c0_274, %c0_275] : memref<1x4x128xf32, #tpu.memory_space<vmem>>, vector<1x4x128xf32>
    %267 = vector.shape_cast %266 : vector<1x4x128xf32> to vector<4x128xf32>
    %268 = vector.shape_cast %265 : vector<4x128xf32> to vector<1x4x128xf32>
    tpu.vector_store %arg34[%c0_273, %c0_274, %c0_275], %268 {strides = array<i32>} : memref<1x4x128xf32, #tpu.memory_space<vmem>>, vector<1x4x128xf32>,
    %cst_276 = arith.constant 0.000000e+00 : f32
    %269 = vector.broadcast %cst_276 : f32 to vector<5x5xf32>
    %c0_277 = arith.constant 0 : index
    %c0_278 = arith.constant 0 : index
    %c0_279 = arith.constant 0 : index
    %270 = vector.load %arg23[%c0_277, %c0_278, %c0_279] : memref<4x128x5xf32, #tpu.memory_space<vmem>>, vector<1x128x5xf32>
    %271 = vector.shape_cast %270 : vector<1x128x5xf32> to vector<128x5xf32>
    %cst_280 = arith.constant dense<0.000000e+00> : vector<4x5xf32>
    %272 = tpu.matmul %265, %271, %cst_280 {dimension_numbers = #tpu.dot_dimension_numbers<[1], [0], [0], [1], [0, 0, 1, 1], [], []>} : vector<4x128xf32>, vector<128x5xf32>, vector<4x5xf32> -> vector<4x5xf32>
    %c0_281 = arith.constant 0 : index
    %c0_282 = arith.constant 0 : index
    %c0_283 = arith.constant 0 : index
    %273 = vector.load %arg24[%c0_281, %c0_282, %c0_283] : memref<4x5x4xf32, #tpu.memory_space<vmem>>, vector<1x5x4xf32>
    %274 = vector.shape_cast %273 : vector<1x5x4xf32> to vector<5x4xf32>
    %cst_284 = arith.constant dense<0.000000e+00> : vector<5x5xf32>
    %275 = tpu.matmul %274, %272, %cst_284 {dimension_numbers = #tpu.dot_dimension_numbers<[1], [0], [0], [1], [0, 0, 1, 1], [], []>} : vector<5x4xf32>, vector<4x5xf32>, vector<5x5xf32> -> vector<5x5xf32>
    %276 = arith.addf %269, %275 : vector<5x5xf32>
    %c1_285 = arith.constant 1 : index
    %c0_286 = arith.constant 0 : index
    %c0_287 = arith.constant 0 : index
    %277 = vector.load %arg23[%c1_285, %c0_286, %c0_287] : memref<4x128x5xf32, #tpu.memory_space<vmem>>, vector<1x128x5xf32>
    %278 = vector.shape_cast %277 : vector<1x128x5xf32> to vector<128x5xf32>
    %cst_288 = arith.constant dense<0.000000e+00> : vector<4x5xf32>
    %279 = tpu.matmul %265, %278, %cst_288 {dimension_numbers = #tpu.dot_dimension_numbers<[1], [0], [0], [1], [0, 0, 1, 1], [], []>} : vector<4x128xf32>, vector<128x5xf32>, vector<4x5xf32> -> vector<4x5xf32>
    %c1_289 = arith.constant 1 : index
    %c0_290 = arith.constant 0 : index
    %c0_291 = arith.constant 0 : index
    %280 = vector.load %arg24[%c1_289, %c0_290, %c0_291] : memref<4x5x4xf32, #tpu.memory_space<vmem>>, vector<1x5x4xf32>
    %281 = vector.shape_cast %280 : vector<1x5x4xf32> to vector<5x4xf32>
    %cst_292 = arith.constant dense<0.000000e+00> : vector<5x5xf32>
    %282 = tpu.matmul %281, %279, %cst_292 {dimension_numbers = #tpu.dot_dimension_numbers<[1], [0], [0], [1], [0, 0, 1, 1], [], []>} : vector<5x4xf32>, vector<4x5xf32>, vector<5x5xf32> -> vector<5x5xf32>
    %283 = arith.addf %276, %282 : vector<5x5xf32>
    %c2_293 = arith.constant 2 : index
    %c0_294 = arith.constant 0 : index
    %c0_295 = arith.constant 0 : index
    %284 = vector.load %arg23[%c2_293, %c0_294, %c0_295] : memref<4x128x5xf32, #tpu.memory_space<vmem>>, vector<1x128x5xf32>
    %285 = vector.shape_cast %284 : vector<1x128x5xf32> to vector<128x5xf32>
    %cst_296 = arith.constant dense<0.000000e+00> : vector<4x5xf32>
    %286 = tpu.matmul %265, %285, %cst_296 {dimension_numbers = #tpu.dot_dimension_numbers<[1], [0], [0], [1], [0, 0, 1, 1], [], []>} : vector<4x128xf32>, vector<128x5xf32>, vector<4x5xf32> -> vector<4x5xf32>
    %c2_297 = arith.constant 2 : index
    %c0_298 = arith.constant 0 : index
    %c0_299 = arith.constant 0 : index
    %287 = vector.load %arg24[%c2_297, %c0_298, %c0_299] : memref<4x5x4xf32, #tpu.memory_space<vmem>>, vector<1x5x4xf32>
    %288 = vector.shape_cast %287 : vector<1x5x4xf32> to vector<5x4xf32>
    %cst_300 = arith.constant dense<0.000000e+00> : vector<5x5xf32>
    %289 = tpu.matmul %288, %286, %cst_300 {dimension_numbers = #tpu.dot_dimension_numbers<[1], [0], [0], [1], [0, 0, 1, 1], [], []>} : vector<5x4xf32>, vector<4x5xf32>, vector<5x5xf32> -> vector<5x5xf32>
    %290 = arith.addf %283, %289 : vector<5x5xf32>
    %c3_301 = arith.constant 3 : index
    %c0_302 = arith.constant 0 : index
    %c0_303 = arith.constant 0 : index
    %291 = vector.load %arg23[%c3_301, %c0_302, %c0_303] : memref<4x128x5xf32, #tpu.memory_space<vmem>>, vector<1x128x5xf32>
    %292 = vector.shape_cast %291 : vector<1x128x5xf32> to vector<128x5xf32>
    %cst_304 = arith.constant dense<0.000000e+00> : vector<4x5xf32>
    %293 = tpu.matmul %265, %292, %cst_304 {dimension_numbers = #tpu.dot_dimension_numbers<[1], [0], [0], [1], [0, 0, 1, 1], [], []>} : vector<4x128xf32>, vector<128x5xf32>, vector<4x5xf32> -> vector<4x5xf32>
    %c3_305 = arith.constant 3 : index
    %c0_306 = arith.constant 0 : index
    %c0_307 = arith.constant 0 : index
    %294 = vector.load %arg24[%c3_305, %c0_306, %c0_307] : memref<4x5x4xf32, #tpu.memory_space<vmem>>, vector<1x5x4xf32>
    %295 = vector.shape_cast %294 : vector<1x5x4xf32> to vector<5x4xf32>
    %cst_308 = arith.constant dense<0.000000e+00> : vector<5x5xf32>
    %296 = tpu.matmul %295, %293, %cst_308 {dimension_numbers = #tpu.dot_dimension_numbers<[1], [0], [0], [1], [0, 0, 1, 1], [], []>} : vector<5x4xf32>, vector<4x5xf32>, vector<5x5xf32> -> vector<5x5xf32>
    %297 = arith.addf %290, %296 : vector<5x5xf32>
    %c0_309 = arith.constant 0 : index
    %c0_310 = arith.constant 0 : index
    %298 = vector.load %arg25[%c0_309, %c0_310] : memref<1x5xf32, #tpu.memory_space<vmem>>, vector<1x5xf32>
    %299 = vector.broadcast %298 : vector<1x5xf32> to vector<5x5xf32>
    %300 = arith.addf %297, %299 : vector<5x5xf32>
    %c0_311 = arith.constant 0 : index
    %c0_312 = arith.constant 0 : index
    %c0_313 = arith.constant 0 : index
    %301 = vector.load %arg35[%c0_311, %c0_312, %c0_313] : memref<1x5x5xf32, #tpu.memory_space<vmem>>, vector<1x5x5xf32>
    %302 = vector.shape_cast %301 : vector<1x5x5xf32> to vector<5x5xf32>
    %303 = vector.shape_cast %300 : vector<5x5xf32> to vector<1x5x5xf32>
    tpu.vector_store %arg35[%c0_311, %c0_312, %c0_313], %303 {strides = array<i32>} : memref<1x5x5xf32, #tpu.memory_space<vmem>>, vector<1x5x5xf32>,
    return
  }
  func.func @transform_0(%arg0: i32) -> (i32, i32, i32) {
    %c0_i32 = arith.constant 0 : i32
    %c0_i32_0 = arith.constant 0 : i32
    %c0_i32_1 = arith.constant 0 : i32
    return %arg0, %c0_i32, %c0_i32_0 : i32, i32, i32
  }
  func.func @transform_1(%arg0: i32) -> (i32, i32, i32) {
    %c0_i32 = arith.constant 0 : i32
    %c0_i32_0 = arith.constant 0 : i32
    %c0_i32_1 = arith.constant 0 : i32
    %c0_i32_2 = arith.constant 0 : i32
    return %c0_i32, %c0_i32_0, %c0_i32_1 : i32, i32, i32
  }
  func.func @transform_2(%arg0: i32) -> (i32, i32, i32) {
    %c0_i32 = arith.constant 0 : i32
    %c0_i32_0 = arith.constant 0 : i32
    %c0_i32_1 = arith.constant 0 : i32
    %c0_i32_2 = arith.constant 0 : i32
    return %c0_i32, %c0_i32_0, %c0_i32_1 : i32, i32, i32
  }
  func.func @transform_3(%arg0: i32) -> (i32, i32) {
    %c0_i32 = arith.constant 0 : i32
    %c0_i32_0 = arith.constant 0 : i32
    %c0_i32_1 = arith.constant 0 : i32
    return %c0_i32, %c0_i32_0 : i32, i32
  }
  func.func @transform_4(%arg0: i32) -> (i32, i32, i32) {
    %c0_i32 = arith.constant 0 : i32
    %c0_i32_0 = arith.constant 0 : i32
    %c0_i32_1 = arith.constant 0 : i32
    %c0_i32_2 = arith.constant 0 : i32
    return %c0_i32, %c0_i32_0, %c0_i32_1 : i32, i32, i32
  }
  func.func @transform_5(%arg0: i32) -> (i32, i32, i32) {
    %c0_i32 = arith.constant 0 : i32
    %c0_i32_0 = arith.constant 0 : i32
    %c0_i32_1 = arith.constant 0 : i32
    %c0_i32_2 = arith.constant 0 : i32
    return %c0_i32, %c0_i32_0, %c0_i32_1 : i32, i32, i32
  }
  func.func @transform_6(%arg0: i32) -> (i32, i32) {
    %c0_i32 = arith.constant 0 : i32
    %c0_i32_0 = arith.constant 0 : i32
    %c0_i32_1 = arith.constant 0 : i32
    return %c0_i32, %c0_i32_0 : i32, i32
  }
  func.func @transform_7(%arg0: i32) -> (i32, i32, i32) {
    %c0_i32 = arith.constant 0 : i32
    %c0_i32_0 = arith.constant 0 : i32
    %c0_i32_1 = arith.constant 0 : i32
    %c0_i32_2 = arith.constant 0 : i32
    return %c0_i32, %c0_i32_0, %c0_i32_1 : i32, i32, i32
  }
  func.func @transform_8(%arg0: i32) -> (i32, i32, i32) {
    %c0_i32 = arith.constant 0 : i32
    %c0_i32_0 = arith.constant 0 : i32
    %c0_i32_1 = arith.constant 0 : i32
    %c0_i32_2 = arith.constant 0 : i32
    return %c0_i32, %c0_i32_0, %c0_i32_1 : i32, i32, i32
  }
  func.func @transform_9(%arg0: i32) -> (i32, i32) {
    %c0_i32 = arith.constant 0 : i32
    %c0_i32_0 = arith.constant 0 : i32
    %c0_i32_1 = arith.constant 0 : i32
    return %c0_i32, %c0_i32_0 : i32, i32
  }
  func.func @transform_10(%arg0: i32) -> (i32, i32, i32) {
    %c0_i32 = arith.constant 0 : i32
    %c0_i32_0 = arith.constant 0 : i32
    %c0_i32_1 = arith.constant 0 : i32
    %c0_i32_2 = arith.constant 0 : i32
    return %c0_i32, %c0_i32_0, %c0_i32_1 : i32, i32, i32
  }
  func.func @transform_11(%arg0: i32) -> (i32, i32, i32) {
    %c0_i32 = arith.constant 0 : i32
    %c0_i32_0 = arith.constant 0 : i32
    %c0_i32_1 = arith.constant 0 : i32
    %c0_i32_2 = arith.constant 0 : i32
    return %c0_i32, %c0_i32_0, %c0_i32_1 : i32, i32, i32
  }
  func.func @transform_12(%arg0: i32) -> (i32, i32) {
    %c0_i32 = arith.constant 0 : i32
    %c0_i32_0 = arith.constant 0 : i32
    %c0_i32_1 = arith.constant 0 : i32
    return %c0_i32, %c0_i32_0 : i32, i32
  }
  func.func @transform_13(%arg0: i32) -> (i32, i32, i32) {
    %c0_i32 = arith.constant 0 : i32
    %c0_i32_0 = arith.constant 0 : i32
    %c0_i32_1 = arith.constant 0 : i32
    %c0_i32_2 = arith.constant 0 : i32
    return %c0_i32, %c0_i32_0, %c0_i32_1 : i32, i32, i32
  }
  func.func @transform_14(%arg0: i32) -> (i32, i32, i32) {
    %c0_i32 = arith.constant 0 : i32
    %c0_i32_0 = arith.constant 0 : i32
    %c0_i32_1 = arith.constant 0 : i32
    %c0_i32_2 = arith.constant 0 : i32
    return %c0_i32, %c0_i32_0, %c0_i32_1 : i32, i32, i32
  }
  func.func @transform_15(%arg0: i32) -> (i32, i32) {
    %c0_i32 = arith.constant 0 : i32
    %c0_i32_0 = arith.constant 0 : i32
    %c0_i32_1 = arith.constant 0 : i32
    return %c0_i32, %c0_i32_0 : i32, i32
  }
  func.func @transform_16(%arg0: i32) -> (i32, i32, i32) {
    %c0_i32 = arith.constant 0 : i32
    %c0_i32_0 = arith.constant 0 : i32
    %c0_i32_1 = arith.constant 0 : i32
    %c0_i32_2 = arith.constant 0 : i32
    return %c0_i32, %c0_i32_0, %c0_i32_1 : i32, i32, i32
  }
  func.func @transform_17(%arg0: i32) -> (i32, i32, i32) {
    %c0_i32 = arith.constant 0 : i32
    %c0_i32_0 = arith.constant 0 : i32
    %c0_i32_1 = arith.constant 0 : i32
    %c0_i32_2 = arith.constant 0 : i32
    return %c0_i32, %c0_i32_0, %c0_i32_1 : i32, i32, i32
  }
  func.func @transform_18(%arg0: i32) -> (i32, i32) {
    %c0_i32 = arith.constant 0 : i32
    %c0_i32_0 = arith.constant 0 : i32
    %c0_i32_1 = arith.constant 0 : i32
    return %c0_i32, %c0_i32_0 : i32, i32
  }
  func.func @transform_19(%arg0: i32) -> (i32, i32, i32) {
    %c0_i32 = arith.constant 0 : i32
    %c0_i32_0 = arith.constant 0 : i32
    %c0_i32_1 = arith.constant 0 : i32
    %c0_i32_2 = arith.constant 0 : i32
    return %c0_i32, %c0_i32_0, %c0_i32_1 : i32, i32, i32
  }
  func.func @transform_20(%arg0: i32) -> (i32, i32, i32) {
    %c0_i32 = arith.constant 0 : i32
    %c0_i32_0 = arith.constant 0 : i32
    %c0_i32_1 = arith.constant 0 : i32
    %c0_i32_2 = arith.constant 0 : i32
    return %c0_i32, %c0_i32_0, %c0_i32_1 : i32, i32, i32
  }
  func.func @transform_21(%arg0: i32) -> (i32, i32) {
    %c0_i32 = arith.constant 0 : i32
    %c0_i32_0 = arith.constant 0 : i32
    %c0_i32_1 = arith.constant 0 : i32
    return %c0_i32, %c0_i32_0 : i32, i32
  }
  func.func @transform_22(%arg0: i32) -> (i32, i32, i32) {
    %c0_i32 = arith.constant 0 : i32
    %c0_i32_0 = arith.constant 0 : i32
    %c0_i32_1 = arith.constant 0 : i32
    %c0_i32_2 = arith.constant 0 : i32
    return %c0_i32, %c0_i32_0, %c0_i32_1 : i32, i32, i32
  }
  func.func @transform_23(%arg0: i32) -> (i32, i32, i32) {
    %c0_i32 = arith.constant 0 : i32
    %c0_i32_0 = arith.constant 0 : i32
    %c0_i32_1 = arith.constant 0 : i32
    %c0_i32_2 = arith.constant 0 : i32
    return %c0_i32, %c0_i32_0, %c0_i32_1 : i32, i32, i32
  }
  func.func @transform_24(%arg0: i32) -> (i32, i32) {
    %c0_i32 = arith.constant 0 : i32
    %c0_i32_0 = arith.constant 0 : i32
    %c0_i32_1 = arith.constant 0 : i32
    return %c0_i32, %c0_i32_0 : i32, i32
  }
  func.func @transform_25(%arg0: i32) -> (i32, i32) {
    %c0_i32 = arith.constant 0 : i32
    %c0_i32_0 = arith.constant 0 : i32
    %c0_i32_1 = arith.constant 0 : i32
    return %c0_i32, %c0_i32_0 : i32, i32
  }
  func.func @transform_26(%arg0: i32) -> (i32, i32) {
    %c0_i32 = arith.constant 0 : i32
    %c0_i32_0 = arith.constant 0 : i32
    %c0_i32_1 = arith.constant 0 : i32
    return %c0_i32, %c0_i32_0 : i32, i32
  }
  func.func @transform_27(%arg0: i32) -> (i32, i32, i32) {
    %c0_i32 = arith.constant 0 : i32
    %c0_i32_0 = arith.constant 0 : i32
    %c0_i32_1 = arith.constant 0 : i32
    return %arg0, %c0_i32, %c0_i32_0 : i32, i32, i32
  }
  func.func @transform_28(%arg0: i32) -> (i32, i32, i32) {
    %c0_i32 = arith.constant 0 : i32
    %c0_i32_0 = arith.constant 0 : i32
    %c0_i32_1 = arith.constant 0 : i32
    return %arg0, %c0_i32, %c0_i32_0 : i32, i32, i32
  }
  func.func @transform_29(%arg0: i32) -> (i32, i32, i32) {
    %c0_i32 = arith.constant 0 : i32
    %c0_i32_0 = arith.constant 0 : i32
    %c0_i32_1 = arith.constant 0 : i32
    return %arg0, %c0_i32, %c0_i32_0 : i32, i32, i32
  }
  func.func @transform_30(%arg0: i32) -> (i32, i32, i32) {
    %c0_i32 = arith.constant 0 : i32
    %c0_i32_0 = arith.constant 0 : i32
    %c0_i32_1 = arith.constant 0 : i32
    return %arg0, %c0_i32, %c0_i32_0 : i32, i32, i32
  }
  func.func @transform_31(%arg0: i32) -> (i32, i32, i32) {
    %c0_i32 = arith.constant 0 : i32
    %c0_i32_0 = arith.constant 0 : i32
    %c0_i32_1 = arith.constant 0 : i32
    return %arg0, %c0_i32, %c0_i32_0 : i32, i32, i32
  }
  func.func @transform_32(%arg0: i32) -> (i32, i32, i32) {
    %c0_i32 = arith.constant 0 : i32
    %c0_i32_0 = arith.constant 0 : i32
    %c0_i32_1 = arith.constant 0 : i32
    return %arg0, %c0_i32, %c0_i32_0 : i32, i32, i32
  }
  func.func @transform_33(%arg0: i32) -> (i32, i32, i32) {
    %c0_i32 = arith.constant 0 : i32
    %c0_i32_0 = arith.constant 0 : i32
    %c0_i32_1 = arith.constant 0 : i32
    return %arg0, %c0_i32, %c0_i32_0 : i32, i32, i32
  }
  func.func @transform_34(%arg0: i32) -> (i32, i32, i32) {
    %c0_i32 = arith.constant 0 : i32
    %c0_i32_0 = arith.constant 0 : i32
    %c0_i32_1 = arith.constant 0 : i32
    return %arg0, %c0_i32, %c0_i32_0 : i32, i32, i32
  }
}

</mosaic_0001>

<bundles_post_ra>
// kernel: render_mouth_d_forward.1
= control target key start
LH: loop header
LB: loop body
LE: loop exit
PB: predicated region body
PF: predicated region fallthrough
CT: control target
= control target key end

     0   :  { %s9085_s6 = smov 1   ;;  %s9086_s10 = smov 2   ;;  %s10328_s0 = inlined_call_operand.smem [shape: u32[35], index: -1, kind: input, shape index: {}] }
   0x1   :  { %s9131_s5 = sld [smem:[%s10328_s0]]   ;;  %s9087_s14 = smov 3  }
   0x2   :  { %s9136_s9 = sld [smem:[%s10328_s0 + %s9085_s6]]   ;;  %s9088_s18 = smov 4  }
   0x3   :  { %s9141_s13 = sld [smem:[%s10328_s0 + %s9086_s10]]   ;;  %s9089_s22 = smov 5  }
   0x4   :  { %s9146_s17 = sld [smem:[%s10328_s0 + %s9087_s14]]   ;;  %s9090_s26 = smov 6  }
   0x5   :  { %s9151_s21 = sld [smem:[%s10328_s0 + %s9088_s18]]   ;;  %s9091_s30 = smov 7  }
   0x6   :  { %s9156_s25 = sld [smem:[%s10328_s0 + %s9089_s22]]   ;;  %s9092_s4 = smov 8  }
   0x7   :  { %s9161_s29 = sld [smem:[%s10328_s0 + %s9090_s26]]   ;;  %s9093_s10 = smov 9  }
   0x8   :  { %s9166_s3 = sld [smem:[%s10328_s0 + %s9091_s30]]   ;;  %s9094_s15 = smov 10  }
   0x9   :  { %s9171_s8 = sld [smem:[%s10328_s0 + %s9092_s4]]   ;;  %s9095_s20 = smov 11  }
   0xa   :  { %s9176_s14 = sld [smem:[%s10328_s0 + %s9093_s10]]   ;;  %s9096_s26 = smov 12  }
   0xb   :  { %s9181_s19 = sld [smem:[%s10328_s0 + %s9094_s15]]   ;;  %s9097_s1 = smov 13  }
   0xc   :  { %s9186_s24 = sld [smem:[%s10328_s0 + %s9095_s20]]   ;;  %s9098_s7 = smov 14  }
   0xd   :  { %s9191_s30 = sld [smem:[%s10328_s0 + %s9096_s26]]   ;;  %s9099_s15 = smov 15  }
   0xe   :  { %s9196_s6 = sld [smem:[%s10328_s0 + %s9097_s1]]   ;;  %s9100_s22 = smov 16  }
   0xf   :  { %s9201_s12 = sld [smem:[%s10328_s0 + %s9098_s7]]   ;;  %s9101_s28 = smov 17  }
  0x10   :  { %s9206_s20 = sld [smem:[%s10328_s0 + %s9099_s15]]   ;;  %s9102_s7 = smov 18  }
  0x11   :  { %s9211_s27 = sld [smem:[%s10328_s0 + %s9100_s22]]   ;;  %s9103_s15 = smov 19  }
  0x12   :  { %10343 = sst [smem:[#allocation2_spill]] %s9186_s24  ;;  %s9104_s22 = smov 20  }
  0x13   :  { %10344 = sst [smem:[#allocation3_spill]] %s9191_s30 }
  0x14   :  { %10345 = sst [smem:[#allocation4_spill]] %s9196_s6 }
  0x15   :  { %10346 = sst [smem:[#allocation5_spill]] %s9201_s12 }
  0x16   :  { %10347 = sst [smem:[#allocation6_spill]] %s9206_s20 }
  0x17   :  { %10348 = sst [smem:[#allocation7_spill]] %s9211_s27 }
  0x18   :  { %s9216_s4 = sld [smem:[%s10328_s0 + %s9101_s28]]   ;;  %s9105_s28 = smov 21  }
  0x19   :  { %s9221_s12 = sld [smem:[%s10328_s0 + %s9102_s7]]   ;;  %s9106_s7 = smov 22  }
  0x1a   :  { %s9226_s20 = sld [smem:[%s10328_s0 + %s9103_s15]]   ;;  %s9107_s15 = smov 23  }
  0x1b   :  { %s9231_s27 = sld [smem:[%s10328_s0 + %s9104_s22]]   ;;  %s9108_s22 = smov 24  }
  0x1e   :  { %10349 = sst [smem:[#allocation8_spill]] %s9216_s4 }
  0x1f   :  { %10350 = sst [smem:[#allocation9_spill]] %s9221_s12 }
  0x20   :  { %10351 = sst [smem:[#allocation10_spill]] %s9226_s20 }
  0x21   :  { %10352 = sst [smem:[#allocation11_spill]] %s9231_s27 }
  0x22   :  { %s9236_s4 = sld [smem:[%s10328_s0 + %s9105_s28]]   ;;  %s9109_s28 = smov 25  }
  0x23   :  { %s9241_s12 = sld [smem:[%s10328_s0 + %s9106_s7]]   ;;  %s9110_s7 = smov 26  }
  0x24   :  { %s9246_s20 = sld [smem:[%s10328_s0 + %s9107_s15]]   ;;  %s9111_s15 = smov 27  }
  0x25   :  { %s9251_s27 = sld [smem:[%s10328_s0 + %s9108_s22]]   ;;  %s9112_s22 = smov 28  }
  0x28   :  { %10353 = sst [smem:[#allocation12_spill]] %s9236_s4 }
  0x29   :  { %10354 = sst [smem:[#allocation13_spill]] %s9241_s12 }
  0x2a   :  { %10355 = sst [smem:[#allocation14_spill]] %s9246_s20 }
  0x2b   :  { %10356 = sst [smem:[#allocation15_spill]] %s9251_s27 }
  0x2c   :  { %s9256_s4 = sld [smem:[%s10328_s0 + %s9109_s28]]   ;;  %s9113_s28 = smov 29  }
  0x2d   :  { %s9261_s12 = sld [smem:[%s10328_s0 + %s9110_s7]]   ;;  %s9114_s7 = smov 30  }
  0x2e   :  { %s9266_s20 = sld [smem:[%s10328_s0 + %s9111_s15]]   ;;  %s9115_s15 = smov 31  }
  0x2f   :  { %s9271_s27 = sld [smem:[%s10328_s0 + %s9112_s22]]   ;;  %s9116_s22 = smov 32  }
  0x30   :  { %s9276_s6 = sld [smem:[%s10328_s0 + %s9113_s28]]   ;;  %s9117_s28 = smov 33  }
  0x31   :  { %s9286_s30 = sld [smem:[%s10328_s0 + %s9115_s15]]   ;;  %s9303_s15 = smov 0  }
  0x32   :  { %10357 = sst [smem:[#allocation16_spill]] %s9256_s4 }
  0x33   :  { %10358 = sst [smem:[#allocation17_spill]] %s9261_s12 }
  0x34   :  { %s9281_s12 = sld [smem:[%s10328_s0 + %s9114_s7]]   ;;  %s9118_s7 = smov 34  }
  0x35   :  { %s9291_s4 = sld [smem:[%s10328_s0 + %s9116_s22]]  }
  0x36   :  { %s9296_s24 = sld [smem:[%s10328_s0 + %s9117_s28]]  }
  0x3a   :  { %10359 = sst [smem:[#allocation18_spill]] %s9281_s12 }
  0x3b   :  { %s9301_s12 = sld [smem:[%s10328_s0 + %s9118_s7]]  }
  0x3c LB: > { %s7015_s16 = sadd.s32 4294967295, %s9083_s15   ;;  %p7019_p0 = scmp.ge.s32.totalorder %s9083_s15, 1  ;;  %s9083_s15 = sphi %s9303_s15, %s80_s15  }
  0x3d   : > { %p962_p1 = scmp.lt.s32.totalorder %s9083_s15, 3 }
  0x3f   : > { %p963_p2 = pnand %p7019_p0, %p962_p1 }
  0x40   : > { %v7034_v0 = vld [vmem:[%s9136_s9 + $0x90] sm:$0xff] (!%p963_p2)  ;;  %v7035_v1 = vld [vmem:[%s9136_s9 + $0x98] sm:$0xff] (!%p963_p2)  ;;  %v7036_v2 = vld [vmem:[%s9136_s9 + $0xa0] sm:$0xff] (!%p963_p2)  ;;  %p1077_p3 = scmp.lt.s32.totalorder (!%p963_p2), %s7015_s16, 1  ;;  %v9119_v3 = vmov (!%p963_p2), 0.0|0.0   ;;  %vm1138_vm0 = vcmask (!%p963_p2), 130048  }
  0x41   : > { %966 = sbr.rel (%p963_p2) target bundleno = 7263 (0x1c5f), region = 128  ;;  %8380 = vmatprep.subr.bf16.mxu1 (!%p963_p2), %v9119_v3  ;;  %v8381_v4 = vpack.c.bf16 (!%p963_p2), %v7035_v1, %v7034_v0  ;;  %v7037_v5 = vld [vmem:[%s9136_s9 + $0xa8] sm:$0xff] (!%p963_p2)  ;;  %8353 = vmatprep.subr.bf16.mxu0 (!%p963_p2), %v9119_v3  ;;  %v7038_v7 = vld [vmem:[%s9136_s9 + $0xb0] sm:$0xff] (!%p963_p2)  ;;  %v7039_v8 = vld [vmem:[%s9136_s9 + $0xb8] sm:$0xff] (!%p963_p2)  ;;  %vm1856_vm1 = vcmask (!%p963_p2), 581632   ;;  %vm1854_vm2 = vcmask (!%p963_p2), 588800  }
  0x42   : > { %v8384_v6 = vpack.c.bf16 (!%p963_p2), %v7037_v5, %v7036_v2  ;;  %v1120_v9 = vld [vmem:[%s9136_s9] sm:$0xff] (!%p963_p2)  ;;  %v1121_v10 = vld [vmem:[%s9136_s9 + $0x8] sm:$0xff] (!%p963_p2)  ;;  %v1122_v12 = vld [vmem:[%s9136_s9 + $0x10] sm:$0xff] (!%p963_p2)  ;;  %v8387_v14 = vpack.c.bf16 (!%p963_p2), %v7039_v8, %v7038_v7  ;;  %vm9120_vm3 = vmmov (!%p963_p2), 0   ;;  %vm2040_vm4 = vcmask (!%p963_p2), 1040384   ;;  %s10362_s1 = sld [smem:[#allocation2_spill]] (!%p963_p2) }
  0x43   : > { %8382 = vmatpush1.bf16.msra.mxu1 (!%p963_p2), %v8381_v4  ;;  %v8354_v11 = vpack.c.bf16 (!%p963_p2), %v1121_v10, %v1120_v9  ;;  %v1123_v13 = vld [vmem:[%s9136_s9 + $0x18] sm:$0xff] (!%p963_p2)  ;;  %v7040_v15 = vld [vmem:[%s9136_s9 + $0xc0] sm:$0xff] (!%p963_p2)  ;;  %v7041_v16 = vld [vmem:[%s9136_s9 + $0xc8] sm:$0xff] (!%p963_p2)  ;;  %vm9122_vm5 = vmmov (!%p963_p2), 1   ;;  %vm2036_vm7 = vcmask (!%p963_p2), 72704   ;;  %vm2550_vm8 = vcmask (!%p963_p2), 654336  }
  0x44   : > { %8383 = vmatprep.subr.bf16.mxu1 (!%p963_p2), %v9119_v3  ;;  %v8357_v17 = vpack.c.bf16 (!%p963_p2), %v1123_v13, %v1122_v12  ;;  %v1124_v18 = vld [vmem:[%s9136_s9 + $0x20] sm:$0xff] (!%p963_p2)  ;;  %v1125_v19 = vld [vmem:[%s9136_s9 + $0x28] sm:$0xff] (!%p963_p2)  ;;  %v8390_v21 = vpack.c.bf16 (!%p963_p2), %v7041_v16, %v7040_v15  ;;  %v7042_v22 = vld [vmem:[%s9136_s9 + $0xd0] sm:$0xff] (!%p963_p2)  ;;  %vm2528_vm9 = vcmask (!%p963_p2), 651264   ;;  %vm2724_vm10 = vcmask (!%p963_p2), 1044480   ;;  %s10363_s7 = sld [smem:[#allocation16_spill]] (!%p963_p2) }
  0x45   : > { %8355 = vmatpush1.bf16.msra.mxu0 (!%p963_p2), %v8354_v11  ;;  %v8360_v23 = vpack.c.bf16 (!%p963_p2), %v1125_v19, %v1124_v18  ;;  %v7043_v24 = vld [vmem:[%s9136_s9 + $0xd8] sm:$0xff] (!%p963_p2)  ;;  %v1126_v25 = vld [vmem:[%s9136_s9 + $0x30] sm:$0xff] (!%p963_p2)  ;;  %v7044_v28 = vld [vmem:[%s9136_s9 + $0xe0] sm:$0xff] (!%p963_p2)  ;;  %vm2720_vm11 = vcmask (!%p963_p2), 39936   ;;  %vm3253_vm12 = vcmask (!%p963_p2), 521216   ;;  %vm3279_vm13 = vcmask (!%p963_p2), 523264  }
  0x46   : > { %8356 = vmatprep.subr.bf16.mxu0 (!%p963_p2), %v9119_v3  ;;  %v1127_v26 = vld [vmem:[%s9136_s9 + $0x38] sm:$0xff] (!%p963_p2)  ;;  %v8393_v27 = vpack.c.bf16 (!%p963_p2), %v7043_v24, %v7042_v22  ;;  %v7045_v30 = vld [vmem:[%s9136_s9 + $0xe8] sm:$0xff] (!%p963_p2)  ;;  %v1128_v31 = vld [vmem:[%s9136_s9 + $0x40] sm:$0xff] (!%p963_p2)  ;;  %vm3455_vm14 = vcmask (!%p963_p2), 1045504   ;;  %vm3451_vm15 = vcmask (!%p963_p2), 48128   ;;  %s10364_s10 = sld [smem:[#allocation3_spill]] (!%p963_p2) }
  0x47   : > { %8385 = vmatpush1.bf16.msra.mxu1 (!%p963_p2), %v8384_v6  ;;  %v8363_v29 = vpack.c.bf16 (!%p963_p2), %v1127_v26, %v1126_v25  ;;  %v1129_v32 = vld [vmem:[%s9136_s9 + $0x48] sm:$0xff] (!%p963_p2)  ;;  %v8396_v33 = vpack.c.bf16 (!%p963_p2), %v7045_v30, %v7044_v28  ;;  %v7046_v34 = vld [vmem:[%s9136_s9 + $0xf0] sm:$0xff] (!%p963_p2)  ;;  %v7047_v36 = vld [vmem:[%s9136_s9 + $0xf8] sm:$0xff] (!%p963_p2)  ;;  %s10365_s11 = sld [smem:[#allocation18_spill]] (!%p963_p2) }
  0x48   : > { %s10381_s16 = smov (!%p1077_p3, %s7015_s16), 1  ;;  %8386 = vmatprep.subr.bf16.mxu1 %v9119_v3  ;;  %v8366_v35 = vpack.c.bf16 %v1129_v32, %v1128_v31  ;;  %v1130_v37 = vld [vmem:[%s9136_s9 + $0x50] sm:$0xff]  ;;  %v1131_v38 = vld [vmem:[%s9136_s9 + $0x58] sm:$0xff]  ;;  %v8399_v39 = vpack.c.bf16 %v7047_v36, %v7046_v34  ;;  %v7048_v40 = vld [vmem:[%s9136_s9 + $0x100] sm:$0xff] }
  0x49   : > { %s7492_s0 = sshll.u32 %s10381_s16, 5  ;;  %8358 = vmatpush1.bf16.msra.mxu0 %v8357_v17  ;;  %v8369_v41 = vpack.c.bf16 %v1131_v38, %v1130_v37  ;;  %v7049_v42 = vld [vmem:[%s9136_s9 + $0x108] sm:$0xff]  ;;  %v1132_v43 = vld [vmem:[%s9136_s9 + $0x60] sm:$0xff]  ;;  %v7050_v46 = vld [vmem:[%s9136_s9 + $0x110] sm:$0xff]  ;;  %s7493_s22 = sshll.u32 %s10381_s16, 4 }
  0x4a   : > { %s9328_s18 = scalar_lea.vmem %s9131_s5, %s7492_s0  ;;  %8359 = vmatprep.subr.bf16.mxu0 %v9119_v3  ;;  %v1133_v44 = vld [vmem:[%s9136_s9 + $0x68] sm:$0xff]  ;;  %v8402_v45 = vpack.c.bf16 %v7049_v42, %v7048_v40  ;;  %v7051_v48 = vld [vmem:[%s9136_s9 + $0x118] sm:$0xff]  ;;  %v1134_v49 = vld [vmem:[%s9136_s9 + $0x70] sm:$0xff]  ;;  %s1086_s23 = scalar_lea.vmem %s9266_s20, %s7493_s22 }
  0x4b   : > { %v9337_v20 = vld [vmem:[%s9328_s18 + $0x8] sm:$0xff]  ;;  %8388 = vmatpush1.bf16.msra.mxu1 %v8387_v14  ;;  %v8372_v47 = vpack.c.bf16 %v1133_v44, %v1132_v43  ;;  %v1135_v50 = vld [vmem:[%s9136_s9 + $0x78] sm:$0xff]  ;;  %v8405_v51 = vpack.c.bf16 %v7051_v48, %v7050_v46  ;;  %v7060_v53 = vld [vmem:[%s9136_s9 + $0x120] sm:$0xff]  ;;  %s9624_s26 = sshll.u32 %s10381_s16, 3  ;;  %s1095_s2 = scalar_lea.vmem %s9276_s6, %s7493_s22 }
  0x4c   : > { %7052 = vmatprep.mubr.msk.f32.mxu1 %vm1138_vm0, %v9337_v20  ;;  %7032 = vmatprep.mubr.msk.f32.mxu0 %vm1138_vm0, %v9337_v20  ;;  %v8375_v52 = vpack.c.bf16 %v1135_v50, %v1134_v49  ;;  %v7061_v54 = vld [vmem:[%s9136_s9 + $0x128] sm:$0xff]  ;;  %v1136_v55 = vld [vmem:[%s9136_s9 + $0x80] sm:$0xff]  ;;  %v9384_v59 = vld [vmem:[%s9328_s18 + $0x18] sm:$0xff]  ;;  %s1090_s28 = scalar_lea.vmem %s9271_s27, %s9624_s26  ;;  %s10366_s0 = sld [smem:[#allocation4_spill]] }
  0x4d   : > { %8389 = vmatprep.subr.bf16.mxu1 %v9119_v3  ;;  %8361 = vmatpush1.bf16.msra.mxu0 %v8360_v23  ;;  %v1137_v56 = vld [vmem:[%s9136_s9 + $0x88] sm:$0xff]  ;;  %v9380_v57 = vld [vmem:[%s9328_s18] sm:$0xff]  ;;  %v8416_v58 = vpack.c.bf16 %v7061_v54, %v7060_v53  ;;  %v7062_v60 = vld [vmem:[%s9136_s9 + $0x130] sm:$0xff]  ;;  %s10367_s22 = sld [smem:[#allocation17_spill]] }
  0x4e   : > { %8362 = vmatprep.subr.bf16.mxu0 %v9119_v3  ;;  %v7063_v61 = vld [vmem:[%s9136_s9 + $0x138] sm:$0xff]  ;;  %v8378_v62 = vpack.c.bf16 %v1137_v56, %v1136_v55  ;;  %v9393_v63 = vld [vmem:[%s9328_s18 + $0x10] sm:$0xff]  ;;  %v7064_v1 = vld [vmem:[%s9136_s9 + $0x140] sm:$0xff] }
  0x4f   : > { %8391 = vmatpush1.bf16.msra.mxu1 %v8390_v21  ;;  %v8419_v0 = vpack.c.bf16 %v7063_v61, %v7062_v60  ;;  %v7065_v2 = vld [vmem:[%s9136_s9 + $0x148] sm:$0xff]  ;;  %v7066_v5 = vld [vmem:[%s9136_s9 + $0x150] sm:$0xff]  ;;  %v7067_v6 = vld [vmem:[%s9136_s9 + $0x158] sm:$0xff] }
  0x50   : > { %8392 = vmatprep.subr.bf16.mxu1 %v9119_v3  ;;  %v8422_v4 = vpack.c.bf16 %v7065_v2, %v7064_v1  ;;  %v8425_v7 = vpack.c.bf16 %v7067_v6, %v7066_v5  ;;  %v7068_v8 = vld [vmem:[%s9136_s9 + $0x160] sm:$0xff]  ;;  %v7069_v9 = vld [vmem:[%s9136_s9 + $0x168] sm:$0xff]  ;;  %v7070_v11 = vld [vmem:[%s9136_s9 + $0x170] sm:$0xff] }
  0x51   : > { %8364 = vmatpush1.bf16.msra.mxu0 %v8363_v29  ;;  %v8428_v10 = vpack.c.bf16 %v7069_v9, %v7068_v8  ;;  %v7071_v12 = vld [vmem:[%s9136_s9 + $0x178] sm:$0xff]  ;;  %v7072_v14 = vld [vmem:[%s9136_s9 + $0x180] sm:$0xff]  ;;  %v7073_v15 = vld [vmem:[%s9136_s9 + $0x188] sm:$0xff] }
  0x52   : > { %8365 = vmatprep.subr.bf16.mxu0 %v9119_v3  ;;  %v8431_v13 = vpack.c.bf16 %v7071_v12, %v7070_v11  ;;  %v8434_v16 = vpack.c.bf16 %v7073_v15, %v7072_v14  ;;  %v7074_v17 = vld [vmem:[%s9136_s9 + $0x190] sm:$0xff]  ;;  %v7075_v18 = vld [vmem:[%s9136_s9 + $0x198] sm:$0xff]  ;;  %v7076_v21 = vld [vmem:[%s9136_s9 + $0x1a0] sm:$0xff] }
  0x53   : > { %8394 = vmatpush1.bf16.msra.mxu1 %v8393_v27  ;;  %v8437_v19 = vpack.c.bf16 %v7075_v18, %v7074_v17  ;;  %v7077_v22 = vld [vmem:[%s9136_s9 + $0x1a8] sm:$0xff]  ;;  %v7054_v24 = vld [vmem:[%s9141_s13 + $0x10] sm:$0xff]  ;;  %v7055_v32 = vld [vmem:[%s9141_s13 + $0x18] sm:$0x1] }
  0x54   : > { %8395 = vmatprep.subr.bf16.mxu1 %v9119_v3  ;;  %v8440_v23 = vpack.c.bf16 %v7077_v22, %v7076_v21  ;;  %v1220_v34 = vld [vmem:[%s9141_s13] sm:$0xff]  ;;  %v1221_v37 = vld [vmem:[%s9141_s13 + $0x8] sm:$0x1]  ;;  %v7084_v44 = vld [vmem:[%s9136_s9 + $0x1b0] sm:$0xff] }
  0x55   : > { %8367 = vmatpush1.bf16.msra.mxu0 %v8366_v35  ;;  %v7080_v38 = vld [vmem:[%s9141_s13 + $0x20] sm:$0xff]  ;;  %v7081_v46 = vld [vmem:[%s9141_s13 + $0x28] sm:$0x1]  ;;  %v7096_v1 = vld [vmem:[%s9136_s9 + $0x210] sm:$0xff] }
  0x56   : > { %8368 = vmatprep.subr.bf16.mxu0 %v9119_v3  ;;  %v7086_v48 = vld [vmem:[%s9136_s9 + $0x1c0] sm:$0xff]  ;;  %v7087_v49 = vld [vmem:[%s9136_s9 + $0x1c8] sm:$0xff]  ;;  %v7097_v2 = vld [vmem:[%s9136_s9 + $0x218] sm:$0xff] }
  0x57   : > { %8397 = vmatpush1.bf16.msra.mxu1 %v8396_v33  ;;  %v8450_v50 = vpack.c.bf16 %v7087_v49, %v7086_v48  ;;  %v7090_v54 = vld [vmem:[%s9136_s9 + $0x1e0] sm:$0xff]  ;;  %v7091_v55 = vld [vmem:[%s9136_s9 + $0x1e8] sm:$0xff]  ;;  %v7100_v8 = vld [vmem:[%s9136_s9 + $0x230] sm:$0xff] }
  0x58   : > { %8398 = vmatprep.subr.bf16.mxu1 %v9119_v3  ;;  %v8456_v56 = vpack.c.bf16 %v7091_v55, %v7090_v54  ;;  %v7094_v61 = vld [vmem:[%s9136_s9 + $0x200] sm:$0xff]  ;;  %v7099_v6 = vld [vmem:[%s9136_s9 + $0x228] sm:$0xff]  ;;  %v7101_v9 = vld [vmem:[%s9136_s9 + $0x238] sm:$0xff] }
  0x59   : > { %8370 = vmatpush1.bf16.msra.mxu0 %v8369_v41  ;;  %v7098_v5 = vld [vmem:[%s9136_s9 + $0x220] sm:$0xff]  ;;  %v7104_v11 = vld [vmem:[%s9141_s13 + $0x30] sm:$0xff]  ;;  %vm9521_vm6 = vmpackc.low %vm2040_vm4, %vm9122_vm5  ;;  %vm4771_vm4 = vcmask 326656   ;;  %vm5396_vm5 = vcmask 387072  }
  0x5a   : > { %8371 = vmatprep.subr.bf16.mxu0 %v9119_v3  ;;  %v1858_v12 = vld [vmem:[%s9151_s21] sm:$0xff]  ;;  %v1860_v14 = vld [vmem:[%s9151_s21 + $0x10] sm:$0xff] }
  0x5b   : > { %8400 = vmatpush1.bf16.msra.mxu1 %v8399_v39  ;;  %v1862_v18 = vld [vmem:[%s9151_s21 + $0x20] sm:$0xff] }
  0x5c   : > { %8401 = vmatprep.subr.bf16.mxu1 %v9119_v3  ;;  %v7118_v48 = vld [vmem:[%s9151_s21 + $0x80] sm:$0xff] }
  0x5d   : > { %8373 = vmatpush1.bf16.msra.mxu0 %v8372_v47 }
  0x5e   : > { %8374 = vmatprep.subr.bf16.mxu0 %v9119_v3 }
  0x5f   : > { %8403 = vmatpush1.bf16.msra.mxu1 %v8402_v45  ;;  %v7085_v45 = vld [vmem:[%s9136_s9 + $0x1b8] sm:$0xff] }
  0x60   : > { %8404 = vmatprep.subr.bf16.mxu1 %v9119_v3  ;;  %v8447_v47 = vpack.c.bf16 %v7085_v45, %v7084_v44  ;;  %v7115_v44 = vld [vmem:[%s9151_s21 + $0x68] sm:$0xff]  ;;  %v7116_v45 = vld [vmem:[%s9151_s21 + $0x70] sm:$0xff] }
  0x61   : > { %8376 = vmatpush1.bf16.msra.mxu0 %v8375_v52  ;;  %v7089_v52 = vld [vmem:[%s9136_s9 + $0x1d8] sm:$0xff] }
  0x62   : > { %8377 = vmatprep.subr.bf16.mxu0 %v9119_v3 }
  0x63   : > { %8406 = vmatpush1.bf16.msra.mxu1 %v8405_v51  ;;  %v7088_v51 = vld [vmem:[%s9136_s9 + $0x1d0] sm:$0xff] }
  0x64   : > { %8415 = vmatprep.subr.bf16.mxu1 %v9119_v3  ;;  %v8453_v53 = vpack.c.bf16 %v7089_v52, %v7088_v51  ;;  %v9121_v51 = vmov 0.0  }
  0x65   : > { %8379 = vmatpush1.bf16.msra.mxu0 %v8378_v62  ;;  %v7095_v62 = vld [vmem:[%s9136_s9 + $0x208] sm:$0xff] }
  0x66   : > { %1306 = vmatmul.mubr.f32.vlgmr.msra.gmra.mrb[0].mxu1 %v9380_v57 }
  0x67   : > { %8417 = vmatpush1.bf16.msra.mxu1 %v8416_v58  ;;  %7053 = vmatprep.mubr.msk.f32.mxu1 %vm1138_vm0, %v9384_v59  ;;  %v7093_v58 = vld [vmem:[%s9136_s9 + $0x1f8] sm:$0xff] }
  0x68   : > { %8418 = vmatprep.subr.bf16.mxu1 %v9119_v3  ;;  %1210 = vmatmul.mubr.f32.vlgmr.msra.gmra.mrb[0].mxu0 %v9380_v57 }
  0x69   : > { %7033 = vmatprep.mubr.msk.f32.mxu0 %vm1138_vm0, %v9384_v59 }
  0x6a   : > { %1311 = vmatmul.mubr.f32.gmra.mrb[2].mxu1 %v9393_v63 }
  0x6b   : > { %8420 = vmatpush1.bf16.msra.mxu1 %v8419_v0  ;;  %7078 = vmatprep.mubr.msk.f32.mxu1 %vm1138_vm0, %v9337_v20  ;;  %v8462_v0 = vpack.c.bf16 %v7095_v62, %v7094_v61  ;;  %v7128_v61 = vld [vmem:[%s9151_s21 + $0x98] sm:$0xff]  ;;  %v7122_v62 = vld [vmem:[%s9156_s25 + $0x8] sm:$0x1f] }
  0x6c   : > { %8421 = vmatprep.subr.bf16.mxu1 %v9119_v3  ;;  %1215 = vmatmul.mubr.f32.gmra.mrb[2].mxu0 %v9393_v63 }
  0x6d   : > { %7774 = vmatprep.mubr.msk.f32.mxu0 %vm1138_vm0, %v7054_v24  ;;  %v7105_v24 = vld [vmem:[%s9141_s13 + $0x38] sm:$0x1] }
  0x6f   : > { %8423 = vmatpush1.bf16.msra.mxu1 %v8422_v4  ;;  %v8465_v4 = vpack.c.bf16 %v7097_v2, %v7096_v1  ;;  %v7129_v1 = vld [vmem:[%s9151_s21 + $0xa0] sm:$0xff]  ;;  %v7130_v2 = vld [vmem:[%s9151_s21 + $0xa8] sm:$0xff] }
  0x70   : > { %8424 = vmatprep.subr.bf16.mxu1 %v9119_v3 }
  0x73   : > { %8426 = vmatpush1.bf16.msra.mxu1 %v8425_v7  ;;  %v8468_v7 = vpack.c.bf16 %v7099_v6, %v7098_v5  ;;  %v8521_v5 = vpack.c.bf16 %v7130_v2, %v7129_v1  ;;  %v7131_v6 = vld [vmem:[%s9151_s21 + $0xb0] sm:$0xff]  ;;  %v2535_v2 = vld [vmem:[%s9166_s3 + $0x28] sm:$0xff] }
  0x74   : > { %8427 = vmatprep.subr.bf16.mxu1 %v9119_v3 }
  0x77   : > { %8429 = vmatpush1.bf16.msra.mxu1 %v8428_v10  ;;  %v8471_v10 = vpack.c.bf16 %v7101_v9, %v7100_v8  ;;  %v7133_v9 = vld [vmem:[%s9151_s21 + $0xc0] sm:$0xff] }
  0x78   : > { %8430 = vmatprep.subr.bf16.mxu1 %v9119_v3 }
  0x7b   : > { %8432 = vmatpush1.bf16.msra.mxu1 %v8431_v13  ;;  %v1859_v13 = vld [vmem:[%s9151_s21 + $0x8] sm:$0xff] }
  0x7c   : > { %8433 = vmatprep.subr.bf16.mxu1 %v9119_v3  ;;  %v8477_v15 = vpack.c.bf16 %v1859_v13, %v1858_v12  ;;  %v7135_v12 = vld [vmem:[%s9151_s21 + $0xd0] sm:$0xff] }
  0x7f   : > { %8435 = vmatpush1.bf16.msra.mxu1 %v8434_v16  ;;  %v1861_v16 = vld [vmem:[%s9151_s21 + $0x18] sm:$0xff] }
  0x80   : > { %8436 = vmatprep.subr.bf16.mxu1 %v9119_v3  ;;  %v8481_v17 = vpack.c.bf16 %v1861_v16, %v1860_v14 }
  0x83   : > { %8438 = vmatpush1.bf16.msra.mxu1 %v8437_v19  ;;  %v1863_v19 = vld [vmem:[%s9151_s21 + $0x28] sm:$0xff] }
  0x84   : > { %8439 = vmatprep.subr.bf16.mxu1 %v9119_v3 }
  0x87   : > { %8441 = vmatpush1.bf16.msra.mxu1 %v8440_v23 }
  0x88   : > { %8478 = vmatprep.subr.bf16.mxu1 %v8477_v15 }
  0x8a   : > { %1565 = vmatmul.mubr.f32.vlgmr.msra.gmra.mrb[4].mxu1 %v9380_v57 }
  0x8b   : > { %7079 = vmatprep.mubr.msk.f32.mxu1 %vm1138_vm0, %v9384_v59  ;;  %8480 = vmatpush3.bf16.msra.mxu1 %v8477_v15 }
  0x8c   : > { %8482 = vmatprep.subr.bf16.mxu1 %v8481_v17 }
  0x8e   : > { %1570 = vmatmul.mubr.f32.gmra.mrb[6].mxu1 %v9393_v63 }
  0x8f   : > { %8484 = vmatpush3.bf16.msra.mxu1 %v8481_v17 }
 0x139   : > { %v1307_v25 = vpop.f32.mrb[0].mxu1 }
 0x13a   : > { %v1309_v26 = vpop.f32.mrb[1].mxu1 }
 0x13b   : > { %v1211_v30 = vpop.f32.mrb[0].mxu0  ;;  %v1865_v26 = vld [vmem:[%s9151_s21 + $0x38] sm:$0xff] }
 0x13c   : > { %v1213_v31 = vpop.f32.mrb[1].mxu0 }
 0x13d   : > { %v1312_v27 = vpop.f32.mrb[2].mxu1 }
 0x13e   : > { %v8407_v28 = vpack.c.bf16 %v1312_v27, %v1307_v25  ;;  %v1314_v29 = vpop.f32.mrb[3].mxu1  ;;  %v1864_v25 = vld [vmem:[%s9151_s21 + $0x30] sm:$0xff] }
 0x13f   : > { %v1216_v33 = vpop.f32.mrb[2].mxu0  ;;  %v8489_v27 = vpack.c.bf16 %v1865_v26, %v1864_v25  ;;  %v7111_v29 = vld [vmem:[%s9151_s21 + $0x48] sm:$0xff]  ;;  %v7145_v26 = vld [vmem:[%s9151_s21 + $0xf8] sm:$0xff] }
 0x140   : > { %8408 = vmatprep.subr.bf16.mxu0 %v8407_v28  ;;  %v8411_v35 = vpack.c.bf16 %v1216_v33, %v1211_v30  ;;  %v1218_v36 = vpop.f32.mrb[3].mxu0  ;;  %v7112_v30 = vld [vmem:[%s9151_s21 + $0x50] sm:$0xff] }
 0x141   : > { %8410 = vmatpush3.bf16.msra.mxu0 %v8407_v28  ;;  %v1866_v28 = vld [vmem:[%s9151_s21 + $0x40] sm:$0xff]  ;;  %v8493_v31 = vpack.c.bf16 %v7112_v30, %v7111_v29  ;;  %v7147_v29 = vld [vmem:[%s9151_s21 + $0x108] sm:$0xff]  ;;  %v7148_v30 = vld [vmem:[%s9151_s21 + $0x110] sm:$0xff] }
 0x142   : > { %8412 = vmatprep.subr.bf16.mxu0 %v8411_v35 }
 0x144   : > { %7775 = vmatmul.mubr.msk.f32.vlgmr.msra.gmra.mrb[4].mxu0 %vm1138_vm0, %v7055_v32  ;;  %v7108_v32 = vld [vmem:[%s9146_s17] ss:$0 sm:$0xff] }
 0x145   : > { %7781 = vmatprep.mubr.msk.f32.mxu0 %vm1138_vm0, %v1220_v34  ;;  %8414 = vmatpush3.bf16.msra.mxu0 %v8411_v35 }
 0x14c   : > { %7782 = vmatmul.mubr.msk.f32.vlgmr.msra.gmra.mrb[4].mxu0 %vm1138_vm0, %v1221_v37 }
 0x14d   : > { %7788 = vmatprep.mubr.msk.f32.mxu0 %vm1138_vm0, %v7080_v38 }
 0x15d   : > { %v1566_v39 = vpop.f32.mrb[4].mxu1 }
 0x15e   : > { %v1568_v40 = vpop.f32.mrb[5].mxu1 }
 0x15f   : > { %v7114_v40 = vld [vmem:[%s9151_s21 + $0x60] sm:$0xff] }
 0x161   : > { %v1571_v41 = vpop.f32.mrb[6].mxu1 }
 0x162   : > { %v8442_v42 = vpack.c.bf16 %v1571_v41, %v1566_v39  ;;  %v1573_v43 = vpop.f32.mrb[7].mxu1  ;;  %v7113_v39 = vld [vmem:[%s9151_s21 + $0x58] sm:$0xff] }
 0x163   : > { %v8497_v43 = vpack.c.bf16 %v7114_v40, %v7113_v39  ;;  %v7162_v39 = vld [vmem:[%s9166_s3 + $0xc8] sm:$0xff]  ;;  %v7164_v40 = vld [vmem:[%s9166_s3 + $0xd8] sm:$0xff] }
 0x164   : > { %8443 = vmatprep.subr.bf16.mxu0 %v8442_v42 }
 0x165   : > { %8445 = vmatpush3.bf16.msra.mxu0 %v8442_v42 }
 0x166   : > { %8446 = vmatprep.subr.bf16.mxu0 %v9119_v3 }
 0x168   : > { %7789 = vmatmul.mubr.msk.f32.vlgmr.msra.gmra.mrb[4].mxu0 %vm1138_vm0, %v7081_v46  ;;  %v8501_v46 = vpack.c.bf16 %v7116_v45, %v7115_v44  ;;  %v7166_v45 = vld [vmem:[%s9166_s3 + $0xe8] sm:$0xff] }
 0x169   : > { %8448 = vmatpush1.bf16.msra.mxu0 %v8447_v47  ;;  %7102 = vmatprep.mubr.msk.f32.mxu0 %vm1138_vm0, %v9337_v20  ;;  %v7092_v20 = vld [vmem:[%s9136_s9 + $0x1f0] sm:$0xff]  ;;  %v7117_v47 = vld [vmem:[%s9151_s21 + $0x78] sm:$0xff] }
 0x16a   : > { %8449 = vmatprep.subr.bf16.mxu0 %v9119_v3  ;;  %v8459_v60 = vpack.c.bf16 %v7093_v58, %v7092_v20  ;;  %v8505_v49 = vpack.c.bf16 %v7118_v48, %v7117_v47  ;;  %v7165_v48 = vld [vmem:[%s9166_s3 + $0xe0] sm:$0xff] }
 0x16d   : > { %8451 = vmatpush1.bf16.msra.mxu0 %v8450_v50  ;;  %v7119_v50 = vld [vmem:[%s9151_s21 + $0x88] sm:$0xff] }
 0x16e   : > { %8452 = vmatprep.subr.bf16.mxu0 %v9119_v3 }
 0x171   : > { %8454 = vmatpush1.bf16.msra.mxu0 %v8453_v53 }
 0x172   : > { %8455 = vmatprep.subr.bf16.mxu0 %v9119_v3 }
 0x175   : > { %8457 = vmatpush1.bf16.msra.mxu0 %v8456_v56 }
 0x176   : > { %8458 = vmatprep.subr.bf16.mxu0 %v9119_v3 }
 0x179   : > { %8460 = vmatpush1.bf16.msra.mxu0 %v8459_v60  ;;  %v7127_v60 = vld [vmem:[%s9151_s21 + $0x90] sm:$0xff] }
 0x17a   : > { %8461 = vmatprep.subr.bf16.mxu0 %v9119_v3 }
 0x17d   : > { %8463 = vmatpush1.bf16.msra.mxu0 %v8462_v0  ;;  %v8517_v0 = vpack.c.bf16 %v7128_v61, %v7127_v60 }
 0x17e   : > { %8464 = vmatprep.subr.bf16.mxu0 %v9119_v3 }
 0x181   : > { %8466 = vmatpush1.bf16.msra.mxu0 %v8465_v4  ;;  %v1948_v4 = vld [vmem:[%s9156_s25] sm:$0x1f] }
 0x182   : > { %8467 = vmatprep.subr.bf16.mxu0 %v9119_v3 }
 0x185   : > { %8469 = vmatpush1.bf16.msra.mxu0 %v8468_v7  ;;  %v7132_v7 = vld [vmem:[%s9151_s21 + $0xb8] sm:$0xff] }
 0x186   : > { %8470 = vmatprep.subr.bf16.mxu0 %v9119_v3  ;;  %v8525_v8 = vpack.c.bf16 %v7132_v7, %v7131_v6 }
 0x189   : > { %8472 = vmatpush1.bf16.msra.mxu0 %v8471_v10  ;;  %v7134_v10 = vld [vmem:[%s9151_s21 + $0xc8] sm:$0xff] }
 0x18c   : > { %1745 = vmatmul.mubr.f32.vlgmr.msra.gmra.mrb[6].mxu0 %v9380_v57  ;;  %v8485_v57 = vpack.c.bf16 %v1863_v19, %v1862_v18  ;;  %v7141_v18 = vld [vmem:[%s9151_s21 + $0xd8] sm:$0xff]  ;;  %v7142_v19 = vld [vmem:[%s9151_s21 + $0xe0] sm:$0xff] }
 0x18d   : > { %7103 = vmatprep.mubr.msk.f32.mxu0 %vm1138_vm0, %v9384_v59 }
 0x18e   : > { %8486 = vmatprep.subr.bf16.mxu1 %v8485_v57 }
 0x18f   : > { %8488 = vmatpush3.bf16.msra.mxu1 %v8485_v57 }
 0x190   : > { %1750 = vmatmul.mubr.f32.gmra.mrb[8].mxu0 %v9393_v63  ;;  %8490 = vmatprep.subr.bf16.mxu1 %v8489_v27 }
 0x191   : > { %7795 = vmatprep.mubr.msk.f32.mxu0 %vm1138_vm0, %v7104_v11  ;;  %v8529_v11 = vpack.c.bf16 %v7134_v10, %v7133_v9  ;;  %v2536_v9 = vld [vmem:[%s9166_s3 + $0x30] sm:$0xff]  ;;  %v2539_v10 = vld [vmem:[%s9166_s3 + $0x48] sm:$0xff] }
 0x193   : > { %8492 = vmatpush3.bf16.msra.mxu1 %v8489_v27  ;;  %v7146_v27 = vld [vmem:[%s9151_s21 + $0x100] sm:$0xff] }
 0x194   : > { %7814 = vmatprep.subr.mxu1 %v1866_v28 }
 0x197   : > { %7815 = vmatpush3.msra.mxu1 %v1866_v28  ;;  %v8545_v28 = vpack.c.bf16 %v7146_v27, %v7145_v26  ;;  %v7174_v26 = vld [vmem:[%s9166_s3 + $0x128] sm:$0xff]  ;;  %v7176_v27 = vld [vmem:[%s9166_s3 + $0x138] sm:$0xff] }
 0x198   : > { %8494 = vmatprep.subr.bf16.mxu1 %v8493_v31 }
 0x25f   : > { %v1746_v59 = vpop.f32.mrb[6].mxu0 }
 0x260   : > { %v1748_v63 = vpop.f32.mrb[7].mxu0 }
 0x261   : > { %v8537_v63 = vpack.c.bf16 %v7142_v19, %v7141_v18  ;;  %v2543_v19 = vld [vmem:[%s9166_s3 + $0x68] sm:$0xff] }
 0x263   : > { %v1751_v21 = vpop.f32.mrb[8].mxu0 }
 0x264   : > { %v8473_v22 = vpack.c.bf16 %v1751_v21, %v1746_v59  ;;  %v1753_v23 = vpop.f32.mrb[9].mxu0 }
 0x265   : > { %v7144_v23 = vld [vmem:[%s9151_s21 + $0xf0] sm:$0xff] }
 0x266   : > { %8474 = vmatprep.subr.bf16.mxu0 %v8473_v22 }
 0x267   : > { %8476 = vmatpush3.bf16.msra.mxu0 %v8473_v22  ;;  %v7143_v22 = vld [vmem:[%s9151_s21 + $0xe8] sm:$0xff] }
 0x268   : > { %8509 = vmatprep.subr.bf16.mxu0 %v9119_v3  ;;  %v8541_v25 = vpack.c.bf16 %v7144_v23, %v7143_v22  ;;  %v2542_v22 = vld [vmem:[%s9166_s3 + $0x60] sm:$0xff]  ;;  %v2544_v23 = vld [vmem:[%s9166_s3 + $0x70] sm:$0xff] }
 0x26a   : > { %7796 = vmatmul.mubr.msk.f32.vlgmr.msra.gmra.mrb[4].mxu0 %vm1138_vm0, %v7105_v24  ;;  %v7138_v24 = vld [vmem:[%s9156_s25 + $0x10] sm:$0x1f] }
 0x26b   : > { %7844 = vmatprep.mubr.msk.f32.mxu0 %vm9120_vm3, %v9121_v51 }
 0x33d   : > { %v7797_v33 = vpop.f32.mrb[4].mxu0 }
 0x33e   : > { %v1849_v34 = vadd.f32 %v7797_v33, %v7108_v32  ;;  %v1830_v35 = vpop.f32.mrb[5].mxu0  ;;  %v7158_v33 = vld [vmem:[%s9166_s3 + $0xa8] sm:$0xff] }
 0x33f   : > { %v1848_v36 = vadd.f32 %v7108_v32, %v1830_v35  ;;  %v7149_v32 = vld [vmem:[%s9151_s21 + $0x118] sm:$0xff] }
 0x340   : > { %v1851_v37 = vmul.f32 0.2, %v1849_v34 }
 0x341   : > { %v1850_v38 = vmul.f32 0.2, %v1848_v36 }
 0x342   : > { %v9496_v41 = vmax.f32 %v1849_v34, %v1851_v37  ;;  %v7160_v34 = vld [vmem:[%s9166_s3 + $0xb8] sm:$0xff]  ;;  %v7159_v37 = vld [vmem:[%s9166_s3 + $0xb0] sm:$0xff] }
 0x343   : > { %v9498_v42 = vmax.f32 %v1848_v36, %v1850_v38  ;;  %v8577_v35 = vpack.c.bf16 %v7160_v34, %v7158_v33  ;;  %v7157_v36 = vld [vmem:[%s9166_s3 + $0xa0] sm:$0xff]  ;;  %v7175_v33 = vld [vmem:[%s9166_s3 + $0x130] sm:$0xff] }
 0x344   : > { %1857 = vst.msk [vmem:[%s1086_s23 + $0x8] sm:$0x1] %vm1856_vm1, %v9496_v41  ;;  %v8579_v38 = vpack.c.bf16 %v7159_v37, %v7157_v36  ;;  %v2546_v34 = vld [vmem:[%s9166_s3 + $0x80] sm:$0xff]  ;;  %vm3961_vm1 = vcmask 55296  }
 0x345   : > { %1855 = vst.msk [vmem:[%s1086_s23] sm:$0xff] %vm1854_vm2, %v9498_v42  ;;  %7816 = vmatprep.mubr.msk.f32.mxu1 %vm1854_vm2, %v9498_v42  ;;  %s1099_s23 = scalar_lea.vmem %s10365_s11, %s9624_s26  ;;  %s1103_s11 = scalar_lea.vmem %s9286_s30, %s9624_s26 }
 0x346   : > { %7817 = vmatmul.mubr.msk.f32.vlgmr.msra.gmra.mrb[8].mxu1 %vm1854_vm2, %v9496_v41 }
 0x347   : > { %8496 = vmatpush3.bf16.msra.mxu1 %v8493_v31  ;;  %7837 = vmatprep.mubr.msk.f32.mxu1 %vm1854_vm2, %v9498_v42  ;;  %v8549_v31 = vpack.c.bf16 %v7148_v30, %v7147_v29  ;;  %v2547_v29 = vld [vmem:[%s9166_s3 + $0x88] sm:$0xff]  ;;  %v2549_v30 = vld [vmem:[%s9166_s3 + $0x98] sm:$0xff] }
 0x348   : > { %8498 = vmatprep.subr.bf16.mxu1 %v8497_v43 }
 0x34b   : > { %8500 = vmatpush3.bf16.msra.mxu1 %v8497_v43  ;;  %v7161_v43 = vld [vmem:[%s9166_s3 + $0xc0] sm:$0xff] }
 0x34c   : > { %8502 = vmatprep.subr.bf16.mxu1 %v8501_v46 }
 0x34f   : > { %8504 = vmatpush3.bf16.msra.mxu1 %v8501_v46  ;;  %v7168_v46 = vld [vmem:[%s9166_s3 + $0xf8] sm:$0xff] }
 0x350   : > { %8506 = vmatprep.subr.bf16.mxu1 %v8505_v49  ;;  %v8585_v47 = vpack.c.bf16 %v7168_v46, %v7166_v45  ;;  %v7185_v46 = vld [vmem:[%s9166_s3 + $0x140] sm:$0xff] }
 0x353   : > { %8508 = vmatpush3.bf16.msra.mxu1 %v8505_v49  ;;  %v7167_v49 = vld [vmem:[%s9166_s3 + $0xf0] sm:$0xff] }
 0x354   : > { %7835 = vmatprep.subr.mxu1 %v7119_v50 }
 0x357   : > { %7836 = vmatpush3.msra.mxu1 %v7119_v50  ;;  %v8587_v50 = vpack.c.bf16 %v7167_v49, %v7165_v48  ;;  %v7190_v48 = vld [vmem:[%s9166_s3 + $0x168] sm:$0xff]  ;;  %v7192_v49 = vld [vmem:[%s9166_s3 + $0x178] sm:$0xff] }
 0x358   : > { %7838 = vmatmul.mubr.msk.f32.vlgmr.msra.gmra.mrb[10].mxu1 %vm1854_vm2, %v9496_v41  ;;  %8533 = vmatprep.subr.bf16.mxu1 %v9119_v3 }
 0x359   : > { %7879 = vmatprep.mubr.msk.f32.mxu1 %vm9120_vm3, %v9121_v51 }
 0x419   : > { %v7818_v52 = vpop.f32.mrb[8].mxu1 }
 0x41a   : > { %v1939_v53 = vpop.f32.mrb[9].mxu1 }
 0x41b   : > { %v8514_v54 = vpack.c.bf16 %v7818_v52, %v1939_v53 }
 0x42b   : > { %v7839_v55 = vpop.f32.mrb[10].mxu1 }
 0x42c   : > { %v2025_v56 = vpop.f32.mrb[11].mxu1 }
 0x42d   : > { %v8510_v58 = vpack.c.bf16 %v7839_v55, %v2025_v56  ;;  %v2531_v55 = vld [vmem:[%s9166_s3 + $0x8] sm:$0xff]  ;;  %v2533_v56 = vld [vmem:[%s9166_s3 + $0x18] sm:$0xff] }
 0x42e   : > { %v8557_v61 = vpack.c.bf16 %v2533_v56, %v2531_v55  ;;  %v7189_v55 = vld [vmem:[%s9166_s3 + $0x160] sm:$0xff]  ;;  %v7191_v56 = vld [vmem:[%s9166_s3 + $0x170] sm:$0xff] }
 0x42f   : > { %8512 = vmatpush3.bf16.msk.msra.mxu0 %vm9521_vm6, %v8510_v58 }
 0x430   : > { %8513 = vmatprep.subr.bf16.mxu0 %v9119_v3 }
 0x432   : > { %7845 = vmatmul.mubr.msk.f32.vlgmr.msra.gmra.mrb[10].mxu0 %vm2036_vm7, %v7122_v62  ;;  %v2530_v62 = vld [vmem:[%s9166_s3] sm:$0xff] }
 0x433   : > { %8516 = vmatpush3.bf16.msk.msra.mxu0 %vm9521_vm6, %v8514_v54  ;;  %7851 = vmatprep.mubr.msk.f32.mxu0 %vm9120_vm3, %v9121_v51 }
 0x434   : > { %8518 = vmatprep.subr.bf16.mxu0 %v8517_v0 }
 0x436   : > { %7852 = vmatmul.mubr.msk.f32.vlgmr.msra.gmra.mrb[12].mxu0 %vm2036_vm7, %v1948_v4  ;;  %v2537_v4 = vld [vmem:[%s9166_s3 + $0x38] sm:$0xff] }
 0x437   : > { %8520 = vmatpush3.bf16.msra.mxu0 %v8517_v0  ;;  %7872 = vmatprep.mubr.msk.f32.mxu0 %vm1854_vm2, %v9498_v42  ;;  %v2532_v0 = vld [vmem:[%s9166_s3 + $0x10] sm:$0xff]  ;;  %v8561_v7 = vpack.c.bf16 %v2537_v4, %v2535_v2  ;;  %v7198_v2 = vld [vmem:[%s9166_s3 + $0x1a8] sm:$0xff]  ;;  %v7200_v4 = vld [vmem:[%s9166_s3 + $0x1b8] sm:$0xff] }
 0x438   : > { %8522 = vmatprep.subr.bf16.mxu0 %v8521_v5  ;;  %v8559_v6 = vpack.c.bf16 %v2532_v0, %v2530_v62  ;;  %v7193_v0 = vld [vmem:[%s9166_s3 + $0x180] sm:$0xff] }
 0x43b   : > { %8524 = vmatpush3.bf16.msra.mxu0 %v8521_v5  ;;  %v7152_v5 = vld [vmem:[%s9156_s25 + $0x18] sm:$0x1f] }
 0x43c   : > { %8526 = vmatprep.subr.bf16.mxu0 %v8525_v8 }
 0x43f   : > { %8528 = vmatpush3.bf16.msra.mxu0 %v8525_v8  ;;  %v2534_v8 = vld [vmem:[%s9166_s3 + $0x20] sm:$0xff] }
 0x440   : > { %8530 = vmatprep.subr.bf16.mxu0 %v8529_v11  ;;  %v8563_v20 = vpack.c.bf16 %v2536_v9, %v2534_v8  ;;  %v7199_v8 = vld [vmem:[%s9166_s3 + $0x1b0] sm:$0xff]  ;;  %v7202_v9 = vld [vmem:[%s9166_s3 + $0x1c8] sm:$0xff] }
 0x443   : > { %8532 = vmatpush3.bf16.msra.mxu0 %v8529_v11  ;;  %v2541_v11 = vld [vmem:[%s9166_s3 + $0x58] sm:$0xff] }
 0x444   : > { %7870 = vmatprep.subr.mxu0 %v7135_v12 }
 0x447   : > { %7871 = vmatpush3.msra.mxu0 %v7135_v12  ;;  %v8565_v12 = vpack.c.bf16 %v2541_v11, %v2539_v10  ;;  %v7204_v10 = vld [vmem:[%s9166_s3 + $0x1d8] sm:$0xff] }
 0x448   : > { %7873 = vmatmul.mubr.msk.f32.vlgmr.msra.gmra.mrb[14].mxu0 %vm1854_vm2, %v9496_v41  ;;  %8553 = vmatprep.subr.bf16.mxu0 %v9119_v3 }
 0x449   : > { %7907 = vmatprep.mubr.msk.f32.mxu0 %vm9120_vm3, %v9121_v51 }
 0x505   : > { %v2110_v13 = vpop.f32.mrb[10].mxu0 }
 0x506   : > { %v7846_v14 = vpop.f32.mrb[11].mxu0 }
 0x507   : > { %v2540_v14 = vld [vmem:[%s9166_s3 + $0x50] sm:$0xff] }
 0x509   : > { %v2186_v15 = vpop.f32.mrb[12].mxu0 }
 0x50a   : > { %v2187_v16 = vadd.f32 %v2186_v15, %v2110_v13  ;;  %v7853_v17 = vpop.f32.mrb[13].mxu0  ;;  %v2538_v13 = vld [vmem:[%s9166_s3 + $0x40] sm:$0xff] }
 0x50b   : > { %v8567_v15 = vpack.c.bf16 %v2540_v14, %v2538_v13  ;;  %v7172_v17 = vld [vmem:[%s9166_s3 + $0x118] sm:$0xff]  ;;  %v7203_v13 = vld [vmem:[%s9166_s3 + $0x1d0] sm:$0xff] }
 0x51b   : > { %v7874_v57 = vpop.f32.mrb[14].mxu0 }
 0x51c   : > { %v2266_v59 = vpop.f32.mrb[15].mxu0 }
 0x51d   : > { %v8534_v21 = vpack.c.bf16 %v7874_v57, %v2266_v59  ;;  %v2545_v57 = vld [vmem:[%s9166_s3 + $0x78] sm:$0xff]  ;;  %v7169_v59 = vld [vmem:[%s9166_s3 + $0x100] sm:$0xff] }
 0x51f   : > { %8536 = vmatpush3.bf16.msk.msra.mxu1 %vm9521_vm6, %v8534_v21  ;;  %v7171_v21 = vld [vmem:[%s9166_s3 + $0x110] sm:$0xff] }
 0x520   : > { %8538 = vmatprep.subr.bf16.mxu1 %v8537_v63 }
 0x522   : > { %7880 = vmatmul.mubr.msk.f32.vlgmr.msra.gmra.mrb[12].mxu1 %vm2036_vm7, %v7138_v24  ;;  %v8591_v24 = vpack.c.bf16 %v7171_v21, %v7169_v59  ;;  %v7211_v59 = vld [vmem:[%s9166_s3 + $0x1e8] sm:$0xff]  ;;  %v7210_v21 = vld [vmem:[%s9166_s3 + $0x1e0] sm:$0xff] }
 0x523   : > { %8540 = vmatpush3.bf16.msra.mxu1 %v8537_v63  ;;  %7900 = vmatprep.mubr.msk.f32.mxu1 %vm1854_vm2, %v9498_v42  ;;  %v8581_v42 = vpack.c.bf16 %v7164_v40, %v7162_v39  ;;  %v8569_v63 = vpack.c.bf16 %v2545_v57, %v2543_v19  ;;  %v7188_v39 = vld [vmem:[%s9166_s3 + $0x158] sm:$0xff]  ;;  %v7178_v19 = vld [vmem:[%s9171_s8 + $0x8] sm:$0x3f]  ;;  %v2625_v57 = vld [vmem:[%s9171_s8] sm:$0x3f] }
 0x524   : > { %8542 = vmatprep.subr.bf16.mxu1 %v8541_v25 }
 0x527   : > { %8544 = vmatpush3.bf16.msra.mxu1 %v8541_v25  ;;  %v8571_v25 = vpack.c.bf16 %v2544_v23, %v2542_v22  ;;  %v7212_v22 = vld [vmem:[%s9166_s3 + $0x1f0] sm:$0xff]  ;;  %v7215_v23 = vld [vmem:[%s9166_s3 + $0x208] sm:$0xff] }
 0x528   : > { %8546 = vmatprep.subr.bf16.mxu1 %v8545_v28 }
 0x52b   : > { %8548 = vmatpush3.bf16.msra.mxu1 %v8545_v28  ;;  %v8593_v28 = vpack.c.bf16 %v7176_v27, %v7174_v26 }
 0x52c   : > { %8550 = vmatprep.subr.bf16.mxu1 %v8549_v31 }
 0x52f   : > { %8552 = vmatpush3.bf16.msra.mxu1 %v8549_v31  ;;  %v7173_v31 = vld [vmem:[%s9166_s3 + $0x120] sm:$0xff] }
 0x530   : > { %7898 = vmatprep.subr.mxu1 %v7149_v32  ;;  %v8595_v36 = vpack.c.bf16 %v7175_v33, %v7173_v31  ;;  %v7214_v31 = vld [vmem:[%s9166_s3 + $0x200] sm:$0xff]  ;;  %v7219_v33 = vld [vmem:[%s9166_s3 + $0x228] sm:$0xff] }
 0x533   : > { %7899 = vmatpush3.msra.mxu1 %v7149_v32  ;;  %v8573_v32 = vpack.c.bf16 %v2549_v30, %v2547_v29  ;;  %v8619_v29 = vpack.c.bf16 %v7212_v22, %v7210_v21  ;;  %v7237_v21 = vld [vmem:[%s9181_s19 + $0xc8] sm:$0xff] }
 0x534   : > { %7901 = vmatmul.mubr.msk.f32.vlgmr.msra.gmra.mrb[14].mxu1 %vm1854_vm2, %v9496_v41  ;;  %8578 = vmatprep.subr.bf16.mxu1 %v8577_v35  ;;  %v7163_v41 = vld [vmem:[%s9166_s3 + $0xd0] sm:$0xff] }
 0x535   : > { %2711 = vmatprep.mubr.f32.mxu1 %v9121_v51  ;;  %8580 = vmatpush1.bf16.msra.mxu1 %v8579_v38  ;;  %v8583_v44 = vpack.c.bf16 %v7163_v41, %v7161_v43  ;;  %v2548_v35 = vld [vmem:[%s9166_s3 + $0x90] sm:$0xff]  ;;  %v7186_v38 = vld [vmem:[%s9166_s3 + $0x148] sm:$0xff]  ;;  %v7155_v43 = vld [vmem:[%s9161_s29] ss:$0 sm:$0xff] }
 0x536   : > { %8582 = vmatprep.subr.bf16.mxu1 %v8581_v42  ;;  %v8575_v37 = vpack.c.bf16 %v2548_v35, %v2546_v34  ;;  %v8597_v40 = vpack.c.bf16 %v7188_v39, %v7186_v38  ;;  %v7221_v34 = vld [vmem:[%s9166_s3 + $0x238] sm:$0xff]  ;;  %v7220_v38 = vld [vmem:[%s9166_s3 + $0x230] sm:$0xff]  ;;  %v7223_v39 = vld [vmem:[%s9166_s3 + $0x248] sm:$0xff] }
 0x539   : > { %8584 = vmatpush1.bf16.msra.mxu1 %v8583_v44 }
 0x53a   : > { %8586 = vmatprep.subr.bf16.mxu1 %v8585_v47  ;;  %v7187_v47 = vld [vmem:[%s9166_s3 + $0x150] sm:$0xff] }
 0x53d   : > { %8588 = vmatpush1.bf16.msra.mxu1 %v8587_v50 }
 0x5f5   : > { %v2349_v52 = vpop.f32.mrb[12].mxu1 }
 0x5f6   : > { %v9582_v53 = vadd.f32 %v2349_v52, %v2187_v16  ;;  %v7881_v54 = vpop.f32.mrb[13].mxu1  ;;  %v7170_v16 = vld [vmem:[%s9166_s3 + $0x108] sm:$0xff]  ;;  %v8599_v52 = vpack.c.bf16 %v7187_v47, %v7185_v46  ;;  %v7229_v46 = vld [vmem:[%s9166_s3 + $0x278] sm:$0xff] }
 0x5f7   : > { %v8589_v18 = vpack.c.bf16 %v7172_v17, %v7170_v16  ;;  %v8601_v54 = vpack.c.bf16 %v7192_v49, %v7190_v48  ;;  %v7226_v49 = vld [vmem:[%s9166_s3 + $0x260] sm:$0xff] }
 0x5f9   : > { %8590 = vmatprep.subr.bf16.mxu1 %v8589_v18 }
 0x5fa   : > { %8592 = vmatpush1.bf16.msra.mxu1 %v8591_v24  ;;  %v7217_v24 = vld [vmem:[%s9166_s3 + $0x218] sm:$0xff] }
 0x5fb   : > { %8594 = vmatprep.subr.bf16.mxu1 %v8593_v28  ;;  %v7206_v28 = vld [vmem:[%s9171_s8 + $0x10] sm:$0x3f]  ;;  %v8621_v30 = vpack.c.bf16 %v7217_v24, %v7215_v23  ;;  %v7231_v24 = vld [vmem:[%s9171_s8 + $0x18] sm:$0x3f] }
 0x5fe   : > { %8596 = vmatpush1.bf16.msra.mxu1 %v8595_v36  ;;  %v8625_v36 = vpack.c.bf16 %v7221_v34, %v7219_v33  ;;  %v7243_v33 = vld [vmem:[%s9181_s19 + $0xf8] sm:$0xff] }
 0x5ff   : > { %8598 = vmatprep.subr.bf16.mxu1 %v8597_v40  ;;  %v7225_v40 = vld [vmem:[%s9166_s3 + $0x258] sm:$0xff] }
 0x607   : > { %v7902_v58 = vpop.f32.mrb[14].mxu1 }
 0x608   : > { %v2430_v60 = vpop.f32.mrb[15].mxu1 }
 0x609   : > { %v8554_v1 = vpack.c.bf16 %v7902_v58, %v2430_v60  ;;  %v7194_v58 = vld [vmem:[%s9166_s3 + $0x188] sm:$0xff]  ;;  %v7196_v60 = vld [vmem:[%s9166_s3 + $0x198] sm:$0xff] }
 0x60a   : > { %v8605_v62 = vpack.c.bf16 %v7196_v60, %v7194_v58  ;;  %v3257_v58 = vld [vmem:[%s9181_s19 + $0x10] sm:$0xff]  ;;  %v3258_v60 = vld [vmem:[%s9181_s19 + $0x18] sm:$0xff] }
 0x60b   : > { %8556 = vmatpush3.bf16.msk.msra.mxu0 %vm9521_vm6, %v8554_v1  ;;  %v7195_v1 = vld [vmem:[%s9166_s3 + $0x190] sm:$0xff]  ;;  %vm5404_vm6 = vcmask 392192  }
 0x60c   : > { %8558 = vmatprep.subr.bf16.mxu0 %v8557_v61  ;;  %v8603_v61 = vpack.c.bf16 %v7191_v56, %v7189_v55  ;;  %v3256_v55 = vld [vmem:[%s9181_s19 + $0x8] sm:$0xff] }
 0x60e   : > { %7908 = vmatmul.mubr.msk.f32.vlgmr.msra.gmra.mrb[16].mxu0 %vm2036_vm7, %v7152_v5  ;;  %v8607_v5 = vpack.c.bf16 %v7195_v1, %v7193_v0  ;;  %v3260_v0 = vld [vmem:[%s9181_s19 + $0x28] sm:$0xff]  ;;  %v3261_v1 = vld [vmem:[%s9181_s19 + $0x30] sm:$0xff]  ;;  %vm5562_vm7 = vcmask 1042432  }
 0x60f   : > { %8560 = vmatpush1.bf16.msra.mxu0 %v8559_v6  ;;  %2618 = vmatprep.mubr.f32.mxu0 %v9121_v51  ;;  %v8609_v6 = vpack.c.bf16 %v7200_v4, %v7198_v2  ;;  %v3262_v2 = vld [vmem:[%s9181_s19 + $0x38] sm:$0xff] }
 0x610   : > { %8562 = vmatprep.subr.bf16.mxu0 %v8561_v7  ;;  %v7197_v7 = vld [vmem:[%s9166_s3 + $0x1a0] sm:$0xff]  ;;  %v8647_v4 = vpack.c.bf16 %v3262_v2, %v3261_v1  ;;  %v7258_v1 = vld [vmem:[%s9181_s19 + $0x170] sm:$0xff] }
 0x611   : > { %v8611_v11 = vpack.c.bf16 %v7199_v8, %v7197_v7  ;;  %v3265_v8 = vld [vmem:[%s9181_s19 + $0x50] sm:$0xff] }
 0x613   : > { %8564 = vmatpush1.bf16.msra.mxu0 %v8563_v20  ;;  %v8613_v20 = vpack.c.bf16 %v7204_v10, %v7202_v9  ;;  %v3266_v9 = vld [vmem:[%s9181_s19 + $0x58] sm:$0xff] }
 0x614   : > { %8566 = vmatprep.subr.bf16.mxu0 %v8565_v12  ;;  %v7201_v12 = vld [vmem:[%s9166_s3 + $0x1c0] sm:$0xff]  ;;  %v8653_v10 = vpack.c.bf16 %v3266_v9, %v3265_v8 }
 0x615   : > { %v8615_v14 = vpack.c.bf16 %v7203_v13, %v7201_v12  ;;  %v3269_v13 = vld [vmem:[%s9181_s19 + $0x70] sm:$0xff]  ;;  %v3234_v9 = vld [vmem:[%s9176_s14] sm:$0x3] }
 0x617   : > { %8568 = vmatpush1.bf16.msra.mxu0 %v8567_v15 }
 0x618   : > { %8570 = vmatprep.subr.bf16.mxu0 %v8569_v63  ;;  %v7213_v63 = vld [vmem:[%s9166_s3 + $0x1f8] sm:$0xff] }
 0x619   : > { %v8617_v26 = vpack.c.bf16 %v7213_v63, %v7211_v59  ;;  %v7236_v63 = vld [vmem:[%s9181_s19 + $0xc0] sm:$0xff] }
 0x61b   : > { %8572 = vmatpush1.bf16.msra.mxu0 %v8571_v25 }
 0x61c   : > { %8574 = vmatprep.subr.bf16.mxu0 %v8573_v32  ;;  %v7216_v32 = vld [vmem:[%s9166_s3 + $0x210] sm:$0xff] }
 0x61d   : > { %v8623_v35 = vpack.c.bf16 %v7216_v32, %v7214_v31  ;;  %v7242_v32 = vld [vmem:[%s9181_s19 + $0xf0] sm:$0xff] }
 0x61e   : > { %v8683_v34 = vpack.c.bf16 %v7243_v33, %v7242_v32  ;;  %v7272_v33 = vld [vmem:[%s9181_s19 + $0x1b0] sm:$0xff] }
 0x61f   : > { %8576 = vmatpush1.bf16.msra.mxu0 %v8575_v37  ;;  %v7218_v37 = vld [vmem:[%s9166_s3 + $0x220] sm:$0xff] }
 0x6e1   : > { %v2513_v42 = vpop.f32.mrb[16].mxu0 }
 0x6e2   : > { %v2517_v41 = vadd.f32 %v2513_v42, %v9582_v53  ;;  %v7909_v44 = vpop.f32.mrb[17].mxu0  ;;  %v8627_v42 = vpack.c.bf16 %v7220_v38, %v7218_v37  ;;  %v7246_v38 = vld [vmem:[%s9181_s19 + $0x110] sm:$0xff] }
 0x6e3   : > { %v7224_v44 = vld [vmem:[%s9166_s3 + $0x250] sm:$0xff] }
 0x6e4   : > { %v2525_v45 = vadd.f32 %v7155_v43, %v2517_v41  ;;  %v8629_v43 = vpack.c.bf16 %v7225_v40, %v7223_v39  ;;  %v7222_v41 = vld [vmem:[%s9166_s3 + $0x240] sm:$0xff]  ;;  %v7247_v39 = vld [vmem:[%s9181_s19 + $0x118] sm:$0xff] }
 0x6e5   : > { %v8631_v47 = vpack.c.bf16 %v7224_v44, %v7222_v41  ;;  %v8689_v40 = vpack.c.bf16 %v7247_v39, %v7246_v38  ;;  %v7250_v44 = vld [vmem:[%s9181_s19 + $0x130] sm:$0xff] }
 0x6e6   : > { %v2526_v50 = vmul.f32 0.2, %v2525_v45  ;;  %v7276_v39 = vld [vmem:[%s9181_s19 + $0x1d0] sm:$0xff] }
 0x6e8   : > { %v9630_v53 = vmax.f32 %v2525_v45, %v2526_v50  ;;  %v7227_v45 = vld [vmem:[%s9166_s3 + $0x268] sm:$0xff]  ;;  %v7228_v50 = vld [vmem:[%s9166_s3 + $0x270] sm:$0xff] }
 0x6e9   : > { %v8633_v48 = vpack.c.bf16 %v7229_v46, %v7227_v45  ;;  %v7251_v45 = vld [vmem:[%s9181_s19 + $0x138] sm:$0xff] }
 0x6ea   : > { %7156 = vmatmul.mubr.msk.f32.vlgmr.msra.gmra.mrb[18].mxu0 %vm2550_vm8, %v9630_v53  ;;  %7177 = vmatmul.mubr.msk.f32.vlgmr.msra.gmra.mrb[16].mxu1 %vm2550_vm8, %v9630_v53  ;;  %2529 = vst.msk [vmem:[%s1090_s28] sm:$0x1f] %vm2528_vm9, %v9630_v53  ;;  %v8695_v46 = vpack.c.bf16 %v7251_v45, %v7250_v44  ;;  %v7280_v45 = vld [vmem:[%s9181_s19 + $0x1f0] sm:$0xff]  ;;  %s10369_s28 = sld [smem:[#allocation7_spill]]  ;;  %vm6215_vm9 = vcmask 1043456  }
 0x6eb   : > { %8600 = vmatpush1.bf16.msra.mxu1 %v8599_v52  ;;  %2967 = vmatprep.mubr.f32.mxu1 %v9121_v51  ;;  %v8635_v52 = vpack.c.bf16 %v7228_v50, %v7226_v49  ;;  %v7254_v50 = vld [vmem:[%s9181_s19 + $0x150] sm:$0xff] }
 0x6ec   : > { %8602 = vmatprep.subr.bf16.mxu1 %v8601_v54  ;;  %2795 = vmatprep.mubr.f32.mxu0 %v9121_v51  ;;  %v3255_v54 = vld [vmem:[%s9181_s19] sm:$0xff] }
 0x6ed   : > { %v8638_v56 = vpack.c.bf16 %v3256_v55, %v3255_v54  ;;  %v3275_v55 = vld [vmem:[%s9181_s19 + $0xa0] sm:$0xff] }
 0x6ef   : > { %8604 = vmatpush1.bf16.msra.mxu1 %v8603_v61  ;;  %v8641_v61 = vpack.c.bf16 %v3258_v60, %v3257_v58  ;;  %v7256_v58 = vld [vmem:[%s9181_s19 + $0x160] sm:$0xff] }
 0x6f0   : > { %8606 = vmatprep.subr.bf16.mxu1 %v8605_v62  ;;  %v3259_v62 = vld [vmem:[%s9181_s19 + $0x20] sm:$0xff] }
 0x6f3   : > { %8608 = vmatpush1.bf16.msra.mxu1 %v8607_v5  ;;  %v3263_v5 = vld [vmem:[%s9181_s19 + $0x40] sm:$0xff] }
 0x6f4   : > { %8610 = vmatprep.subr.bf16.mxu1 %v8609_v6  ;;  %v3264_v6 = vld [vmem:[%s9181_s19 + $0x48] sm:$0xff] }
 0x6f5   : > { %v8650_v7 = vpack.c.bf16 %v3264_v6, %v3263_v5  ;;  %v3236_v6 = vlaneseq }
 0x6f7   : > { %8612 = vmatpush1.bf16.msra.mxu1 %v8611_v11  ;;  %v3267_v11 = vld [vmem:[%s9181_s19 + $0x60] sm:$0xff] }
 0x6f8   : > { %8614 = vmatprep.subr.bf16.mxu1 %v8613_v20  ;;  %v3268_v20 = vld [vmem:[%s9181_s19 + $0x68] sm:$0xff] }
 0x6f9   : > { %v8656_v12 = vpack.c.bf16 %v3268_v20, %v3267_v11 }
 0x6fb   : > { %8616 = vmatpush1.bf16.msra.mxu1 %v8615_v14  ;;  %v3270_v14 = vld [vmem:[%s9181_s19 + $0x78] sm:$0xff] }
 0x6fc   : > { %8637 = vmatprep.subr.bf16.mxu1 %v9119_v3 }
 0x6fe   : > { %7205 = vmatmul.mubr.msk.f32.vlgmr.msra.gmra.mrb[18].mxu1 %vm2550_vm8, %v9630_v53 }
 0x6ff   : > { %8639 = vmatpush1.bf16.msra.mxu1 %v8638_v56  ;;  %v3276_v56 = vld [vmem:[%s9181_s19 + $0xa8] sm:$0xff] }
 0x700   : > { %8640 = vmatprep.subr.bf16.mxu1 %v9119_v3  ;;  %v8668_v60 = vpack.c.bf16 %v3276_v56, %v3275_v55  ;;  %v7286_v56 = vld [vmem:[%s9181_s19 + $0x220] sm:$0xff] }
 0x703   : > { %8642 = vmatpush1.bf16.msra.mxu1 %v8641_v61  ;;  %v7257_v61 = vld [vmem:[%s9181_s19 + $0x168] sm:$0xff] }
 0x704   : > { %8643 = vmatprep.subr.bf16.mxu1 %v9119_v3 }
 0x7bd   : > { %v2620_v15 = vpop.f32.mrb[18].mxu0  ;;  %v2713_v16 = vpop.f32.mrb[16].mxu1 }
 0x7be   : > { %v2622_v17 = vpop.f32.mrb[19].mxu0  ;;  %v2715_v18 = vpop.f32.mrb[17].mxu1 }
 0x7bf   : > { %7179 = vmatprep.subr.msk.mxu0 %vm2724_vm10, %v2715_v18 }
 0x7c0   : > { %7180 = vmatpush1.msk.msra.mxu0 %vm2724_vm10, %v2713_v16  ;;  %v3271_v16 = vld [vmem:[%s9181_s19 + $0x80] sm:$0xff] }
 0x7c1   : > { %7182 = vmatprep.subr.msk.mxu0 %vm2724_vm10, %v2622_v17  ;;  %7181 = vmatmul.mubr.msk.f32.vlgmr.msra.gmra.mrb[20].mxu0 %vm2720_vm11, %v7178_v19  ;;  %v3272_v17 = vld [vmem:[%s9181_s19 + $0x88] sm:$0xff]  ;;  %v3273_v19 = vld [vmem:[%s9181_s19 + $0x90] sm:$0xff] }
 0x7c2   : > { %7183 = vmatpush1.msk.msra.mxu0 %vm2724_vm10, %v2620_v15  ;;  %2875 = vmatprep.mubr.f32.mxu0 %v9121_v51  ;;  %v8659_v15 = vpack.c.bf16 %v3270_v14, %v3269_v13  ;;  %v8662_v18 = vpack.c.bf16 %v3272_v17, %v3271_v16 }
 0x7c9   : > { %7184 = vmatmul.mubr.msk.f32.vlgmr.msra.gmra.mrb[20].mxu0 %vm2720_vm11, %v2625_v57  ;;  %v3274_v57 = vld [vmem:[%s9181_s19 + $0x98] sm:$0xff] }
 0x7ca   : > { %3049 = vmatprep.mubr.f32.mxu0 %v9121_v51  ;;  %v8665_v59 = vpack.c.bf16 %v3274_v57, %v3273_v19  ;;  %v7261_v57 = vld [vmem:[%s10362_s1 + $0x8] sm:$0x7f] }
 0x7d1   : > { %v2969_v25 = vpop.f32.mrb[18].mxu1 }
 0x7d2   : > { %v2971_v27 = vpop.f32.mrb[19].mxu1 }
 0x7d3   : > { %7207 = vmatprep.subr.msk.mxu0 %vm2724_vm10, %v2971_v27  ;;  %v7239_v27 = vld [vmem:[%s9181_s19 + $0xd8] sm:$0xff] }
 0x7d4   : > { %7208 = vmatpush1.msk.msra.mxu0 %vm2724_vm10, %v2969_v25  ;;  %v8674_v25 = vpack.c.bf16 %v7237_v21, %v7236_v63  ;;  %v7266_v21 = vld [vmem:[%s9181_s19 + $0x180] sm:$0xff] }
 0x7d5   : > { %8618 = vmatprep.subr.bf16.mxu0 %v8617_v26  ;;  %7209 = vmatmul.mubr.msk.f32.vlgmr.msra.gmra.mrb[20].mxu0 %vm2720_vm11, %v7206_v28  ;;  %v7238_v26 = vld [vmem:[%s9181_s19 + $0xd0] sm:$0xff] }
 0x7d6   : > { %8620 = vmatpush1.bf16.msra.mxu0 %v8619_v29  ;;  %3143 = vmatprep.mubr.f32.mxu0 %v9121_v51  ;;  %v8677_v28 = vpack.c.bf16 %v7239_v27, %v7238_v26  ;;  %v7240_v29 = vld [vmem:[%s9181_s19 + $0xe0] sm:$0xff]  ;;  %v7268_v27 = vld [vmem:[%s9181_s19 + $0x190] sm:$0xff] }
 0x7d7   : > { %8622 = vmatprep.subr.bf16.mxu0 %v8621_v30  ;;  %v7241_v30 = vld [vmem:[%s9181_s19 + $0xe8] sm:$0xff] }
 0x7d8   : > { %v8680_v31 = vpack.c.bf16 %v7241_v30, %v7240_v29  ;;  %v7270_v30 = vld [vmem:[%s9181_s19 + $0x1a0] sm:$0xff] }
 0x7da   : > { %8624 = vmatpush1.bf16.msra.mxu0 %v8623_v35  ;;  %v7244_v35 = vld [vmem:[%s9181_s19 + $0x100] sm:$0xff] }
 0x7db   : > { %8626 = vmatprep.subr.bf16.mxu0 %v8625_v36  ;;  %v7245_v36 = vld [vmem:[%s9181_s19 + $0x108] sm:$0xff] }
 0x7dc   : > { %v8686_v37 = vpack.c.bf16 %v7245_v36, %v7244_v35  ;;  %v7274_v36 = vld [vmem:[%s9181_s19 + $0x1c0] sm:$0xff] }
 0x7de   : > { %8628 = vmatpush1.bf16.msra.mxu0 %v8627_v42  ;;  %v7248_v42 = vld [vmem:[%s9181_s19 + $0x120] sm:$0xff] }
 0x7df   : > { %8630 = vmatprep.subr.bf16.mxu0 %v8629_v43  ;;  %v7249_v43 = vld [vmem:[%s9181_s19 + $0x128] sm:$0xff] }
 0x7e0   : > { %v8692_v41 = vpack.c.bf16 %v7249_v43, %v7248_v42  ;;  %v7278_v43 = vld [vmem:[%s9181_s19 + $0x1e0] sm:$0xff] }
 0x7e2   : > { %8632 = vmatpush1.bf16.msra.mxu0 %v8631_v47  ;;  %v7252_v47 = vld [vmem:[%s9181_s19 + $0x140] sm:$0xff] }
 0x7e3   : > { %8634 = vmatprep.subr.bf16.mxu0 %v8633_v48  ;;  %v7253_v48 = vld [vmem:[%s9181_s19 + $0x148] sm:$0xff] }
 0x7e4   : > { %v8698_v49 = vpack.c.bf16 %v7253_v48, %v7252_v47  ;;  %v7282_v48 = vld [vmem:[%s9181_s19 + $0x200] sm:$0xff] }
 0x7e6   : > { %8636 = vmatpush1.bf16.msra.mxu0 %v8635_v52  ;;  %v7255_v52 = vld [vmem:[%s9181_s19 + $0x158] sm:$0xff] }
 0x7e7   : > { %v8701_v54 = vpack.c.bf16 %v7255_v52, %v7254_v50  ;;  %v7284_v52 = vld [vmem:[%s9181_s19 + $0x210] sm:$0xff] }
 0x7e9   : > { %7230 = vmatmul.mubr.msk.f32.vlgmr.msra.gmra.mrb[22].mxu0 %vm2550_vm8, %v9630_v53  ;;  %v8644_v53 = vpack.c.bf16 %v3260_v0, %v3259_v62  ;;  %v8704_v62 = vpack.c.bf16 %v7257_v61, %v7256_v58  ;;  %v3277_v0 = vld [vmem:[%s9181_s19 + $0xb0] sm:$0xff]  ;;  %v7287_v58 = vld [vmem:[%s9181_s19 + $0x228] sm:$0xff]  ;;  %vm5558_vm8 = vcmask 23552  }
 0x7ea   : > { %3225 = vmatprep.mubr.f32.mxu0 %v9121_v51  ;;  %v7288_v61 = vld [vmem:[%s9181_s19 + $0x230] sm:$0xff] }
 0x7eb   : > { %8645 = vmatpush1.bf16.msra.mxu1 %v8644_v53  ;;  %v3278_v53 = vld [vmem:[%s9181_s19 + $0xb8] sm:$0xff] }
 0x7ec   : > { %8646 = vmatprep.subr.bf16.mxu1 %v9119_v3  ;;  %v8671_v2 = vpack.c.bf16 %v3278_v53, %v3277_v0 }
 0x7ef   : > { %8648 = vmatpush1.bf16.msra.mxu1 %v8647_v4  ;;  %v7259_v4 = vld [vmem:[%s9181_s19 + $0x178] sm:$0xff] }
 0x7f0   : > { %8649 = vmatprep.subr.bf16.mxu1 %v9119_v3  ;;  %v8707_v5 = vpack.c.bf16 %v7259_v4, %v7258_v1 }
 0x7f3   : > { %8651 = vmatpush1.bf16.msra.mxu1 %v8650_v7  ;;  %v3237_v7 = vshrl.u32 %v3236_v6, 7  ;;  %v7294_v6 = vld [vmem:[%s9181_s19 + $0x240] sm:$0xff] }
 0x7f4   : > { %8652 = vmatprep.subr.bf16.mxu1 %v9119_v3 }
 0x7f5   : > { %v3238_v8 = vsub.s32 0, %v3237_v7 }
 0x7f7   : > { %8654 = vmatpush1.bf16.msra.mxu1 %v8653_v10  ;;  %v3242_v10 = vsub.s32 1, %v3237_v7  ;;  %v3239_v11 = vrot.slane %v3234_v9, %v3238_v8  ;;  %v7295_v7 = vld [vmem:[%s9181_s19 + $0x248] sm:$0xff]  ;;  %v7291_v8 = vld [vmem:[%s10362_s1 + $0x10] sm:$0x7f] }
 0x7f8   : > { %8655 = vmatprep.subr.bf16.mxu1 %v9119_v3 }
 0x7f9   : > { %v3243_v20 = vrot.slane %v3234_v9, %v3242_v10  ;;  %v8746_v9 = vpack.c.bf16 %v7295_v7, %v7294_v6  ;;  %v3974_v6 = vld [vmem:[%s10363_s7 + $0x58] sm:$0xff] }
 0x7fb   : > { %8657 = vmatpush1.bf16.msra.mxu1 %v8656_v12 }
 0x7fc   : > { %8658 = vmatprep.subr.bf16.mxu1 %v9119_v3 }
 0x7ff   : > { %8660 = vmatpush1.bf16.msra.mxu1 %v8659_v15 }
 0x800   : > { %8661 = vmatprep.subr.bf16.mxu1 %v9119_v3 }
 0x803   : > { %8663 = vmatpush1.bf16.msra.mxu1 %v8662_v18 }
 0x804   : > { %8664 = vmatprep.subr.bf16.mxu1 %v9119_v3 }
 0x807   : > { %8666 = vmatpush1.bf16.msra.mxu1 %v8665_v59 }
 0x808   : > { %8667 = vmatprep.subr.bf16.mxu1 %v9119_v3 }
 0x80b   : > { %8669 = vmatpush1.bf16.msra.mxu1 %v8668_v60  ;;  %v8740_v60 = vpack.c.bf16 %v7287_v58, %v7286_v56  ;;  %v9073_v56 = vld [vmem:[%s9328_s18 + $0x8] sm:$0xff]  ;;  %v3967_v58 = vld [vmem:[%s10363_s7 + $0x20] sm:$0xff] }
 0x80c   : > { %8670 = vmatprep.subr.bf16.mxu1 %v9119_v3 }
 0x80f   : > { %8672 = vmatpush1.bf16.msra.mxu1 %v8671_v2 }
 0x810   : > { %7910 = vmatprep.subr.mxu1 %v9121_v51 }
 0x8bc   : > { %v3145_v22 = vpop.f32.mrb[22].mxu0 }
 0x8bd   : > { %v3147_v23 = vpop.f32.mrb[23].mxu0 }
 0x8be   : > { %7232 = vmatprep.subr.msk.mxu0 %vm2724_vm10, %v3147_v23 }
 0x8bf   : > { %7233 = vmatpush1.msk.msra.mxu0 %vm2724_vm10, %v3145_v22  ;;  %v7267_v22 = vld [vmem:[%s9181_s19 + $0x188] sm:$0xff] }
 0x8c0   : > { %7234 = vmatmul.mubr.msk.f32.vlgmr.msra.gmra.mrb[20].mxu0 %vm2720_vm11, %v7231_v24  ;;  %8673 = vmatprep.subr.bf16.mxu0 %v9119_v3  ;;  %v8710_v26 = vpack.c.bf16 %v7267_v22, %v7266_v21  ;;  %v7304_v22 = vld [vmem:[%s9181_s19 + $0x290] sm:$0xff] }
 0x8c1   : > { %8675 = vmatpush1.bf16.msra.mxu0 %v8674_v25  ;;  %v3353_v25 = vld [vmem:[%s10362_s1] sm:$0x7f] }
 0x8c2   : > { %8676 = vmatprep.subr.bf16.mxu0 %v9119_v3 }
 0x8c5   : > { %8678 = vmatpush1.bf16.msra.mxu0 %v8677_v28  ;;  %v7269_v28 = vld [vmem:[%s9181_s19 + $0x198] sm:$0xff] }
 0x8c6   : > { %8679 = vmatprep.subr.bf16.mxu0 %v9119_v3  ;;  %v8713_v29 = vpack.c.bf16 %v7269_v28, %v7268_v27  ;;  %v7308_v28 = vld [vmem:[%s9181_s19 + $0x2b0] sm:$0xff] }
 0x8c9   : > { %8681 = vmatpush1.bf16.msra.mxu0 %v8680_v31  ;;  %v7271_v31 = vld [vmem:[%s9181_s19 + $0x1a8] sm:$0xff] }
 0x8ca   : > { %8682 = vmatprep.subr.bf16.mxu0 %v9119_v3  ;;  %v8716_v32 = vpack.c.bf16 %v7271_v31, %v7270_v30  ;;  %v7310_v31 = vld [vmem:[%s9181_s19 + $0x2c0] sm:$0xff] }
 0x8cd   : > { %8684 = vmatpush1.bf16.msra.mxu0 %v8683_v34  ;;  %v7273_v34 = vld [vmem:[%s9181_s19 + $0x1b8] sm:$0xff] }
 0x8ce   : > { %8685 = vmatprep.subr.bf16.mxu0 %v9119_v3  ;;  %v8719_v35 = vpack.c.bf16 %v7273_v34, %v7272_v33  ;;  %v7312_v34 = vld [vmem:[%s9181_s19 + $0x2d0] sm:$0xff] }
 0x8d1   : > { %8687 = vmatpush1.bf16.msra.mxu0 %v8686_v37  ;;  %v7275_v37 = vld [vmem:[%s9181_s19 + $0x1c8] sm:$0xff] }
 0x8d2   : > { %8688 = vmatprep.subr.bf16.mxu0 %v9119_v3  ;;  %v8722_v38 = vpack.c.bf16 %v7275_v37, %v7274_v36  ;;  %v7314_v37 = vld [vmem:[%s9181_s19 + $0x2e0] sm:$0xff] }
 0x8d5   : > { %8690 = vmatpush1.bf16.msra.mxu0 %v8689_v40  ;;  %v7277_v40 = vld [vmem:[%s9181_s19 + $0x1d8] sm:$0xff] }
 0x8d6   : > { %8691 = vmatprep.subr.bf16.mxu0 %v9119_v3  ;;  %v8725_v42 = vpack.c.bf16 %v7277_v40, %v7276_v39  ;;  %v7316_v40 = vld [vmem:[%s9181_s19 + $0x2f0] sm:$0xff] }
 0x8d9   : > { %8693 = vmatpush1.bf16.msra.mxu0 %v8692_v41  ;;  %v7279_v41 = vld [vmem:[%s9181_s19 + $0x1e8] sm:$0xff] }
 0x8da   : > { %8694 = vmatprep.subr.bf16.mxu0 %v9119_v3  ;;  %v8728_v44 = vpack.c.bf16 %v7279_v41, %v7278_v43 }
 0x8dd   : > { %8696 = vmatpush1.bf16.msra.mxu0 %v8695_v46  ;;  %v7281_v46 = vld [vmem:[%s9181_s19 + $0x1f8] sm:$0xff] }
 0x8de   : > { %8697 = vmatprep.subr.bf16.mxu0 %v9119_v3  ;;  %v8731_v47 = vpack.c.bf16 %v7281_v46, %v7280_v45  ;;  %v3963_v46 = vld [vmem:[%s10363_s7] sm:$0xff] }
 0x8e1   : > { %8699 = vmatpush1.bf16.msra.mxu0 %v8698_v49  ;;  %v7283_v49 = vld [vmem:[%s9181_s19 + $0x208] sm:$0xff] }
 0x8e2   : > { %8700 = vmatprep.subr.bf16.mxu0 %v9119_v3  ;;  %v8734_v50 = vpack.c.bf16 %v7283_v49, %v7282_v48  ;;  %v7319_v48 = vld [vmem:[%s10362_s1 + $0x18] sm:$0x7f]  ;;  %s10378_s1 = sshll.u32 %s10381_s16, 2 }
 0x8e5   : > { %8702 = vmatpush1.bf16.msra.mxu0 %v8701_v54  ;;  %v7285_v54 = vld [vmem:[%s9181_s19 + $0x218] sm:$0xff] }
 0x8e6   : > { %8703 = vmatprep.subr.bf16.mxu0 %v9119_v3  ;;  %v8737_v55 = vpack.c.bf16 %v7285_v54, %v7284_v52  ;;  %v3965_v52 = vld [vmem:[%s10363_s7 + $0x10] sm:$0xff]  ;;  %v3966_v54 = vld [vmem:[%s10363_s7 + $0x18] sm:$0xff] }
 0x8e9   : > { %8705 = vmatpush1.bf16.msra.mxu0 %v8704_v62  ;;  %v7289_v62 = vld [vmem:[%s9181_s19 + $0x238] sm:$0xff] }
 0x8ea   : > { %8706 = vmatprep.subr.bf16.mxu0 %v9119_v3  ;;  %v8743_v0 = vpack.c.bf16 %v7289_v62, %v7288_v61  ;;  %v3969_v62 = vld [vmem:[%s10363_s7 + $0x30] sm:$0xff] }
 0x8ed   : > { %8708 = vmatpush1.bf16.msra.mxu0 %v8707_v5 }
 0x8ee   : > { %7920 = vmatprep.subr.mxu0 %v9121_v51 }
 0x993   : > { %v3227_v12 = vpop.f32.mrb[20].mxu0 }
 0x994   : > { %v3246_v13 = vadd.f32 %v3239_v11, %v3227_v12  ;;  %v3229_v14 = vpop.f32.mrb[21].mxu0  ;;  %v7296_v11 = vld [vmem:[%s9181_s19 + $0x250] sm:$0xff] }
 0x995   : > { %v3247_v15 = vadd.f32 %v3243_v20, %v3229_v14  ;;  %v7297_v20 = vld [vmem:[%s9181_s19 + $0x258] sm:$0xff]  ;;  %v7298_v14 = vld [vmem:[%s9181_s19 + $0x260] sm:$0xff] }
 0x996   : > { %v3248_v16 = vmul.f32 0.2, %v3246_v13 }
 0x997   : > { %v3249_v17 = vmul.f32 0.2, %v3247_v15 }
 0x998   : > { %v9775_v18 = vmax.f32 %v3246_v13, %v3248_v16  ;;  %v8749_v13 = vpack.c.bf16 %v7297_v20, %v7296_v11  ;;  %v3977_v11 = vld [vmem:[%s10363_s7 + $0x70] sm:$0xff]  ;;  %v3978_v20 = vld [vmem:[%s10363_s7 + $0x78] sm:$0xff] }
 0x999   : > { %v9777_v19 = vmax.f32 %v3247_v15, %v3249_v17  ;;  %v7299_v15 = vld [vmem:[%s9181_s19 + $0x268] sm:$0xff]  ;;  %v7300_v17 = vld [vmem:[%s9181_s19 + $0x270] sm:$0xff] }
 0x99a   : > { %3252 = vst [vmem:[%s1095_s2] sm:$0x3f] %v9775_v18  ;;  %v8752_v16 = vpack.c.bf16 %v7299_v15, %v7298_v14  ;;  %v3980_v14 = vld [vmem:[%s10363_s7 + $0x88] sm:$0xff] }
 0x99b   : > { %3254 = vst.msk [vmem:[%s1095_s2 + $0x8] sm:$0x3f] %vm3253_vm12, %v9777_v19  ;;  %7235 = vmatprep.mubr.msk.f32.mxu1 %vm3279_vm13, %v9777_v19  ;;  %7260 = vmatprep.mubr.msk.f32.mxu0 %vm3279_vm13, %v9777_v19  ;;  %s10370_s2 = sld [smem:[#allocation6_spill]] }
 0x99c   : > { %3348 = vmatmul.mubr.f32.vlgmr.msra.gmra.mrb[20].mxu1 %v9775_v18  ;;  %3444 = vmatmul.mubr.f32.vlgmr.msra.gmra.mrb[24].mxu0 %v9775_v18 }
 0x99d   : > { %7912 = vmatprep.mubr.msk.f32.mxu1 %vm9120_vm3, %v9121_v51  ;;  %7922 = vmatprep.mubr.msk.f32.mxu0 %vm9120_vm3, %v9121_v51 }
 0xa6f   : > { %v3349_v59 = vpop.f32.mrb[20].mxu1  ;;  %v3445_v63 = vpop.f32.mrb[24].mxu0 }
 0xa70   : > { %v3351_v23 = vpop.f32.mrb[21].mxu1  ;;  %v3447_v24 = vpop.f32.mrb[25].mxu0  ;;  %7911 = vmatpush3.msk.msra.mxu1 %vm3455_vm14, %v3445_v63  ;;  %v7303_v63 = vld [vmem:[%s9181_s19 + $0x288] sm:$0xff] }
 0xa71   : > { %7913 = vmatmul.mubr.msk.f32.vlgmr.msra.gmra.mrb[22].mxu1 %vm3451_vm15, %v7261_v57  ;;  %7915 = vmatprep.subr.mxu1 %v9121_v51  ;;  %v7301_v57 = vld [vmem:[%s9181_s19 + $0x278] sm:$0xff] }
 0xa72   : > { %7916 = vmatpush3.msk.msra.mxu1 %vm3455_vm14, %v3349_v59  ;;  %7917 = vmatprep.mubr.msk.f32.mxu1 %vm9120_vm3, %v9121_v51  ;;  %v8755_v59 = vpack.c.bf16 %v7301_v57, %v7300_v17  ;;  %v7305_v23 = vld [vmem:[%s9181_s19 + $0x298] sm:$0xff]  ;;  %v9076_v57 = vld [vmem:[%s9328_s18 + $0x10] sm:$0xff] }
 0xa73   : > { %8709 = vmatprep.subr.bf16.mxu1 %v9119_v3  ;;  %v8761_v24 = vpack.c.bf16 %v7305_v23, %v7304_v22  ;;  %v9075_v17 = vld [vmem:[%s9328_s18 + $0x18] sm:$0xff] }
 0xa75   : > { %7918 = vmatmul.mubr.msk.f32.vlgmr.msra.gmra.mrb[24].mxu1 %vm3451_vm15, %v3353_v25  ;;  %v7306_v25 = vld [vmem:[%s9181_s19 + $0x2a0] sm:$0xff] }
 0xa76   : > { %8711 = vmatpush1.bf16.msra.mxu1 %v8710_v26  ;;  %7290 = vmatprep.mubr.msk.f32.mxu1 %vm3279_vm13, %v9777_v19  ;;  %v7307_v26 = vld [vmem:[%s9181_s19 + $0x2a8] sm:$0xff] }
 0xa77   : > { %8712 = vmatprep.subr.bf16.mxu1 %v9119_v3  ;;  %v8764_v27 = vpack.c.bf16 %v7307_v26, %v7306_v25  ;;  %v4130_v26 = vld [vmem:[%s10366_s0] sm:$0xff] }
 0xa7a   : > { %8714 = vmatpush1.bf16.msra.mxu1 %v8713_v29  ;;  %v7309_v29 = vld [vmem:[%s9181_s19 + $0x2b8] sm:$0xff] }
 0xa7b   : > { %8715 = vmatprep.subr.bf16.mxu1 %v9119_v3  ;;  %v8767_v30 = vpack.c.bf16 %v7309_v29, %v7308_v28 }
 0xa7e   : > { %8717 = vmatpush1.bf16.msra.mxu1 %v8716_v32  ;;  %v7311_v32 = vld [vmem:[%s9181_s19 + $0x2c8] sm:$0xff] }
 0xa7f   : > { %8718 = vmatprep.subr.bf16.mxu1 %v9119_v3  ;;  %v8770_v33 = vpack.c.bf16 %v7311_v32, %v7310_v31  ;;  %v4132_v32 = vld [vmem:[%s10366_s0 + $0x10] sm:$0xff] }
 0xa82   : > { %8720 = vmatpush1.bf16.msra.mxu1 %v8719_v35  ;;  %v7313_v35 = vld [vmem:[%s9181_s19 + $0x2d8] sm:$0xff] }
 0xa83   : > { %8721 = vmatprep.subr.bf16.mxu1 %v9119_v3  ;;  %v8773_v36 = vpack.c.bf16 %v7313_v35, %v7312_v34  ;;  %v4134_v35 = vld [vmem:[%s10366_s0 + $0x20] sm:$0xff] }
 0xa86   : > { %8723 = vmatpush1.bf16.msra.mxu1 %v8722_v38  ;;  %v7315_v38 = vld [vmem:[%s9181_s19 + $0x2e8] sm:$0xff] }
 0xa87   : > { %8724 = vmatprep.subr.bf16.mxu1 %v9119_v3  ;;  %v8776_v39 = vpack.c.bf16 %v7315_v38, %v7314_v37  ;;  %v4136_v38 = vld [vmem:[%s10366_s0 + $0x30] sm:$0xff] }
 0xa8a   : > { %8726 = vmatpush1.bf16.msra.mxu1 %v8725_v42  ;;  %v7317_v42 = vld [vmem:[%s9181_s19 + $0x2f8] sm:$0xff] }
 0xa8b   : > { %8727 = vmatprep.subr.bf16.mxu1 %v9119_v3  ;;  %v8779_v43 = vpack.c.bf16 %v7317_v42, %v7316_v40  ;;  %v4138_v42 = vld [vmem:[%s10366_s0 + $0x40] sm:$0xff] }
 0xa8e   : > { %8729 = vmatpush1.bf16.msra.mxu1 %v8728_v44 }
 0xa8f   : > { %8730 = vmatprep.subr.bf16.mxu1 %v9119_v3 }
 0xa92   : > { %8732 = vmatpush1.bf16.msra.mxu1 %v8731_v47  ;;  %v3964_v47 = vld [vmem:[%s10363_s7 + $0x8] sm:$0xff] }
 0xa93   : > { %8733 = vmatprep.subr.bf16.mxu1 %v9119_v3  ;;  %v8782_v49 = vpack.c.bf16 %v3964_v47, %v3963_v46  ;;  %v7330_v46 = vld [vmem:[%s10366_s0 + $0x60] sm:$0xff] }
 0xa96   : > { %8735 = vmatpush1.bf16.msra.mxu1 %v8734_v50 }
 0xa97   : > { %8736 = vmatprep.subr.bf16.mxu1 %v9119_v3 }
 0xa9a   : > { %8738 = vmatpush1.bf16.msra.mxu1 %v8737_v55  ;;  %v8785_v55 = vpack.c.bf16 %v3966_v54, %v3965_v52  ;;  %v7332_v52 = vld [vmem:[%s10366_s0 + $0x70] sm:$0xff] }
 0xa9b   : > { %8739 = vmatprep.subr.bf16.mxu1 %v9119_v3 }
 0xa9e   : > { %8741 = vmatpush1.bf16.msra.mxu1 %v8740_v60  ;;  %v3968_v60 = vld [vmem:[%s10363_s7 + $0x28] sm:$0xff] }
 0xa9f   : > { %8742 = vmatprep.subr.bf16.mxu1 %v9119_v3  ;;  %v8788_v61 = vpack.c.bf16 %v3968_v60, %v3967_v58  ;;  %v7335_v58 = vld [vmem:[%s10366_s0 + $0x88] sm:$0xff] }
 0xaa2   : > { %8744 = vmatpush1.bf16.msra.mxu1 %v8743_v0  ;;  %v3970_v0 = vld [vmem:[%s10363_s7 + $0x38] sm:$0xff] }
 0xaa3   : > { %7925 = vmatprep.subr.mxu1 %v9121_v51 }
 0xaa5   : > { %3695 = vmatmul.mubr.f32.vlgmr.msra.gmra.mrb[26].mxu1 %v9775_v18 }
 0xaa6   : > { %7927 = vmatprep.mubr.msk.f32.mxu1 %vm9120_vm3, %v9121_v51 }
 0xb44   : > { %v3525_v53 = vpop.f32.mrb[22].mxu1 }
 0xb45   : > { %v7914_v1 = vpop.f32.mrb[23].mxu1 }
 0xb46   : > { %v3971_v1 = vld [vmem:[%s10363_s7 + $0x40] sm:$0xff] }
 0xb48   : > { %v3601_v2 = vpop.f32.mrb[24].mxu1 }
 0xb49   : > { %v9842_v4 = vadd.f32 %v3601_v2, %v3525_v53  ;;  %v7919_v5 = vpop.f32.mrb[25].mxu1  ;;  %v8791_v53 = vpack.c.bf16 %v3970_v0, %v3969_v62  ;;  %v3972_v2 = vld [vmem:[%s10363_s7 + $0x48] sm:$0xff]  ;;  %v7340_v0 = vld [vmem:[%s10366_s0 + $0x90] sm:$0xff] }
 0xb4a   : > { %v3973_v5 = vld [vmem:[%s10363_s7 + $0x50] sm:$0xff] }
 0xb4b   : > { %v8797_v7 = vpack.c.bf16 %v3974_v6, %v3973_v5  ;;  %v7342_v5 = vld [vmem:[%s10366_s0 + $0xa0] sm:$0xff]  ;;  %v7343_v6 = vld [vmem:[%s10366_s0 + $0xa8] sm:$0xff] }
 0xb78   : > { %v3696_v10 = vpop.f32.mrb[26].mxu1 }
 0xb79   : > { %v3698_v12 = vpop.f32.mrb[27].mxu1  ;;  %7921 = vmatpush3.msk.msra.mxu0 %vm3455_vm14, %v3696_v10 }
 0xb7a   : > { %7923 = vmatmul.mubr.msk.f32.vlgmr.msra.gmra.mrb[26].mxu0 %vm3451_vm15, %v7291_v8  ;;  %8745 = vmatprep.subr.bf16.mxu0 %v9119_v3  ;;  %v3975_v8 = vld [vmem:[%s10363_s7 + $0x60] sm:$0xff]  ;;  %v8803_v12 = vpack.c.bf16 %v3978_v20, %v3977_v11 }
 0xb7b   : > { %8747 = vmatpush1.bf16.msra.mxu0 %v8746_v9  ;;  %7318 = vmatprep.mubr.msk.f32.mxu0 %vm3279_vm13, %v9777_v19  ;;  %v7302_v19 = vld [vmem:[%s9181_s19 + $0x280] sm:$0xff]  ;;  %v3976_v9 = vld [vmem:[%s10363_s7 + $0x68] sm:$0xff] }
 0xb7c   : > { %8748 = vmatprep.subr.bf16.mxu0 %v9119_v3  ;;  %v8758_v21 = vpack.c.bf16 %v7303_v63, %v7302_v19  ;;  %v8800_v10 = vpack.c.bf16 %v3976_v9, %v3975_v8  ;;  %v7322_v19 = vld [vmem:[%s10364_s10] ss:$0 sm:$0xff]  ;;  %v8839_v8 = vpack.c.bf16 %v7343_v6, %v7342_v5  ;;  %v7344_v9 = vld [vmem:[%s10366_s0 + $0xb0] sm:$0xff]  ;;  %s10371_s10 = sld [smem:[#allocation8_spill]] }
 0xb7d   : > { %v7346_v20 = vld [vmem:[%s10366_s0 + $0xc0] sm:$0xff] }
 0xb7f   : > { %8750 = vmatpush1.bf16.msra.mxu0 %v8749_v13  ;;  %v3979_v13 = vld [vmem:[%s10363_s7 + $0x80] sm:$0xff] }
 0xb80   : > { %8751 = vmatprep.subr.bf16.mxu0 %v9119_v3  ;;  %v8806_v15 = vpack.c.bf16 %v3980_v14, %v3979_v13  ;;  %v7348_v14 = vld [vmem:[%s10366_s0 + $0xd0] sm:$0xff] }
 0xb83   : > { %8753 = vmatpush1.bf16.msra.mxu0 %v8752_v16  ;;  %v9074_v16 = vld [vmem:[%s9328_s18] sm:$0xff]  ;;  %s10368_s18 = sld [smem:[#allocation5_spill]] }
 0xb84   : > { %8754 = vmatprep.subr.bf16.mxu0 %v9119_v3 }
 0xb87   : > { %8756 = vmatpush1.bf16.msra.mxu0 %v8755_v59 }
 0xb88   : > { %8757 = vmatprep.subr.bf16.mxu0 %v9119_v3 }
 0xb89   : > { %v4212_v60 = vld [vmem:[%s10368_s18] sm:$0x1f] }
 0xb8b   : > { %8759 = vmatpush1.bf16.msra.mxu0 %v8758_v21 }
 0xb8c   : > { %8760 = vmatprep.subr.bf16.mxu0 %v9119_v3 }
 0xb8f   : > { %8762 = vmatpush1.bf16.msra.mxu0 %v8761_v24 }
 0xb90   : > { %8763 = vmatprep.subr.bf16.mxu0 %v9119_v3 }
 0xb93   : > { %8765 = vmatpush1.bf16.msra.mxu0 %v8764_v27  ;;  %v4131_v27 = vld [vmem:[%s10366_s0 + $0x8] sm:$0xff] }
 0xb94   : > { %8766 = vmatprep.subr.bf16.mxu0 %v9119_v3  ;;  %v8812_v31 = vpack.c.bf16 %v4131_v27, %v4130_v26 }
 0xb97   : > { %8768 = vmatpush1.bf16.msra.mxu0 %v8767_v30  ;;  %v4056_v30 = vld [vmem:[%s10367_s22] sm:$0xff]  ;;  %s10372_s22 = sld [smem:[#allocation10_spill]] }
 0xb98   : > { %8769 = vmatprep.subr.bf16.mxu0 %v9119_v3 }
 0xb9b   : > { %8771 = vmatpush1.bf16.msra.mxu0 %v8770_v33  ;;  %v4133_v33 = vld [vmem:[%s10366_s0 + $0x18] sm:$0xff] }
 0xb9c   : > { %8772 = vmatprep.subr.bf16.mxu0 %v9119_v3  ;;  %v8815_v34 = vpack.c.bf16 %v4133_v33, %v4132_v32  ;;  %v7359_v32 = vld [vmem:[%s10366_s0 + $0x110] sm:$0xff] }
 0xb9f   : > { %8774 = vmatpush1.bf16.msra.mxu0 %v8773_v36  ;;  %v4135_v36 = vld [vmem:[%s10366_s0 + $0x28] sm:$0xff] }
 0xba0   : > { %8775 = vmatprep.subr.bf16.mxu0 %v9119_v3  ;;  %v8818_v37 = vpack.c.bf16 %v4135_v36, %v4134_v35 }
 0xba3   : > { %8777 = vmatpush1.bf16.msra.mxu0 %v8776_v39  ;;  %v4137_v39 = vld [vmem:[%s10366_s0 + $0x38] sm:$0xff] }
 0xba4   : > { %8778 = vmatprep.subr.bf16.mxu0 %v9119_v3  ;;  %v8821_v40 = vpack.c.bf16 %v4137_v39, %v4136_v38  ;;  %v7362_v38 = vld [vmem:[%s10368_s18 + $0x18] sm:$0x1f] }
 0xba7   : > { %8780 = vmatpush1.bf16.msra.mxu0 %v8779_v43  ;;  %v7327_v43 = vld [vmem:[%s10366_s0 + $0x48] sm:$0xff] }
 0xba8   : > { %8808 = vmatprep.subr.bf16.mxu0 %v9119_v3 }
 0xbaa   : > { %3869 = vmatmul.mubr.f32.vlgmr.msra.gmra.mrb[28].mxu0 %v9775_v18 }
 0xbab   : > { %7934 = vmatprep.mubr.msk.f32.mxu0 %vm9120_vm3, %v9121_v51 }
 0xc4d   : > { %v3774_v41 = vpop.f32.mrb[26].mxu0 }
 0xc4e   : > { %v9890_v44 = vadd.f32 %v3774_v41, %v9842_v4  ;;  %v7924_v45 = vpop.f32.mrb[27].mxu0  ;;  %v8794_v4 = vpack.c.bf16 %v3972_v2, %v3971_v1  ;;  %v7328_v41 = vld [vmem:[%s10366_s0 + $0x50] sm:$0xff]  ;;  %v7337_v1 = vld [vmem:[%s10368_s18 + $0x8] sm:$0x1f] }
 0xc4f   : > { %v7329_v45 = vld [vmem:[%s10366_s0 + $0x58] sm:$0xff] }
 0xc7d   : > { %v3870_v50 = vpop.f32.mrb[28].mxu0 }
 0xc7e   : > { %v3872_v18 = vpop.f32.mrb[29].mxu0  ;;  %7926 = vmatpush3.msk.msra.mxu1 %vm3455_vm14, %v3870_v50  ;;  %v7331_v50 = vld [vmem:[%s10366_s0 + $0x68] sm:$0xff] }
 0xc7f   : > { %7928 = vmatmul.mubr.msk.f32.vlgmr.msra.gmra.mrb[28].mxu1 %vm3451_vm15, %v7319_v48  ;;  %8781 = vmatprep.subr.bf16.mxu1 %v9119_v3  ;;  %v8830_v54 = vpack.c.bf16 %v7332_v52, %v7331_v50  ;;  %v7333_v18 = vld [vmem:[%s10366_s0 + $0x78] sm:$0xff]  ;;  %v7369_v52 = vld [vmem:[%s10369_s28 + $0x40] sm:$0xff] }
 0xc80   : > { %8783 = vmatpush1.bf16.msra.mxu1 %v8782_v49  ;;  %7323 = vmatprep.mubr.msk.f32.mxu1 %vm1138_vm0, %v9073_v56  ;;  %v8827_v49 = vpack.c.bf16 %v7330_v46, %v7329_v45  ;;  %v7367_v45 = vld [vmem:[%s10369_s28 + $0x30] sm:$0xff]  ;;  %v7368_v50 = vld [vmem:[%s10369_s28 + $0x38] sm:$0xff] }
 0xc81   : > { %8784 = vmatprep.subr.bf16.mxu1 %v9119_v3 }
 0xc84   : > { %8786 = vmatpush1.bf16.msra.mxu1 %v8785_v55  ;;  %v7334_v55 = vld [vmem:[%s10366_s0 + $0x80] sm:$0xff] }
 0xc85   : > { %8787 = vmatprep.subr.bf16.mxu1 %v9119_v3  ;;  %v8833_v56 = vpack.c.bf16 %v7334_v55, %v7333_v18  ;;  %v4770_v18 = vld [vmem:[%s10369_s28 + $0x20] sm:$0xff]  ;;  %v7370_v55 = vld [vmem:[%s10369_s28 + $0x48] sm:$0xff] }
 0xc88   : > { %8789 = vmatpush1.bf16.msra.mxu1 %v8788_v61 }
 0xc89   : > { %8790 = vmatprep.subr.bf16.mxu1 %v9119_v3 }
 0xc8c   : > { %8792 = vmatpush1.bf16.msra.mxu1 %v8791_v53  ;;  %v7341_v53 = vld [vmem:[%s10366_s0 + $0x98] sm:$0xff] }
 0xc8d   : > { %8793 = vmatprep.subr.bf16.mxu1 %v9119_v3  ;;  %v8836_v2 = vpack.c.bf16 %v7341_v53, %v7340_v0 }
 0xc90   : > { %8795 = vmatpush1.bf16.msra.mxu1 %v8794_v4 }
 0xc91   : > { %8796 = vmatprep.subr.bf16.mxu1 %v9119_v3 }
 0xc94   : > { %8798 = vmatpush1.bf16.msra.mxu1 %v8797_v7 }
 0xc95   : > { %8799 = vmatprep.subr.bf16.mxu1 %v9119_v3 }
 0xc98   : > { %8801 = vmatpush1.bf16.msra.mxu1 %v8800_v10  ;;  %v7345_v10 = vld [vmem:[%s10366_s0 + $0xb8] sm:$0xff] }
 0xc99   : > { %8802 = vmatprep.subr.bf16.mxu1 %v9119_v3  ;;  %v8842_v11 = vpack.c.bf16 %v7345_v10, %v7344_v9  ;;  %v7379_v9 = vld [vmem:[%s10369_s28 + $0x60] sm:$0xff]  ;;  %v7380_v10 = vld [vmem:[%s10369_s28 + $0x68] sm:$0xff] }
 0xc9c   : > { %8804 = vmatpush1.bf16.msra.mxu1 %v8803_v12  ;;  %v7347_v12 = vld [vmem:[%s10366_s0 + $0xc8] sm:$0xff] }
 0xc9d   : > { %8805 = vmatprep.subr.bf16.mxu1 %v9119_v3  ;;  %v8845_v13 = vpack.c.bf16 %v7347_v12, %v7346_v20  ;;  %v8875_v12 = vpack.c.bf16 %v7380_v10, %v7379_v9 }
 0xca0   : > { %8807 = vmatpush1.bf16.msra.mxu1 %v8806_v15 }
 0xca1   : > { %7979 = vmatprep.subr.mxu1 %v9121_v51 }
 0xca3   : > { %4046 = vmatmul.mubr.f32.vlgmr.msra.gmra.mrb[30].mxu1 %v9074_v16 }
 0xca4   : > { %7324 = vmatprep.mubr.msk.f32.mxu1 %vm1138_vm0, %v9075_v17 }
 0xca7   : > { %4051 = vmatmul.mubr.f32.gmra.mrb[32].mxu1 %v9076_v57 }
 0xca8   : > { %7981 = vmatprep.mubr.msk.f32.mxu1 %vm9120_vm3, %v9121_v51 }
 0xd52   : > { %v3948_v59 = vpop.f32.mrb[28].mxu1 }
 0xd53   : > { %v3952_v63 = vadd.f32 %v3948_v59, %v9890_v44  ;;  %v7929_v21 = vpop.f32.mrb[29].mxu1  ;;  %v8824_v44 = vpack.c.bf16 %v7328_v41, %v7327_v43  ;;  %v4767_v43 = vld [vmem:[%s10369_s28 + $0x8] sm:$0xff] }
 0xd54   : > { %v7350_v21 = vld [vmem:[%s10368_s18 + $0x10] sm:$0x1f]  ;;  %v7366_v41 = vld [vmem:[%s10369_s28 + $0x28] sm:$0xff] }
 0xd55   : > { %v3960_v22 = vadd.f32 %v7322_v19, %v3952_v63  ;;  %v7352_v19 = vld [vmem:[%s10366_s0 + $0xd8] sm:$0xff]  ;;  %v7353_v63 = vld [vmem:[%s10366_s0 + $0xe0] sm:$0xff]  ;;  %v8866_v46 = vpack.c.bf16 %v7367_v45, %v7366_v41 }
 0xd57   : > { %3962 = vst.msk [vmem:[%s1099_s23] sm:$0x7f] %vm3961_vm1, %v3960_v22  ;;  %v8848_v22 = vpack.c.bf16 %v7353_v63, %v7352_v19  ;;  %v7387_v19 = vld [vmem:[%s10369_s28 + $0x80] sm:$0xff]  ;;  %v7383_v63 = vld [vmem:[%s10371_s10 + $0x8] sm:$0x7]  ;;  %s10373_s23 = sld [smem:[#allocation9_spill]] }
 0xd76   : > { %v4047_v23 = vpop.f32.mrb[30].mxu1 }
 0xd77   : > { %v4049_v24 = vpop.f32.mrb[31].mxu1 }
 0xd78   : > { %v7354_v24 = vld [vmem:[%s10366_s0 + $0xe8] sm:$0xff] }
 0xd7a   : > { %v4052_v25 = vpop.f32.mrb[32].mxu1 }
 0xd7b   : > { %v8809_v28 = vpack.c.bf16 %v4052_v25, %v4047_v23  ;;  %v4054_v29 = vpop.f32.mrb[33].mxu1  ;;  %v7355_v25 = vld [vmem:[%s10366_s0 + $0xf0] sm:$0xff] }
 0xd7c   : > { %v8851_v27 = vpack.c.bf16 %v7355_v25, %v7354_v24  ;;  %v7357_v29 = vld [vmem:[%s10366_s0 + $0x100] sm:$0xff]  ;;  %v7389_v24 = vld [vmem:[%s10369_s28 + $0x90] sm:$0xff] }
 0xd7d   : > { %8810 = vmatpush3.bf16.msra.mxu0 %v8809_v28  ;;  %v7356_v28 = vld [vmem:[%s10366_s0 + $0xf8] sm:$0xff] }
 0xd7e   : > { %8811 = vmatprep.subr.bf16.mxu0 %v9119_v3 }
 0xd80   : > { %7935 = vmatmul.mubr.msk.f32.vlgmr.msra.gmra.mrb[30].mxu0 %vm1138_vm0, %v4056_v30  ;;  %vm4295_vm0 = vcmask 64512   ;;  %v8854_v30 = vpack.c.bf16 %v7357_v29, %v7356_v28  ;;  %v7397_v28 = vld [vmem:[%s10372_s22 + $0x30] sm:$0xff]  ;;  %v7398_v29 = vld [vmem:[%s10372_s22 + $0x38] sm:$0xff] }
 0xd81   : > { %8813 = vmatpush3.bf16.msra.mxu0 %v8812_v31  ;;  %7955 = vmatprep.mubr.msk.f32.mxu0 %vm9120_vm3, %v9121_v51  ;;  %v7358_v31 = vld [vmem:[%s10366_s0 + $0x108] sm:$0xff] }
 0xd82   : > { %8814 = vmatprep.subr.bf16.mxu0 %v9119_v3  ;;  %v8857_v33 = vpack.c.bf16 %v7359_v32, %v7358_v31 }
 0xd85   : > { %8816 = vmatpush3.bf16.msra.mxu0 %v8815_v34  ;;  %v7360_v34 = vld [vmem:[%s10366_s0 + $0x118] sm:$0xff] }
 0xd86   : > { %8817 = vmatprep.subr.bf16.mxu0 %v9119_v3 }
 0xd89   : > { %8819 = vmatpush3.bf16.msra.mxu0 %v8818_v37 }
 0xd8a   : > { %8820 = vmatprep.subr.bf16.mxu0 %v9119_v3 }
 0xd8d   : > { %8822 = vmatpush3.bf16.msra.mxu0 %v8821_v40 }
 0xd8e   : > { %7953 = vmatprep.subr.mxu0 %v9121_v51 }
 0xd91   : > { %7954 = vmatpush3.msra.mxu0 %v4138_v42  ;;  %v4766_v42 = vld [vmem:[%s10369_s28] sm:$0xff] }
 0xd92   : > { %8823 = vmatprep.subr.bf16.mxu0 %v9119_v3 }
 0xe53   : > { %v9958_v47 = vpop.f32.mrb[30].mxu0 }
 0xe54   : > { %v7936_v48 = vpop.f32.mrb[31].mxu0  ;;  %7956 = vmatmul.mubr.msk.f32.vlgmr.msra.gmra.mrb[32].mxu0 %vm1854_vm2, %v9958_v47 }
 0xe55   : > { %8825 = vmatpush3.bf16.msra.mxu0 %v8824_v44  ;;  %7976 = vmatprep.mubr.msk.f32.mxu0 %vm9120_vm3, %v9121_v51  ;;  %v8860_v44 = vpack.c.bf16 %v4767_v43, %v4766_v42  ;;  %v4769_v48 = vld [vmem:[%s10369_s28 + $0x18] sm:$0xff]  ;;  %v7399_v43 = vld [vmem:[%s10372_s22 + $0x40] sm:$0xff] }
 0xe56   : > { %8826 = vmatprep.subr.bf16.mxu0 %v9119_v3  ;;  %v5401_v42 = vld [vmem:[%s10372_s22 + $0x18] sm:$0xff] }
 0xe59   : > { %8828 = vmatpush3.bf16.msra.mxu0 %v8827_v49 }
 0xe5a   : > { %8829 = vmatprep.subr.bf16.mxu0 %v9119_v3 }
 0xe5d   : > { %8831 = vmatpush3.bf16.msra.mxu0 %v8830_v54  ;;  %v8869_v54 = vpack.c.bf16 %v7369_v52, %v7368_v50  ;;  %v7402_v50 = vld [vmem:[%s10372_s22 + $0x58] sm:$0xff] }
 0xe5e   : > { %8832 = vmatprep.subr.bf16.mxu0 %v9119_v3 }
 0xe61   : > { %8834 = vmatpush3.bf16.msra.mxu0 %v8833_v56 }
 0xe62   : > { %7974 = vmatprep.subr.mxu0 %v9121_v51 }
 0xe65   : > { %7975 = vmatpush3.msra.mxu0 %v7335_v58  ;;  %v7364_v58 = vld [vmem:[%s10370_s2] ss:$0 sm:$0xff]  ;;  %s10374_s2 = sld [smem:[#allocation11_spill]] }
 0xe66   : > { %7977 = vmatmul.mubr.msk.f32.vlgmr.msra.gmra.mrb[34].mxu0 %vm1854_vm2, %v9958_v47  ;;  %7984 = vmatprep.subr.mxu0 %v9121_v51 }
 0xe67   : > { %7986 = vmatprep.mubr.msk.f32.mxu0 %vm9120_vm3, %v9121_v51 }
 0xf27   : > { %v4208_v61 = vpop.f32.mrb[32].mxu0 }
 0xf28   : > { %v7957_v62 = vpop.f32.mrb[33].mxu0  ;;  %7985 = vmatpush3.msra.mxu0 %v4208_v61 }
 0xf29   : > { %7987 = vmatmul.mubr.msk.f32.vlgmr.msra.gmra.mrb[36].mxu0 %vm4295_vm0, %v4212_v60  ;;  %8010 = vmatprep.subr.mxu0 %v9121_v51 }
 0xf2a   : > { %8012 = vmatprep.mubr.msk.f32.mxu0 %vm9120_vm3, %v9121_v51 }
 0xf39   : > { %v4289_v4 = vpop.f32.mrb[34].mxu0 }
 0xf3a   : > { %v7978_v7 = vpop.f32.mrb[35].mxu0  ;;  %7980 = vmatpush3.msra.mxu1 %v4289_v4  ;;  %v7372_v4 = vld [vmem:[%s10371_s10 + $0x4] sm:$0x7] }
 0xf3b   : > { %8835 = vmatprep.subr.bf16.mxu1 %v9119_v3  ;;  %7982 = vmatmul.mubr.msk.f32.vlgmr.msra.gmra.mrb[34].mxu1 %vm4295_vm0, %v7337_v1  ;;  %v7377_v1 = vld [vmem:[%s10369_s28 + $0x50] sm:$0xff] }
 0xf3c   : > { %8837 = vmatpush3.bf16.msra.mxu1 %v8836_v2  ;;  %8007 = vmatprep.mubr.msk.f32.mxu1 %vm9120_vm3, %v9121_v51  ;;  %v7378_v2 = vld [vmem:[%s10369_s28 + $0x58] sm:$0xff] }
 0xf3d   : > { %8838 = vmatprep.subr.bf16.mxu1 %v9119_v3  ;;  %v8872_v5 = vpack.c.bf16 %v7378_v2, %v7377_v1 }
 0xf40   : > { %8840 = vmatpush3.bf16.msra.mxu1 %v8839_v8  ;;  %v4845_v8 = vld [vmem:[%s10371_s10] sm:$0x7] }
 0xf41   : > { %8841 = vmatprep.subr.bf16.mxu1 %v9119_v3 }
 0xf44   : > { %8843 = vmatpush3.bf16.msra.mxu1 %v8842_v11 }
 0xf45   : > { %8844 = vmatprep.subr.bf16.mxu1 %v9119_v3 }
 0xf48   : > { %8846 = vmatpush3.bf16.msra.mxu1 %v8845_v13  ;;  %v7381_v13 = vld [vmem:[%s10369_s28 + $0x70] sm:$0xff] }
 0xf49   : > { %8005 = vmatprep.subr.mxu1 %v9121_v51 }
 0xf4c   : > { %8006 = vmatpush3.msra.mxu1 %v7348_v14 }
 0xf4d   : > { %8008 = vmatmul.mubr.msk.f32.vlgmr.msra.gmra.mrb[36].mxu1 %vm1854_vm2, %v9958_v47  ;;  %8036 = vmatprep.subr.mxu1 %v9121_v51 }
 0xf4e   : > { %8038 = vmatprep.mubr.msk.f32.mxu1 %vm9120_vm3, %v9121_v51 }
 0xffc   : > { %v4438_v15 = vpop.f32.mrb[36].mxu0 }
 0xffd   : > { %v7988_v16 = vpop.f32.mrb[37].mxu0 }
0x100e   : > { %v4365_v17 = vpop.f32.mrb[34].mxu1 }
0x100f   : > { %v7983_v57 = vpop.f32.mrb[35].mxu1  ;;  %v4439_v59 = vadd.f32 %v4438_v15, %v4365_v17 }
0x1020   : > { %v4518_v23 = vpop.f32.mrb[36].mxu1 }
0x1021   : > { %v8009_v26 = vpop.f32.mrb[37].mxu1  ;;  %8011 = vmatpush3.msra.mxu0 %v4518_v23  ;;  %v7388_v23 = vld [vmem:[%s10369_s28 + $0x88] sm:$0xff] }
0x1022   : > { %8013 = vmatmul.mubr.msk.f32.vlgmr.msra.gmra.mrb[38].mxu0 %vm4295_vm0, %v7350_v21  ;;  %8847 = vmatprep.subr.bf16.mxu0 %v9119_v3  ;;  %v8881_v26 = vpack.c.bf16 %v7389_v24, %v7388_v23  ;;  %v7422_v23 = vld [vmem:[%s10372_s22 + $0xa8] sm:$0xff] }
0x1023   : > { %8849 = vmatpush3.bf16.msra.mxu0 %v8848_v22  ;;  %8033 = vmatprep.mubr.msk.f32.mxu0 %vm9120_vm3, %v9121_v51 }
0x1024   : > { %8850 = vmatprep.subr.bf16.mxu0 %v9119_v3 }
0x1027   : > { %8852 = vmatpush3.bf16.msra.mxu0 %v8851_v27  ;;  %v7390_v27 = vld [vmem:[%s10369_s28 + $0x98] sm:$0xff] }
0x1028   : > { %8853 = vmatprep.subr.bf16.mxu0 %v9119_v3 }
0x102b   : > { %8855 = vmatpush3.bf16.msra.mxu0 %v8854_v30  ;;  %v8893_v30 = vpack.c.bf16 %v7398_v29, %v7397_v28 }
0x102c   : > { %8856 = vmatprep.subr.bf16.mxu0 %v9119_v3 }
0x102f   : > { %8858 = vmatpush3.bf16.msra.mxu0 %v8857_v33 }
0x1030   : > { %8031 = vmatprep.subr.mxu0 %v9121_v51 }
0x1033   : > { %8032 = vmatpush3.msra.mxu0 %v7360_v34  ;;  %v5398_v34 = vld [vmem:[%s10372_s22] sm:$0xff] }
0x1034   : > { %8034 = vmatmul.mubr.msk.f32.vlgmr.msra.gmra.mrb[40].mxu0 %vm1854_vm2, %v9958_v47  ;;  %8865 = vmatprep.subr.bf16.mxu0 %v9119_v3  ;;  %v4768_v47 = vld [vmem:[%s10369_s28 + $0x10] sm:$0xff]  ;;  %vm4764_vm2 = vcmask 323584  }
0x1035   : > { %8064 = vmatprep.mubr.msk.f32.mxu0 %vm9120_vm3, %v9121_v51  ;;  %8867 = vmatpush3.bf16.msra.mxu0 %v8866_v46  ;;  %v8863_v49 = vpack.c.bf16 %v4769_v48, %v4768_v47  ;;  %v5402_v46 = vld [vmem:[%s10372_s22 + $0x20] sm:$0xff]  ;;  %v5403_v47 = vld [vmem:[%s10372_s22 + $0x28] sm:$0xff]  ;;  %v7401_v48 = vld [vmem:[%s10372_s22 + $0x50] sm:$0xff] }
0x1036   : > { %8868 = vmatprep.subr.bf16.mxu0 %v9119_v3  ;;  %v8899_v52 = vpack.c.bf16 %v7402_v50, %v7401_v48 }
0x1039   : > { %8870 = vmatpush3.bf16.msra.mxu0 %v8869_v54 }
0x103a   : > { %8062 = vmatprep.subr.mxu0 %v9121_v51 }
0x103d   : > { %8063 = vmatpush3.msra.mxu0 %v7370_v55 }
0x103e   : > { %8072 = vmatprep.subr.mxu0 %v9121_v51 }
0x10f5   : > { %v4593_v35 = vpop.f32.mrb[38].mxu0 }
0x10f6   : > { %v4597_v36 = vadd.f32 %v4593_v35, %v4439_v59  ;;  %v8014_v37 = vpop.f32.mrb[39].mxu0  ;;  %v7386_v59 = vld [vmem:[%s10369_s28 + $0x78] sm:$0xff]  ;;  %v5399_v35 = vld [vmem:[%s10372_s22 + $0x8] sm:$0xff] }
0x10f7   : > { %v8878_v21 = vpack.c.bf16 %v7387_v19, %v7386_v59  ;;  %v8884_v37 = vpack.c.bf16 %v5399_v35, %v5398_v34  ;;  %v7420_v59 = vld [vmem:[%s10372_s22 + $0x98] sm:$0xff]  ;;  %v7416_v19 = vld [vmem:[%s10374_s2 + $0x8] sm:$0xf] }
0x1107   : > { %v4674_v39 = vpop.f32.mrb[40].mxu0 }
0x1108   : > { %v8035_v40 = vpop.f32.mrb[41].mxu0  ;;  %8037 = vmatpush3.msra.mxu1 %v4674_v39 }
0x1109   : > { %8039 = vmatmul.mubr.msk.f32.vlgmr.msra.gmra.mrb[38].mxu1 %vm4295_vm0, %v7362_v38  ;;  %8859 = vmatprep.subr.bf16.mxu1 %v9119_v3  ;;  %v5400_v40 = vld [vmem:[%s10372_s22 + $0x10] sm:$0xff] }
0x110a   : > { %8051 = vmatprep.mubr.msk.f32.mxu1 %vm9120_vm3, %v9121_v51  ;;  %8861 = vmatpush3.bf16.msra.mxu1 %v8860_v44  ;;  %v8887_v41 = vpack.c.bf16 %v5401_v42, %v5400_v40  ;;  %v7400_v44 = vld [vmem:[%s10372_s22 + $0x48] sm:$0xff] }
0x110b   : > { %8862 = vmatprep.subr.bf16.mxu1 %v9119_v3  ;;  %v8896_v45 = vpack.c.bf16 %v7400_v44, %v7399_v43 }
0x110e   : > { %8864 = vmatpush3.bf16.msra.mxu1 %v8863_v49  ;;  %v8890_v49 = vpack.c.bf16 %v5403_v47, %v5402_v46 }
0x110f   : > { %8049 = vmatprep.subr.mxu1 %v9121_v51 }
0x1112   : > { %8050 = vmatpush3.msra.mxu1 %v4770_v18  ;;  %v7395_v18 = vld [vmem:[%s10373_s23] ss:$0 sm:$0xff]  ;;  %s10376_s23 = sld [smem:[#allocation12_spill]] }
0x1113   : > { %8067 = vmatprep.subr.mxu1 %v9121_v51 }
0x11dc   : > { %v4749_v56 = vpop.f32.mrb[38].mxu1 }
0x11dd   : > { %v4753_v60 = vadd.f32 %v4749_v56, %v4597_v36  ;;  %v8040_v61 = vpop.f32.mrb[39].mxu1  ;;  %v7392_v36 = vld [vmem:[%s10371_s10 + $0xc] sm:$0x7] }
0x11df   : > { %v4761_v62 = vadd.f32 %v7364_v58, %v4753_v60 }
0x11e1   : > { %v4762_v0 = vmul.f32 0.2, %v4761_v62 }
0x11e3   : > { %v4763_v53 = vmax.f32 %v4761_v62, %v4762_v0  ;;  %v7409_v62 = vld [vmem:[%s10372_s22 + $0x60] sm:$0xff]  ;;  %v7410_v0 = vld [vmem:[%s10372_s22 + $0x68] sm:$0xff] }
0x11e4   : > { %v8902_v1 = vpack.c.bf16 %v7410_v0, %v7409_v62 }
0x11e5   : > { %4765 = vst.msk [vmem:[%s1103_s11] sm:$0x1f] %vm4764_vm2, %v4763_v53  ;;  %8052 = vmatmul.mubr.msk.f32.vlgmr.msra.gmra.mrb[40].mxu1 %vm4771_vm4, %v4763_v53  ;;  %8065 = vmatmul.mubr.msk.f32.vlgmr.msra.gmra.mrb[42].mxu0 %vm4771_vm4, %v4763_v53  ;;  %s10340_s11 = sshll.u32 %s10381_s16, 2  ;;  %s10379_s16 = sld [smem:[#allocation15_spill]] }
0x11e6   : > { %8069 = vmatprep.mubr.msk.f32.mxu1 %vm9120_vm3, %v9121_v51  ;;  %8074 = vmatprep.mubr.msk.f32.mxu0 %vm9120_vm3, %v9121_v51  ;;  %s1107_s0 = scalar_lea.vmem %s9291_s4, %s10340_s11  ;;  %s10377_s11 = sld [smem:[#allocation14_spill]] }
0x12b8   : > { %v4841_v6 = vpop.f32.mrb[40].mxu1  ;;  %v4918_v7 = vpop.f32.mrb[42].mxu0 }
0x12b9   : > { %v8053_v11 = vpop.f32.mrb[41].mxu1  ;;  %v8066_v20 = vpop.f32.mrb[43].mxu0  ;;  %8068 = vmatpush3.msk.msra.mxu1 %vm2724_vm10, %v4918_v7  ;;  %8073 = vmatpush3.msk.msra.mxu0 %vm2724_vm10, %v4841_v6  ;;  %v7411_v6 = vld [vmem:[%s10372_s22 + $0x70] sm:$0xff]  ;;  %v7412_v7 = vld [vmem:[%s10372_s22 + $0x78] sm:$0xff] }
0x12ba   : > { %8871 = vmatprep.subr.bf16.mxu1 %v9119_v3  ;;  %8070 = vmatmul.mubr.msk.f32.vlgmr.msra.gmra.mrb[42].mxu1 %vm2720_vm11, %v7372_v4  ;;  %v8905_v10 = vpack.c.bf16 %v7412_v7, %v7411_v6  ;;  %v7413_v11 = vld [vmem:[%s10372_s22 + $0x80] sm:$0xff]  ;;  %v7414_v20 = vld [vmem:[%s10372_s22 + $0x88] sm:$0xff] }
0x12bb   : > { %8873 = vmatpush3.bf16.msra.mxu1 %v8872_v5  ;;  %8075 = vmatmul.mubr.msk.f32.vlgmr.msra.gmra.mrb[44].mxu0 %vm2720_vm11, %v4845_v8  ;;  %v5478_v5 = vld [vmem:[%s10374_s2] sm:$0xf] }
0x12bc   : > { %8874 = vmatprep.subr.bf16.mxu1 %v9119_v3  ;;  %8087 = vmatprep.mubr.msk.f32.mxu1 %vm9120_vm3, %v9121_v51 }
0x12bd   : > { %8090 = vmatprep.subr.mxu0 %v9121_v51  ;;  %8092 = vmatprep.mubr.msk.f32.mxu0 %vm9120_vm3, %v9121_v51 }
0x12bf   : > { %8876 = vmatpush3.bf16.msra.mxu1 %v8875_v12  ;;  %v8908_v12 = vpack.c.bf16 %v7414_v20, %v7413_v11 }
0x12c0   : > { %8085 = vmatprep.subr.mxu1 %v9121_v51 }
0x12c3   : > { %8086 = vmatpush3.msra.mxu1 %v7381_v13 }
0x12c4   : > { %8088 = vmatmul.mubr.msk.f32.vlgmr.msra.gmra.mrb[44].mxu1 %vm4771_vm4, %v4763_v53  ;;  %8108 = vmatprep.subr.mxu1 %v9121_v51 }
0x12c5   : > { %8110 = vmatprep.mubr.msk.f32.mxu1 %vm9120_vm3, %v9121_v51 }
0x138d   : > { %v4996_v14 = vpop.f32.mrb[42].mxu1 }
0x138e   : > { %v8071_v15 = vpop.f32.mrb[43].mxu1  ;;  %v5072_v16 = vpop.f32.mrb[44].mxu0 }
0x138f   : > { %v5073_v17 = vadd.f32 %v5072_v16, %v4996_v14  ;;  %v8076_v57 = vpop.f32.mrb[45].mxu0 }
0x1390   : > { %v7419_v57 = vld [vmem:[%s10372_s22 + $0x90] sm:$0xff] }
0x1397   : > { %v5148_v22 = vpop.f32.mrb[44].mxu1 }
0x1398   : > { %v8089_v25 = vpop.f32.mrb[45].mxu1  ;;  %8091 = vmatpush3.msk.msra.mxu0 %vm2724_vm10, %v5148_v22  ;;  %v7421_v22 = vld [vmem:[%s10372_s22 + $0xa0] sm:$0xff] }
0x1399   : > { %8093 = vmatmul.mubr.msk.f32.vlgmr.msra.gmra.mrb[46].mxu0 %vm2720_vm11, %v7383_v63  ;;  %8877 = vmatprep.subr.bf16.mxu0 %v9119_v3  ;;  %v8911_v63 = vpack.c.bf16 %v7420_v59, %v7419_v57  ;;  %v8914_v25 = vpack.c.bf16 %v7422_v23, %v7421_v22  ;;  %v7429_v22 = vld [vmem:[%s10376_s23] ss:$0 sm:$0xff] }
0x139a   : > { %8879 = vmatpush3.bf16.msra.mxu0 %v8878_v21  ;;  %8105 = vmatprep.mubr.msk.f32.mxu0 %vm9120_vm3, %v9121_v51 }
0x139b   : > { %8880 = vmatprep.subr.bf16.mxu0 %v9119_v3 }
0x139e   : > { %8882 = vmatpush3.bf16.msra.mxu0 %v8881_v26  ;;  %v7423_v26 = vld [vmem:[%s10372_s22 + $0xb0] sm:$0xff] }
0x139f   : > { %8103 = vmatprep.subr.mxu0 %v9121_v51 }
0x13a2   : > { %8104 = vmatpush3.msra.mxu0 %v7390_v27  ;;  %v7424_v27 = vld [vmem:[%s10372_s22 + $0xb8] sm:$0xff] }
0x13a3   : > { %8106 = vmatmul.mubr.msk.f32.vlgmr.msra.gmra.mrb[48].mxu0 %vm4771_vm4, %v4763_v53  ;;  %8892 = vmatprep.subr.bf16.mxu0 %v9119_v3  ;;  %v7404_v53 = vld [vmem:[%s10374_s2 + $0x4] sm:$0xf]  ;;  %v8917_v28 = vpack.c.bf16 %v7424_v27, %v7423_v26 }
0x13a4   : > { %8140 = vmatprep.mubr.msk.f32.mxu0 %vm9120_vm3, %v9121_v51  ;;  %8894 = vmatpush3.bf16.msra.mxu0 %v8893_v30 }
0x13a5   : > { %8895 = vmatprep.subr.bf16.mxu0 %v9119_v3 }
0x13a8   : > { %8897 = vmatpush3.bf16.msra.mxu0 %v8896_v45 }
0x13a9   : > { %8898 = vmatprep.subr.bf16.mxu0 %v9119_v3 }
0x13ac   : > { %8900 = vmatpush3.bf16.msra.mxu0 %v8899_v52 }
0x13ad   : > { %8148 = vmatprep.subr.mxu0 %v9121_v51 }
0x146c   : > { %v5226_v31 = vpop.f32.mrb[46].mxu0 }
0x146d   : > { %v5230_v32 = vadd.f32 %v5226_v31, %v5073_v17  ;;  %v8094_v33 = vpop.f32.mrb[47].mxu0 }
0x1476   : > { %v5303_v38 = vpop.f32.mrb[48].mxu0 }
0x1477   : > { %v8107_v39 = vpop.f32.mrb[49].mxu0  ;;  %8109 = vmatpush3.msk.msra.mxu1 %vm2724_vm10, %v5303_v38  ;;  %vm6211_vm10 = vcmask 31744  }
0x1478   : > { %8111 = vmatmul.mubr.msk.f32.vlgmr.msra.gmra.mrb[46].mxu1 %vm2720_vm11, %v7392_v36  ;;  %8883 = vmatprep.subr.bf16.mxu1 %v9119_v3 }
0x1479   : > { %8885 = vmatpush3.bf16.msra.mxu1 %v8884_v37  ;;  %8125 = vmatprep.mubr.msk.f32.mxu1 %vm9120_vm3, %v9121_v51 }
0x147a   : > { %8886 = vmatprep.subr.bf16.mxu1 %v9119_v3 }
0x147d   : > { %8888 = vmatpush3.bf16.msra.mxu1 %v8887_v41 }
0x147e   : > { %8889 = vmatprep.subr.bf16.mxu1 %v9119_v3 }
0x1481   : > { %8891 = vmatpush3.bf16.msra.mxu1 %v8890_v49 }
0x1482   : > { %8143 = vmatprep.subr.mxu1 %v9121_v51 }
0x154b   : > { %v5381_v54 = vpop.f32.mrb[46].mxu1 }
0x154c   : > { %v5385_v55 = vadd.f32 %v5381_v54, %v5230_v32  ;;  %v8112_v56 = vpop.f32.mrb[47].mxu1  ;;  %v7426_v54 = vld [vmem:[%s10374_s2 + $0xc] sm:$0xf]  ;;  %s1111_s2 = scalar_lea.vmem %s9296_s24, %s10378_s1  ;;  %s1115_s1 = scalar_lea.vmem %s9301_s12, %s9624_s26 }
0x154e   : > { %v5393_v58 = vadd.f32 %v7395_v18, %v5385_v55 }
0x1550   : > { %v5394_v60 = vmul.f32 0.2, %v5393_v58 }
0x1552   : > { %v10128_v61 = vmax.f32 %v5393_v58, %v5394_v60 }
0x1554   : > { %5397 = vst.msk [vmem:[%s1107_s0] sm:$0x7] %vm5396_vm5, %v10128_v61  ;;  %8126 = vmatmul.mubr.msk.f32.vlgmr.msra.gmra.mrb[48].mxu1 %vm5404_vm6, %v10128_v61  ;;  %8141 = vmatmul.mubr.msk.f32.vlgmr.msra.gmra.mrb[50].mxu0 %vm5404_vm6, %v10128_v61  ;;  %s10375_s0 = sld [smem:[#allocation13_spill]] }
0x1555   : > { %8145 = vmatprep.mubr.msk.f32.mxu1 %vm9120_vm3, %v9121_v51  ;;  %8150 = vmatprep.mubr.msk.f32.mxu0 %vm9120_vm3, %v9121_v51 }
0x155a   : > { %v7430_v29 = vld [vmem:[%s10375_s0 + $0x80] sm:$0xff]  ;;  %v7431_v30 = vld [vmem:[%s10375_s0 + $0x88] sm:$0xff]  ;;  %v7432_v32 = vld [vmem:[%s10375_s0 + $0x90] sm:$0xff] }
0x155b   : > { %v8944_v31 = vpack.c.bf16 %v7431_v30, %v7430_v29  ;;  %v7433_v33 = vld [vmem:[%s10375_s0 + $0x98] sm:$0xff]  ;;  %v7434_v35 = vld [vmem:[%s10375_s0 + $0xa0] sm:$0xff]  ;;  %v7435_v36 = vld [vmem:[%s10375_s0 + $0xa8] sm:$0xff] }
0x155c   : > { %v8947_v34 = vpack.c.bf16 %v7433_v33, %v7432_v32  ;;  %v8950_v37 = vpack.c.bf16 %v7435_v36, %v7434_v35  ;;  %v7436_v38 = vld [vmem:[%s10375_s0 + $0xb0] sm:$0xff]  ;;  %v7437_v39 = vld [vmem:[%s10375_s0 + $0xb8] sm:$0xff]  ;;  %v7438_v42 = vld [vmem:[%s10375_s0 + $0xc0] sm:$0xff] }
0x155d   : > { %v8953_v40 = vpack.c.bf16 %v7437_v39, %v7436_v38  ;;  %v7439_v43 = vld [vmem:[%s10375_s0 + $0xc8] sm:$0xff]  ;;  %v7440_v44 = vld [vmem:[%s10375_s0 + $0xd0] sm:$0xff]  ;;  %v7441_v45 = vld [vmem:[%s10375_s0 + $0xd8] sm:$0xff] }
0x155e   : > { %v8956_v41 = vpack.c.bf16 %v7439_v43, %v7438_v42  ;;  %v8959_v46 = vpack.c.bf16 %v7441_v45, %v7440_v44  ;;  %v6035_v50 = vld [vmem:[%s10375_s0] sm:$0xff]  ;;  %v6036_v52 = vld [vmem:[%s10375_s0 + $0x8] sm:$0xff]  ;;  %v6037_v56 = vld [vmem:[%s10375_s0 + $0x10] sm:$0xff] }
0x155f   : > { %v8920_v18 = vpack.c.bf16 %v6036_v52, %v6035_v50  ;;  %v6038_v58 = vld [vmem:[%s10375_s0 + $0x18] sm:$0xff]  ;;  %v6039_v62 = vld [vmem:[%s10375_s0 + $0x20] sm:$0xff]  ;;  %v6040_v0 = vld [vmem:[%s10375_s0 + $0x28] sm:$0xff] }
0x1560   : > { %v6044_v6 = vld [vmem:[%s10375_s0 + $0x48] sm:$0xff]  ;;  %v6047_v11 = vld [vmem:[%s10375_s0 + $0x60] sm:$0xff]  ;;  %v7444_v57 = vld [vmem:[%s10375_s0 + $0xf0] sm:$0xff] }
0x1561   : > { %v6048_v20 = vld [vmem:[%s10375_s0 + $0x68] sm:$0xff]  ;;  %v7453_v35 = vld [vmem:[%s10375_s0 + $0x110] sm:$0xff]  ;;  %v7454_v36 = vld [vmem:[%s10375_s0 + $0x118] sm:$0xff] }
0x1562   : > { %v7452_v29 = vld [vmem:[%s10375_s0 + $0x108] sm:$0xff]  ;;  %v8971_v39 = vpack.c.bf16 %v7454_v36, %v7453_v35  ;;  %v7458_v44 = vld [vmem:[%s10375_s0 + $0x138] sm:$0xff]  ;;  %v7489_v35 = vld [vmem:[%s10379_s16] ss:$0 sm:$0xff] }
0x1563   : > { %v7446_v30 = vld [vmem:[%s10377_s11 + $0x8] sm:$0x1f]  ;;  %v7462_v50 = vld [vmem:[%s10375_s0 + $0x158] sm:$0xff] }
0x1564   : > { %v7456_v42 = vld [vmem:[%s10375_s0 + $0x128] sm:$0xff] }
0x1627   : > { %v5474_v2 = vpop.f32.mrb[48].mxu1  ;;  %v5552_v4 = vpop.f32.mrb[50].mxu0 }
0x1628   : > { %v8127_v8 = vpop.f32.mrb[49].mxu1  ;;  %v8142_v9 = vpop.f32.mrb[51].mxu0  ;;  %8144 = vmatpush3.msk.msra.mxu1 %vm5562_vm7, %v5552_v4  ;;  %8149 = vmatpush3.msk.msra.mxu0 %vm5562_vm7, %v5474_v2  ;;  %v6042_v2 = vld [vmem:[%s10375_s0 + $0x38] sm:$0xff] }
0x1629   : > { %8901 = vmatprep.subr.bf16.mxu1 %v9119_v3  ;;  %8146 = vmatmul.mubr.msk.f32.vlgmr.msra.gmra.mrb[50].mxu1 %vm5558_vm8, %v7404_v53  ;;  %v8926_v53 = vpack.c.bf16 %v6040_v0, %v6039_v62  ;;  %v6045_v8 = vld [vmem:[%s10375_s0 + $0x50] sm:$0xff]  ;;  %v6046_v9 = vld [vmem:[%s10375_s0 + $0x58] sm:$0xff] }
0x162a   : > { %8903 = vmatpush3.bf16.msra.mxu1 %v8902_v1  ;;  %8151 = vmatmul.mubr.msk.f32.vlgmr.msra.gmra.mrb[52].mxu0 %vm5558_vm8, %v5478_v5  ;;  %v6041_v1 = vld [vmem:[%s10375_s0 + $0x30] sm:$0xff]  ;;  %v6043_v5 = vld [vmem:[%s10375_s0 + $0x40] sm:$0xff] }
0x162b   : > { %8904 = vmatprep.subr.bf16.mxu1 %v9119_v3  ;;  %8165 = vmatprep.mubr.msk.f32.mxu1 %vm9120_vm3, %v9121_v51  ;;  %v8929_v4 = vpack.c.bf16 %v6042_v2, %v6041_v1  ;;  %v8932_v7 = vpack.c.bf16 %v6044_v6, %v6043_v5  ;;  %v7470_v2 = vld [vmem:[%s10375_s0 + $0x180] sm:$0xff]  ;;  %v7467_v5 = vld [vmem:[%s10377_s11 + $0x10] sm:$0x1f] }
0x162c   : > { %8168 = vmatprep.subr.mxu0 %v9121_v51  ;;  %8170 = vmatprep.mubr.msk.f32.mxu0 %vm9120_vm3, %v9121_v51 }
0x162e   : > { %8906 = vmatpush3.bf16.msra.mxu1 %v8905_v10  ;;  %v8935_v10 = vpack.c.bf16 %v6046_v9, %v6045_v8  ;;  %v7472_v8 = vld [vmem:[%s10375_s0 + $0x190] sm:$0xff]  ;;  %v7473_v9 = vld [vmem:[%s10375_s0 + $0x198] sm:$0xff] }
0x162f   : > { %8907 = vmatprep.subr.bf16.mxu1 %v9119_v3 }
0x1632   : > { %8909 = vmatpush3.bf16.msra.mxu1 %v8908_v12  ;;  %v7442_v12 = vld [vmem:[%s10375_s0 + $0xe0] sm:$0xff] }
0x1633   : > { %8188 = vmatprep.subr.mxu1 %v9121_v51 }
0x1635   : > { %8166 = vmatmul.mubr.msk.f32.vlgmr.msra.gmra.mrb[52].mxu1 %vm5404_vm6, %v10128_v61 }
0x1636   : > { %8190 = vmatprep.mubr.msk.f32.mxu1 %vm9120_vm3, %v9121_v51 }
0x16fc   : > { %v5632_v13 = vpop.f32.mrb[50].mxu1 }
0x16fd   : > { %v8147_v14 = vpop.f32.mrb[51].mxu1  ;;  %v5708_v15 = vpop.f32.mrb[52].mxu0 }
0x16fe   : > { %v5709_v16 = vadd.f32 %v5708_v15, %v5632_v13  ;;  %v8152_v17 = vpop.f32.mrb[53].mxu0  ;;  %v8938_v13 = vpack.c.bf16 %v6048_v20, %v6047_v11  ;;  %v7443_v14 = vld [vmem:[%s10375_s0 + $0xe8] sm:$0xff]  ;;  %v8995_v11 = vpack.c.bf16 %v7473_v9, %v7472_v8  ;;  %v7474_v20 = vld [vmem:[%s10375_s0 + $0x1a0] sm:$0xff] }
0x16ff   : > { %v8962_v15 = vpack.c.bf16 %v7443_v14, %v7442_v12  ;;  %v6050_v17 = vld [vmem:[%s10375_s0 + $0x78] sm:$0xff]  ;;  %v7475_v12 = vld [vmem:[%s10375_s0 + $0x1a8] sm:$0xff]  ;;  %v7476_v14 = vld [vmem:[%s10375_s0 + $0x1b0] sm:$0xff] }
0x1708   : > { %v5785_v21 = vpop.f32.mrb[52].mxu1 }
0x1709   : > { %v8167_v24 = vpop.f32.mrb[53].mxu1  ;;  %8169 = vmatpush3.msk.msra.mxu0 %vm5562_vm7, %v5785_v21 }
0x170a   : > { %8171 = vmatmul.mubr.msk.f32.vlgmr.msra.gmra.mrb[54].mxu0 %vm5558_vm8, %v7416_v19  ;;  %8910 = vmatprep.subr.bf16.mxu0 %v9119_v3  ;;  %v7445_v19 = vld [vmem:[%s10375_s0 + $0xf8] sm:$0xff] }
0x170b   : > { %8912 = vmatpush3.bf16.msra.mxu0 %v8911_v63  ;;  %8185 = vmatprep.mubr.msk.f32.mxu0 %vm9120_vm3, %v9121_v51  ;;  %v8965_v63 = vpack.c.bf16 %v7445_v19, %v7444_v57  ;;  %v7481_v19 = vld [vmem:[%s10375_s0 + $0x1d8] sm:$0xff] }
0x170c   : > { %8913 = vmatprep.subr.bf16.mxu0 %v9119_v3 }
0x170f   : > { %8915 = vmatpush3.bf16.msra.mxu0 %v8914_v25 }
0x1710   : > { %8916 = vmatprep.subr.bf16.mxu0 %v9119_v3 }
0x1713   : > { %8918 = vmatpush3.bf16.msra.mxu0 %v8917_v28  ;;  %v7451_v28 = vld [vmem:[%s10375_s0 + $0x100] sm:$0xff] }
0x1714   : > { %8943 = vmatprep.subr.bf16.mxu0 %v9119_v3 }
0x1716   : > { %8186 = vmatmul.mubr.msk.f32.vlgmr.msra.gmra.mrb[56].mxu0 %vm5404_vm6, %v10128_v61  ;;  %v8923_v61 = vpack.c.bf16 %v6038_v58, %v6037_v56  ;;  %v7465_v56 = vld [vmem:[%s10375_s0 + $0x170] sm:$0xff]  ;;  %v7466_v58 = vld [vmem:[%s10375_s0 + $0x178] sm:$0xff] }
0x1717   : > { %8260 = vmatprep.mubr.msk.f32.mxu0 %vm9120_vm3, %v9121_v51  ;;  %8945 = vmatpush3.bf16.msra.mxu0 %v8944_v31  ;;  %v8968_v31 = vpack.c.bf16 %v7452_v29, %v7451_v28 }
0x1718   : > { %8946 = vmatprep.subr.bf16.mxu0 %v9119_v3 }
0x171b   : > { %8948 = vmatpush3.bf16.msra.mxu0 %v8947_v34  ;;  %v6121_v34 = vld [vmem:[%s10377_s11] sm:$0x1f] }
0x171c   : > { %8949 = vmatprep.subr.bf16.mxu0 %v9119_v3 }
0x171f   : > { %8951 = vmatpush3.bf16.msra.mxu0 %v8950_v37 }
0x1720   : > { %8952 = vmatprep.subr.bf16.mxu0 %v9119_v3 }
0x1723   : > { %8954 = vmatpush3.bf16.msra.mxu0 %v8953_v40  ;;  %v7455_v40 = vld [vmem:[%s10375_s0 + $0x120] sm:$0xff] }
0x1724   : > { %8955 = vmatprep.subr.bf16.mxu0 %v9119_v3  ;;  %v8974_v43 = vpack.c.bf16 %v7456_v42, %v7455_v40 }
0x1727   : > { %8957 = vmatpush3.bf16.msra.mxu0 %v8956_v41  ;;  %v7457_v41 = vld [vmem:[%s10375_s0 + $0x130] sm:$0xff] }
0x1728   : > { %8958 = vmatprep.subr.bf16.mxu0 %v9119_v3  ;;  %v8977_v45 = vpack.c.bf16 %v7458_v44, %v7457_v41 }
0x172b   : > { %8960 = vmatpush3.bf16.msra.mxu0 %v8959_v46  ;;  %v7459_v46 = vld [vmem:[%s10375_s0 + $0x140] sm:$0xff] }
0x172c   : > { %8961 = vmatprep.subr.bf16.mxu0 %v9119_v3 }
0x172f   : > { %8963 = vmatpush3.bf16.msra.mxu0 %v8962_v15  ;;  %v7477_v15 = vld [vmem:[%s10375_s0 + $0x1b8] sm:$0xff] }
0x1730   : > { %8964 = vmatprep.subr.bf16.mxu0 %v9119_v3 }
0x1733   : > { %8966 = vmatpush3.bf16.msra.mxu0 %v8965_v63 }
0x1734   : > { %8268 = vmatprep.subr.mxu0 %v9121_v51 }
0x17dd   : > { %v5863_v47 = vpop.f32.mrb[54].mxu0 }
0x17de   : > { %v5867_v48 = vadd.f32 %v5863_v47, %v5709_v16  ;;  %v8172_v49 = vpop.f32.mrb[55].mxu0  ;;  %v6049_v16 = vld [vmem:[%s10375_s0 + $0x70] sm:$0xff]  ;;  %v7460_v47 = vld [vmem:[%s10375_s0 + $0x148] sm:$0xff] }
0x17df   : > { %v8941_v59 = vpack.c.bf16 %v6050_v17, %v6049_v16  ;;  %v7461_v49 = vld [vmem:[%s10375_s0 + $0x150] sm:$0xff]  ;;  %v9001_v16 = vpack.c.bf16 %v7477_v15, %v7476_v14  ;;  %v7479_v17 = vld [vmem:[%s10375_s0 + $0x1c8] sm:$0xff] }
0x17e0   : > { %v8983_v52 = vpack.c.bf16 %v7462_v50, %v7461_v49 }
0x17e9   : > { %v5941_v55 = vpop.f32.mrb[56].mxu0 }
0x17ea   : > { %v8187_v60 = vpop.f32.mrb[57].mxu0  ;;  %8189 = vmatpush3.msk.msra.mxu1 %vm5562_vm7, %v5941_v55 }
0x17eb   : > { %8191 = vmatmul.mubr.msk.f32.vlgmr.msra.gmra.mrb[54].mxu1 %vm5558_vm8, %v7426_v54  ;;  %8919 = vmatprep.subr.bf16.mxu1 %v9119_v3  ;;  %v7463_v54 = vld [vmem:[%s10375_s0 + $0x160] sm:$0xff]  ;;  %v8989_v60 = vpack.c.bf16 %v7466_v58, %v7465_v56 }
0x17ec   : > { %8921 = vmatpush3.bf16.msra.mxu1 %v8920_v18  ;;  %8225 = vmatprep.mubr.msk.f32.mxu1 %vm9120_vm3, %v9121_v51  ;;  %v7464_v18 = vld [vmem:[%s10375_s0 + $0x168] sm:$0xff] }
0x17ed   : > { %8922 = vmatprep.subr.bf16.mxu1 %v9119_v3  ;;  %v8986_v55 = vpack.c.bf16 %v7464_v18, %v7463_v54 }
0x17f0   : > { %8924 = vmatpush3.bf16.msra.mxu1 %v8923_v61 }
0x17f1   : > { %8925 = vmatprep.subr.bf16.mxu1 %v9119_v3 }
0x17f4   : > { %8927 = vmatpush3.bf16.msra.mxu1 %v8926_v53 }
0x17f5   : > { %8928 = vmatprep.subr.bf16.mxu1 %v9119_v3 }
0x17f8   : > { %8930 = vmatpush3.bf16.msra.mxu1 %v8929_v4  ;;  %v7471_v4 = vld [vmem:[%s10375_s0 + $0x188] sm:$0xff] }
0x17f9   : > { %8931 = vmatprep.subr.bf16.mxu1 %v9119_v3  ;;  %v8992_v6 = vpack.c.bf16 %v7471_v4, %v7470_v2 }
0x17fc   : > { %8933 = vmatpush3.bf16.msra.mxu1 %v8932_v7 }
0x17fd   : > { %8934 = vmatprep.subr.bf16.mxu1 %v9119_v3 }
0x1800   : > { %8936 = vmatpush3.bf16.msra.mxu1 %v8935_v10 }
0x1801   : > { %8937 = vmatprep.subr.bf16.mxu1 %v9119_v3 }
0x1804   : > { %8939 = vmatpush3.bf16.msra.mxu1 %v8938_v13  ;;  %v8998_v13 = vpack.c.bf16 %v7475_v12, %v7474_v20 }
0x1805   : > { %8940 = vmatprep.subr.bf16.mxu1 %v9119_v3 }
0x1808   : > { %8942 = vmatpush3.bf16.msra.mxu1 %v8941_v59  ;;  %v7480_v59 = vld [vmem:[%s10375_s0 + $0x1d0] sm:$0xff] }
0x1809   : > { %8263 = vmatprep.subr.mxu1 %v9121_v51  ;;  %v9007_v63 = vpack.c.bf16 %v7481_v19, %v7480_v59 }
0x18be   : > { %v6019_v21 = vpop.f32.mrb[54].mxu1 }
0x18bf   : > { %v6023_v23 = vadd.f32 %v6019_v21, %v5867_v48  ;;  %v8192_v24 = vpop.f32.mrb[55].mxu1  ;;  %v8980_v48 = vpack.c.bf16 %v7460_v47, %v7459_v46  ;;  %v7482_v21 = vld [vmem:[%s10375_s0 + $0x1e0] sm:$0xff] }
0x18c0   : > { %v7484_v24 = vld [vmem:[%s10375_s0 + $0x1f0] sm:$0xff] }
0x18c1   : > { %v6031_v25 = vadd.f32 %v7429_v22, %v6023_v23  ;;  %v7483_v22 = vld [vmem:[%s10375_s0 + $0x1e8] sm:$0xff] }
0x18c2   : > { %v9010_v23 = vpack.c.bf16 %v7483_v22, %v7482_v21 }
0x18c3   : > { %v6032_v26 = vmul.f32 0.2, %v6031_v25 }
0x18c5   : > { %v10241_v27 = vmax.f32 %v6031_v25, %v6032_v26  ;;  %v7485_v25 = vld [vmem:[%s10375_s0 + $0x1f8] sm:$0xff] }
0x18c6   : > { %v9013_v26 = vpack.c.bf16 %v7485_v25, %v7484_v24 }
0x18c7   : > { %6034 = vst [vmem:[%s1111_s2] sm:$0xf] %v10241_v27  ;;  %8226 = vmatmul.mubr.f32.vlgmr.msra.gmra.mrb[56].mxu1 %v10241_v27  ;;  %8261 = vmatmul.mubr.f32.vlgmr.msra.gmra.mrb[58].mxu0 %v10241_v27 }
0x18c8   : > { %8265 = vmatprep.mubr.msk.f32.mxu1 %vm9120_vm3, %v9121_v51  ;;  %8270 = vmatprep.mubr.msk.f32.mxu0 %vm9120_vm3, %v9121_v51 }
0x199a   : > { %v6117_v32 = vpop.f32.mrb[56].mxu1  ;;  %v6205_v33 = vpop.f32.mrb[58].mxu0 }
0x199b   : > { %v8227_v37 = vpop.f32.mrb[57].mxu1  ;;  %v8262_v38 = vpop.f32.mrb[59].mxu0  ;;  %8264 = vmatpush3.msk.msra.mxu1 %vm6215_vm9, %v6205_v33  ;;  %8269 = vmatpush3.msk.msra.mxu0 %vm6215_vm9, %v6117_v32 }
0x199c   : > { %8967 = vmatprep.subr.bf16.mxu1 %v9119_v3  ;;  %8266 = vmatmul.mubr.msk.f32.vlgmr.msra.gmra.mrb[58].mxu1 %vm6211_vm10, %v7446_v30 }
0x199d   : > { %8969 = vmatpush3.bf16.msra.mxu1 %v8968_v31  ;;  %8271 = vmatmul.mubr.msk.f32.vlgmr.msra.gmra.mrb[60].mxu0 %vm6211_vm10, %v6121_v34  ;;  %v7486_v31 = vld [vmem:[%s10377_s11 + $0x18] sm:$0x1f] }
0x199e   : > { %8970 = vmatprep.subr.bf16.mxu1 %v9119_v3  ;;  %8305 = vmatprep.mubr.msk.f32.mxu1 %vm9120_vm3, %v9121_v51 }
0x199f   : > { %8308 = vmatprep.subr.mxu0 %v9121_v51  ;;  %8310 = vmatprep.mubr.msk.f32.mxu0 %vm9120_vm3, %v9121_v51 }
0x19a1   : > { %8972 = vmatpush3.bf16.msra.mxu1 %v8971_v39 }
0x19a2   : > { %8973 = vmatprep.subr.bf16.mxu1 %v9119_v3 }
0x19a5   : > { %8975 = vmatpush3.bf16.msra.mxu1 %v8974_v43 }
0x19a6   : > { %8976 = vmatprep.subr.bf16.mxu1 %v9119_v3 }
0x19a9   : > { %8978 = vmatpush3.bf16.msra.mxu1 %v8977_v45 }
0x19aa   : > { %8979 = vmatprep.subr.bf16.mxu1 %v9119_v3 }
0x19ad   : > { %8981 = vmatpush3.bf16.msra.mxu1 %v8980_v48 }
0x19ae   : > { %8982 = vmatprep.subr.bf16.mxu1 %v9119_v3 }
0x19b1   : > { %8984 = vmatpush3.bf16.msra.mxu1 %v8983_v52 }
0x19b2   : > { %8985 = vmatprep.subr.bf16.mxu1 %v9119_v3 }
0x19b5   : > { %8987 = vmatpush3.bf16.msra.mxu1 %v8986_v55 }
0x19b6   : > { %8988 = vmatprep.subr.bf16.mxu1 %v9119_v3 }
0x19b9   : > { %8990 = vmatpush3.bf16.msra.mxu1 %v8989_v60 }
0x19ba   : > { %8348 = vmatprep.subr.mxu1 %v9121_v51 }
0x19bc   : > { %8306 = vmatmul.mubr.f32.vlgmr.msra.gmra.mrb[60].mxu1 %v10241_v27 }
0x19bd   : > { %8350 = vmatprep.mubr.msk.f32.mxu1 %vm9120_vm3, %v9121_v51 }
0x1a6f   : > { %v6285_v61 = vpop.f32.mrb[58].mxu1 }
0x1a70   : > { %v8267_v62 = vpop.f32.mrb[59].mxu1  ;;  %v6361_v0 = vpop.f32.mrb[60].mxu0 }
0x1a71   : > { %v6362_v53 = vadd.f32 %v6361_v0, %v6285_v61  ;;  %v8272_v1 = vpop.f32.mrb[61].mxu0 }
0x1a8f   : > { %v6448_v7 = vpop.f32.mrb[60].mxu1 }
0x1a90   : > { %v8307_v10 = vpop.f32.mrb[61].mxu1  ;;  %8309 = vmatpush3.msk.msra.mxu0 %vm6215_vm9, %v6448_v7 }
0x1a91   : > { %8311 = vmatmul.mubr.msk.f32.vlgmr.msra.gmra.mrb[62].mxu0 %vm6211_vm10, %v7467_v5  ;;  %8991 = vmatprep.subr.bf16.mxu0 %v9119_v3 }
0x1a92   : > { %8993 = vmatpush3.bf16.msra.mxu0 %v8992_v6  ;;  %8345 = vmatprep.mubr.msk.f32.mxu0 %vm9120_vm3, %v9121_v51  ;;  %v7478_v51 = vld [vmem:[%s10375_s0 + $0x1c0] sm:$0xff]  ;;  %vm6705_vm3 = vcmask 36864  }
0x1a93   : > { %8994 = vmatprep.subr.bf16.mxu0 %v9119_v3  ;;  %v9004_v57 = vpack.c.bf16 %v7479_v17, %v7478_v51 }
0x1a96   : > { %8996 = vmatpush3.bf16.msra.mxu0 %v8995_v11 }
0x1a97   : > { %8997 = vmatprep.subr.bf16.mxu0 %v9119_v3 }
0x1a9a   : > { %8999 = vmatpush3.bf16.msra.mxu0 %v8998_v13 }
0x1a9b   : > { %9000 = vmatprep.subr.bf16.mxu0 %v9119_v3 }
0x1a9e   : > { %9002 = vmatpush3.bf16.msra.mxu0 %v9001_v16 }
0x1a9f   : > { %9003 = vmatprep.subr.bf16.mxu0 %v9119_v3 }
0x1aa2   : > { %9005 = vmatpush3.bf16.msra.mxu0 %v9004_v57 }
0x1aa3   : > { %9006 = vmatprep.subr.bf16.mxu0 %v9119_v3 }
0x1aa6   : > { %9008 = vmatpush3.bf16.msra.mxu0 %v9007_v63 }
0x1aa7   : > { %9009 = vmatprep.subr.bf16.mxu0 %v9119_v3 }
0x1aaa   : > { %9011 = vmatpush3.bf16.msra.mxu0 %v9010_v23 }
0x1aab   : > { %9012 = vmatprep.subr.bf16.mxu0 %v9119_v3 }
0x1aae   : > { %9014 = vmatpush3.bf16.msra.mxu0 %v9013_v26 }
0x1ab1   : > { %8346 = vmatmul.mubr.f32.vlgmr.msra.gmra.mrb[64].mxu0 %v10241_v27 }
0x1b64   : > { %v6526_v28 = vpop.f32.mrb[62].mxu0 }
0x1b65   : > { %v6530_v29 = vadd.f32 %v6526_v28, %v6362_v53  ;;  %v8312_v30 = vpop.f32.mrb[63].mxu0 }
0x1b84   : > { %v6614_v32 = vpop.f32.mrb[64].mxu0 }
0x1b85   : > { %v8347_v33 = vpop.f32.mrb[65].mxu0  ;;  %8349 = vmatpush3.msk.msra.mxu1 %vm6215_vm9, %v6614_v32 }
0x1b86   : > { %8351 = vmatmul.mubr.msk.f32.vlgmr.msra.gmra.mrb[62].mxu1 %vm6211_vm10, %v7486_v31 }
0x1c59   : > { %v6692_v34 = vpop.f32.mrb[62].mxu1 }
0x1c5a   : > { %v6696_v36 = vadd.f32 %v6692_v34, %v6530_v29  ;;  %v8352_v37 = vpop.f32.mrb[63].mxu1 }
0x1c5c   : > { %v6704_v3 = vadd.f32 %v7489_v35, %v6696_v36 }
0x1c5e   : > { %6706 = vst.msk [vmem:[%s1115_s1] sm:$0x1f] %vm6705_vm3, %v6704_v3 }
0x1c5f PF: > { %s80_s15 = sadd.s32 1, %s9083_s15  }
0x1c60   : > { %p77_p4 = scmp.ge.s32.totalorder %s80_s15, 4  }
0x1c62   :  { %79 = sbr.rel (!%p77_p4) target bundleno = 60 (0x3c), region = 324 }

</bundles_post_ra>
